<compile_context>
chip_gen: v5e
topology: v5e:2x2
jax: 0.10.0
libtpu: 0.0.40
codegen_flags: <defaults>
</compile_context>

<pallas_src>
import functools

import jax
import jax.numpy as jnp
from jax.experimental import pallas as pl
from jax.experimental.pallas import tpu as pltpu


def _up_fused_kernel(*refs, H0, W0, C0, C1, CM, CO, has_skip):
    if has_skip:
        x0_ref, x1_ref, mask_ref, w1_ref, b1_ref, w2_ref, b2_ref, o_ref = refs
    else:
        x0_ref, mask_ref, w1_ref, b1_ref, w2_ref, b2_ref, o_ref = refs
        x1_ref = None

    f32 = jnp.float32
    OH, OW = 2 * H0, 2 * W0
    WP = OW + 2          # padded row width: OW data cols + 2 zero junk cols
    M = OH * WP          # flattened spatial extent seen by the convs (incl. junk cols)

    # ---------------- bilinear 2x upsample of x0: {0.25, 0.75} shift+blend ----------------
    x = x0_ref[0].astype(f32)                                   # (H0, W0, C0)
    # W axis (sublane axis of this layout): clamp-shifted neighbours, blend, interleave.
    xl = jnp.concatenate([x[:, :1], x[:, :W0 - 1]], axis=1)     # col k-1 (clamped)
    xr = jnp.concatenate([x[:, 1:], x[:, W0 - 1:]], axis=1)     # col k+1 (clamped)
    even_w = 0.25 * xl + 0.75 * x                                # output cols 2k
    odd_w = 0.75 * x + 0.25 * xr                                 # output cols 2k+1
    yw = jnp.concatenate([even_w[:, :, None, :], odd_w[:, :, None, :]],
                         axis=2).reshape(H0, OW, C0)             # (H0, OW, C0)
    # H axis (outer axis): same fixed blend.
    yu = jnp.concatenate([yw[:1], yw[:H0 - 1]], axis=0)
    yd = jnp.concatenate([yw[1:], yw[H0 - 1:]], axis=0)
    even_h = 0.25 * yu + 0.75 * yw
    odd_h = 0.75 * yw + 0.25 * yd
    up = jnp.concatenate([even_h[:, None], odd_h[:, None]],
                         axis=1).reshape(OH, OW, C0)             # (OH, OW, C0)

    # -------- conv-1 padded input as a value: rows flattened with a WP stride --------
    def flat_pad(img, c):
        # (OH, OW, c) -> (OH*WP, c): append 2 zero cols per row, flatten rows.
        img = jnp.concatenate([img, jnp.zeros((OH, WP - OW, c), f32)], axis=1)
        return img.reshape(OH * WP, c)

    if has_skip:
        x1 = x1_ref[0].astype(f32)                               # (OH, OW, C1)
        interior = jnp.concatenate([flat_pad(up, C0), flat_pad(x1, C1)], axis=1)
        cin1 = C0 + C1
    else:
        interior = flat_pad(up, C0)
        cin1 = C0
    zrow = jnp.zeros((2 * WP, cin1), f32)                        # 2 zero halo rows
    f01 = jnp.concatenate([zrow, interior, zrow], axis=0)        # ((OH+4)*WP, cin1)

    # ---- conv1 (+ folded BN + ReLU): single fat MXU dot, output (CM, M) lane-dense ----
    # im2col: each 3x3 tap is a contiguous row-offset slice of the fixed flat layout.
    p1 = jnp.concatenate(
        [f01[(dy + 1) * WP + dx - 1:(dy + 1) * WP + dx - 1 + M]
         for dy in range(3) for dx in range(3)], axis=1)         # (M, 9*cin1)
    acc1 = jax.lax.dot_general(w1_ref[...], p1, (((1,), (1,)), ((), ())),
                               preferred_element_type=f32)       # (CM, M)
    # bias (BN folded) + ReLU + zero the 2 junk cols per row (they are conv2's padding).
    mid = jnp.maximum(acc1 + b1_ref[...], 0.0) * mask_ref[...]

    # ---- conv2 (+ folded BN + ReLU): padded input built straight from mid (no repack) ----
    zlane = jnp.zeros((CM, 2 * WP), f32)
    f2 = jnp.concatenate([zlane, mid, zlane], axis=1)            # (CM, (OH+4)*WP)
    p2 = jnp.concatenate(
        [f2[:, (dy + 1) * WP + dx - 1:(dy + 1) * WP + dx - 1 + M]
         for dy in range(3) for dx in range(3)], axis=0)         # (9*CM, M)
    acc2 = jnp.dot(w2_ref[...], p2, preferred_element_type=f32)  # (CO, M)
    out = jnp.maximum(acc2 + b2_ref[...], 0.0)

    # Lane-dense, unmasked NCHW-flat store (junk cols dropped by the wrapper).
    o_ref[...] = out[None].astype(o_ref.dtype)


def up_forward(x0_nchw, x1_nchw, params):
    """Up block forward; NCHW in / NCHW out, like the PyTorch module."""
    w1, b1, w2, b2 = params                                     # w: HWIO (BN-folded), b: (cout,)
    N, C0, H0, W0 = x0_nchw.shape
    OH, OW = 2 * H0, 2 * W0
    WP = OW + 2
    M = OH * WP
    CM = w1.shape[-1]
    CO = w2.shape[-1]
    has_skip = x1_nchw is not None

    # NCHW -> NHWC so channels sit on the lane axis for the conv contraction.
    x0 = jnp.transpose(x0_nchw, (0, 2, 3, 1))
    inputs = [x0]
    in_specs = [pl.BlockSpec((1, H0, W0, C0), lambda n: (n, 0, 0, 0))]
    if has_skip:
        x1 = jnp.transpose(x1_nchw, (0, 2, 3, 1))
        C1 = x1.shape[-1]
        inputs.append(x1)
        in_specs.append(pl.BlockSpec((1, OH, OW, C1), lambda n: (n, 0, 0, 0)))
        cin1 = C0 + C1
    else:
        C1 = 0
        cin1 = C0
    assert w1.shape == (3, 3, cin1, CM), (w1.shape, cin1, CM)

    # Valid-column mask for the WP-strided flat layout (1 for data cols, 0 for junk cols).
    col = jnp.arange(M, dtype=jnp.int32) % WP
    mask = (col < OW).astype(jnp.float32).reshape(1, M)

    # Weights in the flipped (Cout, 9*Cin) orientation; K ordering = (tap, cin).
    w1t = jnp.transpose(w1.reshape(9, cin1, CM), (2, 0, 1)).reshape(CM, 9 * cin1)
    w2t = jnp.transpose(w2.reshape(9, CM, CO), (2, 0, 1)).reshape(CO, 9 * CM)
    b1c = b1.reshape(CM, 1)
    b2c = b2.reshape(CO, 1)

    inputs += [mask, w1t, b1c, w2t, b2c]
    in_specs += [
        pl.BlockSpec((1, M), lambda n: (0, 0)),
        pl.BlockSpec((CM, 9 * cin1), lambda n: (0, 0)),
        pl.BlockSpec((CM, 1), lambda n: (0, 0)),
        pl.BlockSpec((CO, 9 * CM), lambda n: (0, 0)),
        pl.BlockSpec((CO, 1), lambda n: (0, 0)),
    ]

    kernel = functools.partial(_up_fused_kernel, H0=H0, W0=W0, C0=C0, C1=C1,
                               CM=CM, CO=CO, has_skip=has_skip)
    out_flat = pl.pallas_call(
        kernel,
        out_shape=jax.ShapeDtypeStruct((N, CO, M), x0_nchw.dtype),
        grid=(N,),
        in_specs=in_specs,
        out_specs=pl.BlockSpec((1, CO, M), lambda n: (n, 0, 0)),
        compiler_params=pltpu.CompilerParams(
            dimension_semantics=("parallel",)),                  # batch shards across TCs
    )(*inputs)

    # Kernel emits NCHW rows with a WP lane stride (2 junk cols/row); drop them here.
    return out_flat.reshape(N, CO, OH, WP)[:, :, :, :OW]


def make_up_params(key, in_channels, out_channels, eps=1e-5):
    """Synthetic Conv+BN params with the BN scale folded into the conv weights."""
    def convblock(k, cin, cout):
        k1, k2, k3, k4, k5, k6 = jax.random.split(k, 6)
        w = jax.random.normal(k1, (3, 3, cin, cout), jnp.float32) * 0.1   # HWIO
        conv_b = jax.random.normal(k2, (cout,), jnp.float32) * 0.1
        gamma = jax.random.uniform(k3, (cout,), jnp.float32, minval=0.5, maxval=1.5)
        beta = jax.random.normal(k4, (cout,), jnp.float32) * 0.1
        mean = jax.random.normal(k5, (cout,), jnp.float32) * 0.1
        var = jax.random.uniform(k6, (cout,), jnp.float32, minval=0.5, maxval=1.5)
        scale = gamma / jnp.sqrt(var + eps)
        w_folded = w * scale                                     # fold BN scale into weights
        bias = beta + scale * (conv_b - mean)                    # fold conv bias + BN shift
        return w_folded, bias

    k1, k2 = jax.random.split(key)
    w1, b1 = convblock(k1, in_channels, out_channels)
    w2, b2 = convblock(k2, out_channels, out_channels)
    return w1, b1, w2, b2


if __name__ == "__main__":
    # Up(in_channels=8, out_channels=4): x0 has 4 channels (low-res), skip x1 has 4 (2x res).
    N, C0, H0, W0 = 2, 4, 8, 8
    C1 = 4
    OH, OW = 2 * H0, 2 * W0
    out_channels = 4

    key = jax.random.PRNGKey(0)
    kx0, kx1, kp = jax.random.split(key, 3)
    x0 = jax.random.normal(kx0, (N, C0, H0, W0), jnp.float32)    # NCHW
    x1 = jax.random.normal(kx1, (N, C1, OH, OW), jnp.float32)    # NCHW
    params = make_up_params(kp, C0 + C1, out_channels)

    fwd = jax.jit(up_forward)
    out = jax.block_until_ready(fwd(x0, x1, params))
    assert out.shape == (N, out_channels, OH, OW), out.shape
    assert out.dtype == jnp.float32
    assert bool(jnp.isfinite(out).all())
    print("KERNEL_OK")
</pallas_src>

<mosaic_0001>
module attributes {stable_mosaic.version = 11 : i64} {
  func.func @_up_fused_kernel(%arg0: i32, %arg1: memref<1x8x8x4xf32, #tpu.memory_space<vmem>>, %arg2: memref<1x16x16x4xf32, #tpu.memory_space<vmem>>, %arg3: memref<1x288xf32, #tpu.memory_space<vmem>>, %arg4: memref<4x72xf32, #tpu.memory_space<vmem>>, %arg5: memref<4x1xf32, #tpu.memory_space<vmem>>, %arg6: memref<4x36xf32, #tpu.memory_space<vmem>>, %arg7: memref<4x1xf32, #tpu.memory_space<vmem>>, %arg8: memref<1x4x288xf32, #tpu.memory_space<vmem>>) attributes {dimension_semantics = [#tpu.dimension_semantics<parallel>], iteration_bounds = array<i64: 2>, scalar_prefetch = 0 : i64, scratch_operands = 0 : i64, tpu.core_type = #tpu.core_type<tc>, window_params = [{transform_indices = @transform_0, window_bounds = array<i64: 1, 8, 8, 4>}, {transform_indices = @transform_1, window_bounds = array<i64: 1, 16, 16, 4>}, {pipeline_mode = #tpu.pipeline_mode<synchronous>, transform_indices = @transform_2, window_bounds = array<i64: 1, 288>}, {pipeline_mode = #tpu.pipeline_mode<synchronous>, transform_indices = @transform_3, window_bounds = array<i64: 4, 72>}, {pipeline_mode = #tpu.pipeline_mode<synchronous>, transform_indices = @transform_4, window_bounds = array<i64: 4, 1>}, {pipeline_mode = #tpu.pipeline_mode<synchronous>, transform_indices = @transform_5, window_bounds = array<i64: 4, 36>}, {pipeline_mode = #tpu.pipeline_mode<synchronous>, transform_indices = @transform_6, window_bounds = array<i64: 4, 1>}, {transform_indices = @transform_7, window_bounds = array<i64: 1, 4, 288>}]} {
    %c0 = arith.constant 0 : index
    %c0_0 = arith.constant 0 : index
    %c0_1 = arith.constant 0 : index
    %c0_2 = arith.constant 0 : index
    %0 = vector.load %arg1[%c0, %c0_0, %c0_1, %c0_2] : memref<1x8x8x4xf32, #tpu.memory_space<vmem>>, vector<1x8x8x4xf32>
    %1 = vector.shape_cast %0 : vector<1x8x8x4xf32> to vector<8x8x4xf32>
    %2 = vector.extract_strided_slice %1 {offsets = [0, 0, 0], sizes = [8, 1, 4], strides = [1, 1, 1]} : vector<8x8x4xf32> to vector<8x1x4xf32>
    %3 = vector.extract_strided_slice %1 {offsets = [0, 0, 0], sizes = [8, 7, 4], strides = [1, 1, 1]} : vector<8x8x4xf32> to vector<8x7x4xf32>
    %4 = tpu.concatenate %2, %3 in 1 : vector<8x1x4xf32>, vector<8x7x4xf32> -> vector<8x8x4xf32>
    %5 = vector.extract_strided_slice %1 {offsets = [0, 1, 0], sizes = [8, 7, 4], strides = [1, 1, 1]} : vector<8x8x4xf32> to vector<8x7x4xf32>
    %6 = vector.extract_strided_slice %1 {offsets = [0, 7, 0], sizes = [8, 1, 4], strides = [1, 1, 1]} : vector<8x8x4xf32> to vector<8x1x4xf32>
    %7 = tpu.concatenate %5, %6 in 1 : vector<8x7x4xf32>, vector<8x1x4xf32> -> vector<8x8x4xf32>
    %cst = arith.constant 2.500000e-01 : f32
    %8 = vector.broadcast %cst : f32 to vector<8x8x4xf32>
    %9 = arith.mulf %8, %4 : vector<8x8x4xf32>
    %cst_3 = arith.constant 7.500000e-01 : f32
    %10 = vector.broadcast %cst_3 : f32 to vector<8x8x4xf32>
    %11 = arith.mulf %10, %1 : vector<8x8x4xf32>
    %12 = arith.addf %9, %11 : vector<8x8x4xf32>
    %cst_4 = arith.constant 7.500000e-01 : f32
    %13 = vector.broadcast %cst_4 : f32 to vector<8x8x4xf32>
    %14 = arith.mulf %13, %1 : vector<8x8x4xf32>
    %cst_5 = arith.constant 2.500000e-01 : f32
    %15 = vector.broadcast %cst_5 : f32 to vector<8x8x4xf32>
    %16 = arith.mulf %15, %7 : vector<8x8x4xf32>
    %17 = arith.addf %14, %16 : vector<8x8x4xf32>
    %18 = vector.shape_cast %12 : vector<8x8x4xf32> to vector<8x8x1x4xf32>
    %19 = vector.shape_cast %17 : vector<8x8x4xf32> to vector<8x8x1x4xf32>
    %20 = tpu.concatenate %18, %19 in 2 : vector<8x8x1x4xf32>, vector<8x8x1x4xf32> -> vector<8x8x2x4xf32>
    %21 = vector.shape_cast %20 : vector<8x8x2x4xf32> to vector<8x16x4xf32>
    %22 = vector.extract_strided_slice %21 {offsets = [0, 0, 0], sizes = [1, 16, 4], strides = [1, 1, 1]} : vector<8x16x4xf32> to vector<1x16x4xf32>
    %23 = vector.extract_strided_slice %21 {offsets = [0, 0, 0], sizes = [7, 16, 4], strides = [1, 1, 1]} : vector<8x16x4xf32> to vector<7x16x4xf32>
    %24 = tpu.concatenate %22, %23 in 0 : vector<1x16x4xf32>, vector<7x16x4xf32> -> vector<8x16x4xf32>
    %25 = vector.extract_strided_slice %21 {offsets = [1, 0, 0], sizes = [7, 16, 4], strides = [1, 1, 1]} : vector<8x16x4xf32> to vector<7x16x4xf32>
    %26 = vector.extract_strided_slice %21 {offsets = [7, 0, 0], sizes = [1, 16, 4], strides = [1, 1, 1]} : vector<8x16x4xf32> to vector<1x16x4xf32>
    %27 = tpu.concatenate %25, %26 in 0 : vector<7x16x4xf32>, vector<1x16x4xf32> -> vector<8x16x4xf32>
    %cst_6 = arith.constant 2.500000e-01 : f32
    %28 = vector.broadcast %cst_6 : f32 to vector<8x16x4xf32>
    %29 = arith.mulf %28, %24 : vector<8x16x4xf32>
    %cst_7 = arith.constant 7.500000e-01 : f32
    %30 = vector.broadcast %cst_7 : f32 to vector<8x16x4xf32>
    %31 = arith.mulf %30, %21 : vector<8x16x4xf32>
    %32 = arith.addf %29, %31 : vector<8x16x4xf32>
    %cst_8 = arith.constant 7.500000e-01 : f32
    %33 = vector.broadcast %cst_8 : f32 to vector<8x16x4xf32>
    %34 = arith.mulf %33, %21 : vector<8x16x4xf32>
    %cst_9 = arith.constant 2.500000e-01 : f32
    %35 = vector.broadcast %cst_9 : f32 to vector<8x16x4xf32>
    %36 = arith.mulf %35, %27 : vector<8x16x4xf32>
    %37 = arith.addf %34, %36 : vector<8x16x4xf32>
    %38 = vector.shape_cast %32 : vector<8x16x4xf32> to vector<8x1x16x4xf32>
    %39 = vector.shape_cast %37 : vector<8x16x4xf32> to vector<8x1x16x4xf32>
    %40 = tpu.concatenate %38, %39 in 1 : vector<8x1x16x4xf32>, vector<8x1x16x4xf32> -> vector<8x2x16x4xf32>
    %41 = vector.shape_cast %40 : vector<8x2x16x4xf32> to vector<16x16x4xf32>
    %c0_10 = arith.constant 0 : index
    %c0_11 = arith.constant 0 : index
    %c0_12 = arith.constant 0 : index
    %c0_13 = arith.constant 0 : index
    %42 = vector.load %arg2[%c0_10, %c0_11, %c0_12, %c0_13] : memref<1x16x16x4xf32, #tpu.memory_space<vmem>>, vector<1x16x16x4xf32>
    %43 = vector.shape_cast %42 : vector<1x16x16x4xf32> to vector<16x16x4xf32>
    %cst_14 = arith.constant 0.000000e+00 : f32
    %44 = vector.broadcast %cst_14 : f32 to vector<16x2x4xf32>
    %45 = tpu.concatenate %41, %44 in 1 : vector<16x16x4xf32>, vector<16x2x4xf32> -> vector<16x18x4xf32>
    %46 = vector.shape_cast %45 : vector<16x18x4xf32> to vector<288x4xf32>
    %cst_15 = arith.constant 0.000000e+00 : f32
    %47 = vector.broadcast %cst_15 : f32 to vector<16x2x4xf32>
    %48 = tpu.concatenate %43, %47 in 1 : vector<16x16x4xf32>, vector<16x2x4xf32> -> vector<16x18x4xf32>
    %49 = vector.shape_cast %48 : vector<16x18x4xf32> to vector<288x4xf32>
    %50 = tpu.concatenate %46, %49 in 1 : vector<288x4xf32>, vector<288x4xf32> -> vector<288x8xf32>
    %cst_16 = arith.constant 0.000000e+00 : f32
    %51 = vector.broadcast %cst_16 : f32 to vector<36x8xf32>
    %52 = tpu.concatenate %51, %50, %51 in 0 : vector<36x8xf32>, vector<288x8xf32>, vector<36x8xf32> -> vector<360x8xf32>
    %53 = vector.extract_strided_slice %52 {offsets = [17, 0], sizes = [288, 8], strides = [1, 1]} : vector<360x8xf32> to vector<288x8xf32>
    %54 = vector.extract_strided_slice %52 {offsets = [18, 0], sizes = [288, 8], strides = [1, 1]} : vector<360x8xf32> to vector<288x8xf32>
    %55 = vector.extract_strided_slice %52 {offsets = [19, 0], sizes = [288, 8], strides = [1, 1]} : vector<360x8xf32> to vector<288x8xf32>
    %56 = vector.extract_strided_slice %52 {offsets = [35, 0], sizes = [288, 8], strides = [1, 1]} : vector<360x8xf32> to vector<288x8xf32>
    %57 = vector.extract_strided_slice %52 {offsets = [36, 0], sizes = [288, 8], strides = [1, 1]} : vector<360x8xf32> to vector<288x8xf32>
    %58 = vector.extract_strided_slice %52 {offsets = [37, 0], sizes = [288, 8], strides = [1, 1]} : vector<360x8xf32> to vector<288x8xf32>
    %59 = vector.extract_strided_slice %52 {offsets = [53, 0], sizes = [288, 8], strides = [1, 1]} : vector<360x8xf32> to vector<288x8xf32>
    %60 = vector.extract_strided_slice %52 {offsets = [54, 0], sizes = [288, 8], strides = [1, 1]} : vector<360x8xf32> to vector<288x8xf32>
    %61 = vector.extract_strided_slice %52 {offsets = [55, 0], sizes = [288, 8], strides = [1, 1]} : vector<360x8xf32> to vector<288x8xf32>
    %62 = tpu.concatenate %53, %54, %55, %56, %57, %58, %59, %60, %61 in 1 : vector<288x8xf32>, vector<288x8xf32>, vector<288x8xf32>, vector<288x8xf32>, vector<288x8xf32>, vector<288x8xf32>, vector<288x8xf32>, vector<288x8xf32>, vector<288x8xf32> -> vector<288x72xf32>
    %c0_17 = arith.constant 0 : index
    %c0_18 = arith.constant 0 : index
    %63 = vector.load %arg4[%c0_17, %c0_18] : memref<4x72xf32, #tpu.memory_space<vmem>>, vector<4x72xf32>
    %cst_19 = arith.constant dense<0.000000e+00> : vector<4x288xf32>
    %64 = tpu.matmul %63, %62, %cst_19 {dimension_numbers = #tpu.dot_dimension_numbers<[1], [1], [0], [0], [0, 0, 1, 0], [], []>} : vector<4x72xf32>, vector<288x72xf32>, vector<4x288xf32> -> vector<4x288xf32>
    %c0_20 = arith.constant 0 : index
    %c0_21 = arith.constant 0 : index
    %65 = vector.load %arg5[%c0_20, %c0_21] : memref<4x1xf32, #tpu.memory_space<vmem>>, vector<4x1xf32>
    %66 = vector.broadcast %65 : vector<4x1xf32> to vector<4x288xf32>
    %67 = arith.addf %64, %66 : vector<4x288xf32>
    %cst_22 = arith.constant 0.000000e+00 : f32
    %68 = vector.broadcast %cst_22 : f32 to vector<4x288xf32>
    %69 = arith.maximumf %67, %68 : vector<4x288xf32>
    %c0_23 = arith.constant 0 : index
    %c0_24 = arith.constant 0 : index
    %70 = vector.load %arg3[%c0_23, %c0_24] : memref<1x288xf32, #tpu.memory_space<vmem>>, vector<1x288xf32>
    %71 = vector.broadcast %70 : vector<1x288xf32> to vector<4x288xf32>
    %72 = arith.mulf %69, %71 : vector<4x288xf32>
    %cst_25 = arith.constant 0.000000e+00 : f32
    %73 = vector.broadcast %cst_25 : f32 to vector<4x36xf32>
    %74 = tpu.concatenate %73, %72, %73 in 1 : vector<4x36xf32>, vector<4x288xf32>, vector<4x36xf32> -> vector<4x360xf32>
    %75 = vector.extract_strided_slice %74 {offsets = [0, 17], sizes = [4, 288], strides = [1, 1]} : vector<4x360xf32> to vector<4x288xf32>
    %76 = vector.extract_strided_slice %74 {offsets = [0, 18], sizes = [4, 288], strides = [1, 1]} : vector<4x360xf32> to vector<4x288xf32>
    %77 = vector.extract_strided_slice %74 {offsets = [0, 19], sizes = [4, 288], strides = [1, 1]} : vector<4x360xf32> to vector<4x288xf32>
    %78 = vector.extract_strided_slice %74 {offsets = [0, 35], sizes = [4, 288], strides = [1, 1]} : vector<4x360xf32> to vector<4x288xf32>
    %79 = vector.extract_strided_slice %74 {offsets = [0, 36], sizes = [4, 288], strides = [1, 1]} : vector<4x360xf32> to vector<4x288xf32>
    %80 = vector.extract_strided_slice %74 {offsets = [0, 37], sizes = [4, 288], strides = [1, 1]} : vector<4x360xf32> to vector<4x288xf32>
    %81 = vector.extract_strided_slice %74 {offsets = [0, 53], sizes = [4, 288], strides = [1, 1]} : vector<4x360xf32> to vector<4x288xf32>
    %82 = vector.extract_strided_slice %74 {offsets = [0, 54], sizes = [4, 288], strides = [1, 1]} : vector<4x360xf32> to vector<4x288xf32>
    %83 = vector.extract_strided_slice %74 {offsets = [0, 55], sizes = [4, 288], strides = [1, 1]} : vector<4x360xf32> to vector<4x288xf32>
    %84 = tpu.concatenate %75, %76, %77, %78, %79, %80, %81, %82, %83 in 0 : vector<4x288xf32>, vector<4x288xf32>, vector<4x288xf32>, vector<4x288xf32>, vector<4x288xf32>, vector<4x288xf32>, vector<4x288xf32>, vector<4x288xf32>, vector<4x288xf32> -> vector<36x288xf32>
    %c0_26 = arith.constant 0 : index
    %c0_27 = arith.constant 0 : index
    %85 = vector.load %arg6[%c0_26, %c0_27] : memref<4x36xf32, #tpu.memory_space<vmem>>, vector<4x36xf32>
    %cst_28 = arith.constant dense<0.000000e+00> : vector<4x288xf32>
    %86 = tpu.matmul %85, %84, %cst_28 {dimension_numbers = #tpu.dot_dimension_numbers<[1], [0], [0], [1], [0, 0, 1, 1], [], []>} : vector<4x36xf32>, vector<36x288xf32>, vector<4x288xf32> -> vector<4x288xf32>
    %c0_29 = arith.constant 0 : index
    %c0_30 = arith.constant 0 : index
    %87 = vector.load %arg7[%c0_29, %c0_30] : memref<4x1xf32, #tpu.memory_space<vmem>>, vector<4x1xf32>
    %88 = vector.broadcast %87 : vector<4x1xf32> to vector<4x288xf32>
    %89 = arith.addf %86, %88 : vector<4x288xf32>
    %cst_31 = arith.constant 0.000000e+00 : f32
    %90 = vector.broadcast %cst_31 : f32 to vector<4x288xf32>
    %91 = arith.maximumf %89, %90 : vector<4x288xf32>
    %92 = vector.shape_cast %91 : vector<4x288xf32> to vector<1x4x288xf32>
    %c0_32 = arith.constant 0 : index
    %c0_33 = arith.constant 0 : index
    %c0_34 = arith.constant 0 : index
    %93 = vector.load %arg8[%c0_32, %c0_33, %c0_34] : memref<1x4x288xf32, #tpu.memory_space<vmem>>, vector<1x4x288xf32>
    tpu.vector_store %arg8[%c0_32, %c0_33, %c0_34], %92 {strides = array<i32>} : memref<1x4x288xf32, #tpu.memory_space<vmem>>, vector<1x4x288xf32>,
    return
  }
  func.func @transform_0(%arg0: i32) -> (i32, i32, i32, i32) {
    %c0_i32 = arith.constant 0 : i32
    %c0_i32_0 = arith.constant 0 : i32
    %c0_i32_1 = arith.constant 0 : i32
    %c0_i32_2 = arith.constant 0 : i32
    return %arg0, %c0_i32, %c0_i32_0, %c0_i32_1 : i32, i32, i32, i32
  }
  func.func @transform_1(%arg0: i32) -> (i32, i32, i32, i32) {
    %c0_i32 = arith.constant 0 : i32
    %c0_i32_0 = arith.constant 0 : i32
    %c0_i32_1 = arith.constant 0 : i32
    %c0_i32_2 = arith.constant 0 : i32
    return %arg0, %c0_i32, %c0_i32_0, %c0_i32_1 : i32, i32, i32, i32
  }
  func.func @transform_2(%arg0: i32) -> (i32, i32) {
    %c0_i32 = arith.constant 0 : i32
    %c0_i32_0 = arith.constant 0 : i32
    %c0_i32_1 = arith.constant 0 : i32
    return %c0_i32, %c0_i32_0 : i32, i32
  }
  func.func @transform_3(%arg0: i32) -> (i32, i32) {
    %c0_i32 = arith.constant 0 : i32
    %c0_i32_0 = arith.constant 0 : i32
    %c0_i32_1 = arith.constant 0 : i32
    return %c0_i32, %c0_i32_0 : i32, i32
  }
  func.func @transform_4(%arg0: i32) -> (i32, i32) {
    %c0_i32 = arith.constant 0 : i32
    %c0_i32_0 = arith.constant 0 : i32
    %c0_i32_1 = arith.constant 0 : i32
    return %c0_i32, %c0_i32_0 : i32, i32
  }
  func.func @transform_5(%arg0: i32) -> (i32, i32) {
    %c0_i32 = arith.constant 0 : i32
    %c0_i32_0 = arith.constant 0 : i32
    %c0_i32_1 = arith.constant 0 : i32
    return %c0_i32, %c0_i32_0 : i32, i32
  }
  func.func @transform_6(%arg0: i32) -> (i32, i32) {
    %c0_i32 = arith.constant 0 : i32
    %c0_i32_0 = arith.constant 0 : i32
    %c0_i32_1 = arith.constant 0 : i32
    return %c0_i32, %c0_i32_0 : i32, i32
  }
  func.func @transform_7(%arg0: i32) -> (i32, i32, i32) {
    %c0_i32 = arith.constant 0 : i32
    %c0_i32_0 = arith.constant 0 : i32
    %c0_i32_1 = arith.constant 0 : i32
    return %arg0, %c0_i32, %c0_i32_0 : i32, i32, i32
  }
}

</mosaic_0001>

<bundles_post_ra>
// kernel: up_forward.1
= control target key start
LH: loop header
LB: loop body
LE: loop exit
PB: predicated region body
PF: predicated region fallthrough
CT: control target
= control target key end

     0   :  { %s4783_s24 = smov 0   ;;  %s8207_s0 = inlined_call_operand.vmem [shape: f32[2,8,8,4], index: 0, kind: input, shape index: {}]   ;;  %s8208_s1 = inlined_call_operand.vmem [shape: f32[2,16,16,4], index: 1, kind: input, shape index: {}]   ;;  %s8209_s2 = inlined_call_operand.vmem [shape: f32[1,288], index: 2, kind: input, shape index: {}]   ;;  %s8210_s3 = inlined_call_operand.vmem [shape: f32[4,72], index: 3, kind: input, shape index: {}]   ;;  %s8211_s4 = inlined_call_operand.vmem [shape: f32[4,1], index: 4, kind: input, shape index: {}]   ;;  %s8212_s5 = inlined_call_operand.vmem [shape: f32[4,36], index: 5, kind: input, shape index: {}]   ;;  %s8213_s6 = inlined_call_operand.vmem [shape: f32[4,1], index: 6, kind: input, shape index: {}]   ;;  %s8214_s7 = inlined_call_operand.vmem [shape: f32[2,4,288], index: 7, kind: output, shape index: {}]  }
   0x1 LB: > { %s4543_s25 = sadd.s32 4294967295, %s4720_s24   ;;  %p4547_p0 = scmp.ge.s32.totalorder %s4720_s24, 1  ;;  %s4720_s24 = sphi %s4783_s24, %s17_s24  }
   0x2   : > { %p247_p1 = scmp.lt.s32.totalorder %s4720_s24, 3 }
   0x4   : > { %p248_p2 = pnand %p4547_p0, %p247_p1 }
   0x6   : > { %251 = sbr.rel (%p248_p2) target bundleno = 2178 (0x882), region = 48 }
   0xb   : > { %v8215_v0 = vmov 0.0   ;;  %s4723_s26 = smov 8   ;;  %s4724_s27 = smov 16   ;;  %vm356_vm0 = vcmask 1046528   ;;  %vm331_vm1 = vcmask 1040384   ;;  %vm2107_vm2 = vcmask 31744  }
   0xc   : > { %v4792_v1 = vrot.slane %v8215_v0, 1  ;;  %v4795_v2 = vrot.slane %v8215_v0, 2  ;;  %p284_p3 = scmp.lt.s32.totalorder %s4543_s25, 1  ;;  %s4725_s13 = smov 4   ;;  %vm2180_vm3 = vcmask 1043456   ;;  %vm2474_vm4 = vcmask 1045504  }
   0xd   : > { %vm2774_vm5 = vcmask 1044480   ;;  %s4726_s14 = smov 32   ;;  %s4727_s15 = smov 24   ;;  %vm3257_vm6 = vcmask 1042432   ;;  %vm3441_vm7 = vcmask 1041408   ;;  %vm3625_vm8 = vcmask 64512  }
   0xe   : > { %8309 = vst [vmem:[#allocation2_spill] sm:$0xff] %v4792_v1  ;;  %2363 = vrot.lane.b32.xlu0 %v4792_v1, %s4723_s26  ;;  %2547 = vrot.lane.b32.xlu1 %v4795_v2, %s4724_s27  ;;  %s8729_s25 = smov (!%p284_p3, %s4543_s25), 1  ;;  %s4728_s16 = smov 40   ;;  %vm3663_vm9 = vcmask 130048   ;;  %vm3701_vm10 = vcmask 195584   ;;  %vm3739_vm11 = vcmask 261120  }
   0xf   : > { %8310 = vst [vmem:[#allocation3_spill] sm:$0xff] %v4795_v2  ;;  %s4600_s28 = sshll.u32 %s8729_s25, 6  ;;  %s4601_s9 = sshll.u32 %s8729_s25, 8  ;;  %vm3777_vm12 = vcmask 326656   ;;  %vm3815_vm13 = vcmask 392192   ;;  %vm3853_vm14 = vcmask 457728  }
  0x10   : > { %s4807_s8 = scalar_lea.vmem %s8207_s0, %s4600_s28  ;;  %s5630_s12 = scalar_lea.vmem %s8208_s1, %s4601_s9  ;;  %vm3891_vm15 = vcmask 523264  }
  0x11   : > { %v299_v3 = vld [vmem:[%s4807_s8] sm:$0xff]  ;;  %v300_v12 = vld [vmem:[%s4807_s8 + $0x8] sm:$0xff]  ;;  %s4729_s17 = smov 48   ;;  %s4730_s18 = smov 56  }
  0x12   : > { %v340_v4 = vrot.slane %v299_v3, 1  ;;  %v315_v5 = vrot.slane %v299_v3, 7  ;;  %v373_v7 = vmul.f32 0.75, %v299_v3  ;;  %v341_v15 = vrot.slane %v300_v12, 1  ;;  %s4731_s19 = smov 64   ;;  %s4733_s28 = smov 36  }
  0x13   : > { %v316_v21 = vrot.slane %v300_v12, 7  ;;  %v374_v40 = vmul.f32 0.75, %v300_v12  ;;  %s4734_s29 = smov 90   ;;  %s4735_s30 = smov 126  }
  0x14   : > { %v357_v6 = vsel %vm356_vm0, %v340_v4, %v299_v3  ;;  %v332_v9 = vsel %vm331_vm1, %v299_v3, %v315_v5  ;;  %v358_v25 = vsel %vm356_vm0, %v341_v15, %v300_v12  ;;  %s4737_s9 = smov 109   ;;  %s4738_s10 = smov 108  }
  0x15   : > { %v389_v8 = vmul.f32 0.25, %v357_v6  ;;  %v365_v10 = vmul.f32 0.25, %v332_v9  ;;  %v333_v39 = vsel %vm331_vm1, %v300_v12, %v316_v21  ;;  %v390_v41 = vmul.f32 0.25, %v358_v25  ;;  %s4739_s11 = smov 110  }
  0x16   : > { %v366_v57 = vmul.f32 0.25, %v333_v39 }
  0x17   : > { %v397_v11 = vadd.f32 %v389_v8, %v373_v7  ;;  %v381_v13 = vadd.f32 %v373_v7, %v365_v10  ;;  %v398_v61 = vadd.f32 %v390_v41, %v374_v40 }
  0x19   : > { %v533_v14 = vrot.slane %v397_v11, 1  ;;  %v534_v16 = vrot.slane %v397_v11, 2  ;;  %v535_v17 = vrot.slane %v397_v11, 3  ;;  %v536_v18 = vrot.slane %v397_v11, 4 }
  0x1a   : > { %v537_v19 = vrot.slane %v397_v11, 5  ;;  %v538_v20 = vrot.slane %v397_v11, 6  ;;  %v413_v22 = vrot.slane %v381_v13, 1  ;;  %v589_v23 = vperm.slane %v397_v11, 0 }
  0x1b   : > { %v590_v24 = vperm.slane %v533_v14, 0  ;;  %v414_v26 = vrot.slane %v381_v13, 2  ;;  %v415_v27 = vrot.slane %v381_v13, 3  ;;  %v591_v28 = vperm.slane %v534_v16, 0 }
  0x1c   : > { %v416_v29 = vrot.slane %v381_v13, 4  ;;  %v539_v30 = vrot.slane %v397_v11, 7  ;;  %v592_v31 = vperm.slane %v535_v17, 0  ;;  %v593_v32 = vperm.slane %v536_v18, 0 }
  0x1d   : > { %v417_v33 = vrot.slane %v381_v13, 5  ;;  %v418_v34 = vrot.slane %v381_v13, 6  ;;  %v594_v35 = vperm.slane %v537_v19, 0  ;;  %v595_v36 = vperm.slane %v538_v20, 0  ;;  %v301_v20 = vld [vmem:[%s4807_s8 + $0x10] sm:$0xff] }
  0x1e   : > { %v717_v37 = vsel %vm331_vm1, %v381_v13, %v589_v23  ;;  %v718_v38 = vsel %vm331_vm1, %v413_v22, %v590_v24  ;;  %v719_v42 = vsel %vm331_vm1, %v414_v26, %v591_v28  ;;  %v419_v43 = vrot.slane %v381_v13, 7 }
  0x1f   : > { %v596_v44 = vperm.slane %v539_v30, 0  ;;  %v720_v45 = vsel %vm331_vm1, %v415_v27, %v592_v31  ;;  %v721_v46 = vsel %vm331_vm1, %v416_v29, %v593_v32  ;;  %v722_v47 = vsel %vm331_vm1, %v417_v33, %v594_v35 }
  0x20   : > { %v723_v48 = vsel %vm331_vm1, %v418_v34, %v595_v36  ;;  %v4822_v49 = vmul.f32 0.25, %v717_v37  ;;  %v4824_v50 = vmul.f32 0.25, %v718_v38  ;;  %v4826_v51 = vmul.f32 0.25, %v719_v42 }
  0x21   : > { %v4828_v52 = vmul.f32 0.75, %v717_v37  ;;  %v4830_v53 = vmul.f32 0.75, %v718_v38  ;;  %v4832_v54 = vmul.f32 0.75, %v719_v42  ;;  %v4834_v55 = vmul.f32 0.25, %v720_v45 }
  0x22   : > { %v4836_v56 = vmul.f32 0.75, %v720_v45  ;;  %v724_v58 = vsel %vm331_vm1, %v419_v43, %v596_v44  ;;  %v4839_v59 = vmul.f32 0.25, %v721_v46  ;;  %v4841_v60 = vmul.f32 0.75, %v721_v46 }
  0x23   : > { %v4843_v62 = vmul.f32 0.25, %v722_v47  ;;  %v4845_v63 = vmul.f32 0.25, %v723_v48  ;;  %v4847_v3 = vmul.f32 0.75, %v722_v47  ;;  %v4849_v4 = vmul.f32 0.75, %v723_v48 }
  0x24   : > { %v901_v5 = vadd.f32 %v4828_v52, %v4822_v49  ;;  %v902_v6 = vadd.f32 %v4830_v53, %v4824_v50  ;;  %v903_v7 = vadd.f32 %v4832_v54, %v4826_v51  ;;  %v4857_v8 = vmul.f32 0.25, %v724_v58 }
  0x25   : > { %v4859_v9 = vmul.f32 0.75, %v724_v58  ;;  %v904_v10 = vadd.f32 %v4836_v56, %v4834_v55  ;;  %v382_v11 = vadd.f32 %v374_v40, %v366_v57  ;;  %v905_v12 = vadd.f32 %v4841_v60, %v4839_v59 }
  0x26   : > { %1197 = vst [vmem:[#allocation1] ss:$4 sm:$0xff] %v901_v5  ;;  %v540_v13 = vrot.slane %v398_v61, 1  ;;  %v541_v14 = vrot.slane %v398_v61, 2  ;;  %v906_v15 = vadd.f32 %v4847_v3, %v4843_v62  ;;  %v542_v16 = vrot.slane %v398_v61, 3 }
  0x27   : > { %1199 = vst [vmem:[#allocation1 + $0x1] ss:$4 sm:$0xff] %v902_v6  ;;  %v907_v17 = vadd.f32 %v4849_v4, %v4845_v63  ;;  %v543_v18 = vrot.slane %v398_v61, 4  ;;  %v908_v19 = vadd.f32 %v4859_v9, %v4857_v8  ;;  %v420_v21 = vrot.slane %v382_v11, 1 }
  0x28   : > { %1201 = vst [vmem:[#allocation1 + $0x2] ss:$4 sm:$0xff] %v903_v7  ;;  %v421_v22 = vrot.slane %v382_v11, 2  ;;  %v544_v23 = vrot.slane %v398_v61, 5  ;;  %v545_v24 = vrot.slane %v398_v61, 6  ;;  %v597_v25 = vperm.slane %v398_v61, 0 }
  0x29   : > { %1203 = vst [vmem:[#allocation1 + $0x3] ss:$4 sm:$0xff] %v904_v10  ;;  %v598_v26 = vperm.slane %v540_v13, 0  ;;  %v599_v27 = vperm.slane %v541_v14, 0  ;;  %v317_v28 = vrot.slane %v301_v20, 7  ;;  %v422_v29 = vrot.slane %v382_v11, 3 }
  0x2a   : > { %1205 = vst [vmem:[#allocation1 + $0x20] ss:$4 sm:$0xff] %v905_v12  ;;  %v546_v30 = vrot.slane %v398_v61, 7  ;;  %v600_v31 = vperm.slane %v542_v16, 0  ;;  %v342_v32 = vrot.slane %v301_v20, 1  ;;  %v423_v33 = vrot.slane %v382_v11, 4 }
  0x2b   : > { %1207 = vst [vmem:[#allocation1 + $0x21] ss:$4 sm:$0xff] %v906_v15  ;;  %v601_v34 = vperm.slane %v543_v18, 0  ;;  %v424_v35 = vrot.slane %v382_v11, 5  ;;  %v425_v36 = vrot.slane %v382_v11, 6  ;;  %v602_v37 = vperm.slane %v544_v23, 0 }
  0x2c   : > { %1209 = vst [vmem:[#allocation1 + $0x22] ss:$4 sm:$0xff] %v907_v17  ;;  %v603_v38 = vperm.slane %v545_v24, 0  ;;  %v725_v39 = vsel %vm331_vm1, %v382_v11, %v597_v25  ;;  %v726_v40 = vsel %vm331_vm1, %v420_v21, %v598_v26  ;;  %v727_v41 = vsel %vm331_vm1, %v421_v22, %v599_v27  ;;  %v4913_v25 = vld [vmem:[%s4807_s8 + $0x18] sm:$0xff] }
  0x2d   : > { %1211 = vst [vmem:[#allocation1 + $0x23] ss:$4 sm:$0xff] %v908_v19  ;;  %v334_v42 = vsel %vm331_vm1, %v301_v20, %v317_v28  ;;  %v426_v43 = vrot.slane %v382_v11, 7  ;;  %v604_v44 = vperm.slane %v546_v30, 0  ;;  %v728_v45 = vsel %vm331_vm1, %v422_v29, %v600_v31 }
  0x2e   : > { %v359_v46 = vsel %vm356_vm0, %v342_v32, %v301_v20  ;;  %v729_v47 = vsel %vm331_vm1, %v423_v33, %v601_v34  ;;  %v730_v48 = vsel %vm331_vm1, %v424_v35, %v602_v37  ;;  %v4880_v57 = vmul.f32 0.25, %v725_v39 }
  0x2f   : > { %v4882_v58 = vmul.f32 0.25, %v726_v40  ;;  %v4884_v61 = vmul.f32 0.25, %v727_v41  ;;  %v367_v5 = vmul.f32 0.25, %v334_v42  ;;  %v731_v6 = vsel %vm331_vm1, %v425_v36, %v603_v38 }
  0x30   : > { %v4887_v7 = vmul.f32 0.25, %v728_v45  ;;  %v375_v10 = vmul.f32 0.75, %v301_v20  ;;  %v391_v11 = vmul.f32 0.25, %v359_v46  ;;  %v732_v12 = vsel %vm331_vm1, %v426_v43, %v604_v44  ;;  %v4894_v15 = vld.sshfl [vmem:[#allocation1] sm:$0xff pattern:$0x73625140] }
  0x31   : > { %v4890_v13 = vmul.f32 0.25, %v729_v47  ;;  %v4892_v14 = vmul.f32 0.25, %v730_v48  ;;  %v4896_v16 = vmul.f32 0.25, %v731_v6  ;;  %v973_v17 = vadd.f32 %v4828_v52, %v4880_v57 }
  0x32   : > { %v974_v18 = vadd.f32 %v4830_v53, %v4882_v58  ;;  %v975_v19 = vadd.f32 %v4832_v54, %v4884_v61  ;;  %v4904_v20 = vmul.f32 0.25, %v732_v12  ;;  %v976_v21 = vadd.f32 %v4836_v56, %v4887_v7 }
  0x33   : > { %v4908_v22 = vadd.f32 %v375_v10, %v367_v5  ;;  %v399_v23 = vadd.f32 %v391_v11, %v375_v10  ;;  %v977_v24 = vadd.f32 %v4841_v60, %v4890_v13  ;;  %1214 = vst [vmem:[#allocation1] ss:$4 sm:$0xff] %v973_v17  ;;  %v978_v52 = vadd.f32 %v4847_v3, %v4892_v14 }
  0x34   : > { %v4917_v53 = vld.sshfl [vmem:[#allocation1 + $0x20] sm:$0xff pattern:$0x73625140]  ;;  %1215 = vst [vmem:[#allocation1 + $0x1] ss:$4 sm:$0xff] %v974_v18  ;;  %v979_v54 = vadd.f32 %v4849_v4, %v4896_v16  ;;  %v318_v56 = vrot.slane %v4913_v25, 7  ;;  %v980_v60 = vadd.f32 %v4859_v9, %v4904_v20 }
  0x35   : > { %1216 = vst [vmem:[#allocation1 + $0x2] ss:$4 sm:$0xff] %v975_v19  ;;  %v4922_v26 = vmul.f32 0.75, %v725_v39  ;;  %v343_v27 = vrot.slane %v4913_v25, 1  ;;  %v427_v28 = vrot.slane %v4908_v22, 1  ;;  %v547_v3 = vrot.slane %v399_v23, 1 }
  0x36   : > { %1217 = vst [vmem:[#allocation1 + $0x3] ss:$4 sm:$0xff] %v976_v21  ;;  %v4928_v29 = vmul.f32 0.75, %v726_v40  ;;  %v428_v30 = vrot.slane %v4908_v22, 2  ;;  %v429_v4 = vrot.slane %v4908_v22, 3  ;;  %v548_v31 = vrot.slane %v399_v23, 2 }
  0x37   : > { %1218 = vst [vmem:[#allocation1 + $0x20] ss:$4 sm:$0xff] %v977_v24  ;;  %v4932_v32 = vmul.f32 0.75, %v727_v41  ;;  %v430_v33 = vrot.slane %v4908_v22, 4  ;;  %v549_v9 = vrot.slane %v399_v23, 3  ;;  %v550_v34 = vrot.slane %v399_v23, 4 }
  0x38   : > { %1219 = vst [vmem:[#allocation1 + $0x21] ss:$4 sm:$0xff] %v978_v52  ;;  %v4935_v35 = vmul.f32 0.75, %v728_v45  ;;  %v551_v36 = vrot.slane %v399_v23, 5  ;;  %v605_v37 = vperm.slane %v399_v23, 0  ;;  %v4937_v38 = vmul.f32 0.75, %v729_v47 }
  0x39   : > { %1220 = vst [vmem:[#allocation1 + $0x22] ss:$4 sm:$0xff] %v979_v54  ;;  %v909_v39 = vadd.f32 %v4922_v26, %v4822_v49  ;;  %v552_v40 = vrot.slane %v399_v23, 6  ;;  %v606_v42 = vperm.slane %v547_v3, 0  ;;  %v850_v41 = vmul.f32 0.75, %v730_v48 }
  0x3a   : > { %1221 = vst [vmem:[#allocation1 + $0x23] ss:$4 sm:$0xff] %v980_v60  ;;  %v910_v43 = vadd.f32 %v4928_v29, %v4824_v50  ;;  %v553_v44 = vrot.slane %v399_v23, 7  ;;  %v607_v46 = vperm.slane %v548_v31, 0  ;;  %v851_v5 = vmul.f32 0.75, %v731_v6 }
  0x3b   : > { %v911_v45 = vadd.f32 %v4932_v32, %v4826_v51  ;;  %v431_v10 = vrot.slane %v4908_v22, 5  ;;  %v608_v47 = vperm.slane %v549_v9, 0  ;;  %v852_v11 = vmul.f32 0.75, %v732_v12 }
  0x3c   : > { %v912_v49 = vadd.f32 %v4935_v35, %v4834_v55  ;;  %v432_v48 = vrot.slane %v4908_v22, 6  ;;  %v609_v18 = vperm.slane %v550_v34, 0  ;;  %v733_v50 = vsel %vm331_vm1, %v4908_v22, %v605_v37 }
  0x3d   : > { %v4948_v17 = vld.sshfl [vmem:[#allocation1] sm:$0xff pattern:$0x73625140]  ;;  %v913_v6 = vadd.f32 %v4937_v38, %v4839_v59  ;;  %v433_v51 = vrot.slane %v4908_v22, 7  ;;  %v610_v19 = vperm.slane %v551_v36, 0  ;;  %v734_v12 = vsel %vm331_vm1, %v427_v28, %v606_v42 }
  0x3e   : > { %1224 = vst [vmem:[#allocation1] ss:$4 sm:$0xff] %v909_v39  ;;  %v914_v21 = vadd.f32 %v850_v41, %v4843_v62  ;;  %v611_v55 = vperm.slane %v552_v40, 0  ;;  %v612_v23 = vperm.slane %v553_v44, 0  ;;  %v735_v24 = vsel %vm331_vm1, %v428_v30, %v607_v46 }
  0x3f   : > { %1225 = vst [vmem:[#allocation1 + $0x1] ss:$4 sm:$0xff] %v910_v43  ;;  %v915_v52 = vadd.f32 %v851_v5, %v4845_v63  ;;  %v335_v54 = vsel %vm331_vm1, %v4913_v25, %v318_v56  ;;  %v736_v59 = vsel %vm331_vm1, %v429_v4, %v608_v47  ;;  %v4963_v60 = vmul.f32 0.25, %v733_v50 }
  0x40   : > { %1226 = vst [vmem:[#allocation1 + $0x2] ss:$4 sm:$0xff] %v911_v45  ;;  %v916_v22 = vadd.f32 %v852_v11, %v4857_v8  ;;  %v360_v62 = vsel %vm356_vm0, %v343_v27, %v4913_v25  ;;  %v737_v3 = vsel %vm331_vm1, %v430_v33, %v609_v18  ;;  %v4971_v30 = vmul.f32 0.25, %v734_v12 }
  0x41   : > { %v4966_v28 = vld.sshfl [vmem:[#allocation1 + $0x20] sm:$0xff pattern:$0x73625140]  ;;  %1227 = vst [vmem:[#allocation1 + $0x3] ss:$4 sm:$0xff] %v912_v49  ;;  %v738_v63 = vsel %vm331_vm1, %v431_v10, %v610_v19  ;;  %v4974_v56 = vmul.f32 0.25, %v735_v24  ;;  %v739_v8 = vsel %vm331_vm1, %v432_v48, %v611_v55  ;;  %v740_v27 = vsel %vm331_vm1, %v433_v51, %v612_v23 }
  0x42   : > { %1228 = vst [vmem:[#allocation1 + $0x20] ss:$4 sm:$0xff] %v913_v6  ;;  %v368_v4 = vmul.f32 0.25, %v335_v54  ;;  %v376_v31 = vmul.f32 0.75, %v4913_v25  ;;  %v4978_v9 = vmul.f32 0.25, %v736_v59  ;;  %v392_v34 = vmul.f32 0.25, %v360_v62 }
  0x43   : > { %1229 = vst [vmem:[#allocation1 + $0x21] ss:$4 sm:$0xff] %v914_v21  ;;  %v4981_v33 = vmul.f32 0.25, %v737_v3  ;;  %v981_v36 = vadd.f32 %v4922_v26, %v4963_v60  ;;  %v4985_v37 = vmul.f32 0.25, %v738_v63  ;;  %v982_v25 = vadd.f32 %v4928_v29, %v4971_v30  ;;  %v5004_v29 = vld [vmem:[%s4807_s8 + $0x20] sm:$0xff] }
  0x44   : > { %1230 = vst [vmem:[#allocation1 + $0x22] ss:$4 sm:$0xff] %v915_v52  ;;  %v4989_v39 = vmul.f32 0.25, %v739_v8  ;;  %v983_v40 = vadd.f32 %v4932_v32, %v4974_v56  ;;  %v4993_v42 = vmul.f32 0.25, %v740_v27  ;;  %v984_v43 = vadd.f32 %v4935_v35, %v4978_v9 }
  0x45   : > { %1231 = vst [vmem:[#allocation1 + $0x23] ss:$4 sm:$0xff] %v916_v22  ;;  %v4999_v46 = vadd.f32 %v376_v31, %v368_v4  ;;  %v400_v26 = vadd.f32 %v392_v34, %v376_v31  ;;  %v985_v45 = vadd.f32 %v4937_v38, %v4981_v33  ;;  %v986_v10 = vadd.f32 %v850_v41, %v4985_v37 }
  0x46   : > { %v319_v32 = vrot.slane %v5004_v29, 7  ;;  %v987_v47 = vadd.f32 %v851_v5, %v4989_v39  ;;  %v5009_v35 = vmul.f32 0.75, %v733_v50  ;;  %v988_v49 = vadd.f32 %v852_v11, %v4993_v42 }
  0x47   : > { %v344_v38 = vrot.slane %v5004_v29, 1  ;;  %v434_v18 = vrot.slane %v4999_v46, 1  ;;  %v554_v6 = vrot.slane %v400_v26, 1  ;;  %v5016_v51 = vmul.f32 0.75, %v734_v12 }
  0x48   : > { %v4997_v44 = vld.sshfl [vmem:[#allocation1] sm:$0xff pattern:$0x73625140]  ;;  %v435_v41 = vrot.slane %v4999_v46, 2  ;;  %v436_v5 = vrot.slane %v4999_v46, 3  ;;  %v555_v19 = vrot.slane %v400_v26, 2  ;;  %v917_v22 = vadd.f32 %v5009_v35, %v4880_v57 }
  0x49   : > { %1234 = vst [vmem:[#allocation1] ss:$4 sm:$0xff] %v981_v36  ;;  %v5020_v50 = vmul.f32 0.75, %v735_v24  ;;  %v437_v11 = vrot.slane %v4999_v46, 4  ;;  %v556_v21 = vrot.slane %v400_v26, 3  ;;  %v557_v55 = vrot.slane %v400_v26, 4 }
  0x4a   : > { %1235 = vst [vmem:[#allocation1 + $0x1] ss:$4 sm:$0xff] %v982_v25  ;;  %v5023_v23 = vmul.f32 0.75, %v736_v59  ;;  %v558_v52 = vrot.slane %v400_v26, 5  ;;  %v613_v54 = vperm.slane %v400_v26, 0  ;;  %v5025_v12 = vmul.f32 0.75, %v737_v3 }
  0x4b   : > { %1236 = vst [vmem:[#allocation1 + $0x2] ss:$4 sm:$0xff] %v983_v40  ;;  %v559_v62 = vrot.slane %v400_v26, 6  ;;  %v614_v4 = vperm.slane %v554_v6, 0  ;;  %v858_v24 = vmul.f32 0.75, %v738_v63  ;;  %v918_v31 = vadd.f32 %v5016_v51, %v4882_v58 }
  0x4c   : > { %v5012_v48 = vld.sshfl [vmem:[#allocation1 + $0x20] sm:$0xff pattern:$0x73625140]  ;;  %1237 = vst [vmem:[#allocation1 + $0x3] ss:$4 sm:$0xff] %v984_v43  ;;  %v560_v34 = vrot.slane %v400_v26, 7  ;;  %v919_v59 = vadd.f32 %v5020_v50, %v4884_v61  ;;  %v920_v57 = vadd.f32 %v5023_v23, %v4887_v7  ;;  %v741_v58 = vsel %vm331_vm1, %v4999_v46, %v613_v54 }
  0x4d   : > { %1238 = vst [vmem:[#allocation1 + $0x20] ss:$4 sm:$0xff] %v985_v45  ;;  %v615_v36 = vperm.slane %v555_v19, 0  ;;  %v859_v25 = vmul.f32 0.75, %v739_v8  ;;  %v438_v40 = vrot.slane %v4999_v46, 5  ;;  %v616_v3 = vperm.slane %v556_v21, 0 }
  0x4e   : > { %1239 = vst [vmem:[#allocation1 + $0x21] ss:$4 sm:$0xff] %v986_v10  ;;  %v860_v43 = vmul.f32 0.75, %v740_v27  ;;  %v439_v63 = vrot.slane %v4999_v46, 6  ;;  %v617_v10 = vperm.slane %v557_v55, 0  ;;  %v921_v8 = vadd.f32 %v5025_v12, %v4890_v13 }
  0x4f   : > { %1240 = vst [vmem:[#allocation1 + $0x22] ss:$4 sm:$0xff] %v987_v47  ;;  %v440_v61 = vrot.slane %v4999_v46, 7  ;;  %v618_v26 = vperm.slane %v558_v52, 0  ;;  %v742_v27 = vsel %vm331_vm1, %v434_v18, %v614_v4  ;;  %v922_v47 = vadd.f32 %v858_v24, %v4892_v14 }
  0x50   : > { %1241 = vst [vmem:[#allocation1 + $0x23] ss:$4 sm:$0xff] %v988_v49  ;;  %v619_v7 = vperm.slane %v559_v62, 0  ;;  %v620_v49 = vperm.slane %v560_v34, 0  ;;  %v743_v6 = vsel %vm331_vm1, %v435_v41, %v615_v36  ;;  %v923_v19 = vadd.f32 %v859_v25, %v4896_v16 }
  0x51   : > { %v336_v21 = vsel %vm331_vm1, %v5004_v29, %v319_v32  ;;  %v744_v13 = vsel %vm331_vm1, %v436_v5, %v616_v3  ;;  %v5051_v55 = vmul.f32 0.25, %v741_v58  ;;  %v924_v46 = vadd.f32 %v860_v43, %v4904_v20 }
  0x52   : > { %v361_v14 = vsel %vm356_vm0, %v344_v38, %v5004_v29  ;;  %v745_v41 = vsel %vm331_vm1, %v437_v11, %v617_v10  ;;  %v5059_v52 = vmul.f32 0.25, %v742_v27  ;;  %v746_v16 = vsel %vm331_vm1, %v438_v40, %v618_v26 }
  0x53   : > { %v5036_v45 = vld.sshfl [vmem:[#allocation1] sm:$0xff pattern:$0x73625140]  ;;  %v5062_v32 = vmul.f32 0.25, %v743_v6  ;;  %v369_v5 = vmul.f32 0.25, %v336_v21  ;;  %v377_v54 = vmul.f32 0.75, %v5004_v29  ;;  %v747_v20 = vsel %vm331_vm1, %v439_v63, %v619_v7 }
  0x54   : > { %1244 = vst [vmem:[#allocation1] ss:$4 sm:$0xff] %v917_v22  ;;  %v5066_v22 = vmul.f32 0.25, %v744_v13  ;;  %v393_v62 = vmul.f32 0.25, %v361_v14  ;;  %v748_v38 = vsel %vm331_vm1, %v440_v61, %v620_v49  ;;  %v5069_v11 = vmul.f32 0.25, %v745_v41 }
  0x55   : > { %1245 = vst [vmem:[#allocation1 + $0x1] ss:$4 sm:$0xff] %v918_v31  ;;  %v989_v4 = vadd.f32 %v5009_v35, %v5051_v55  ;;  %v5073_v31 = vmul.f32 0.25, %v746_v16  ;;  %v990_v29 = vadd.f32 %v5016_v51, %v5059_v52  ;;  %v5077_v34 = vmul.f32 0.25, %v747_v20  ;;  %v5092_v51 = vld [vmem:[%s4807_s8 + $0x28] sm:$0xff] }
  0x56   : > { %1246 = vst [vmem:[#allocation1 + $0x2] ss:$4 sm:$0xff] %v919_v59  ;;  %v991_v36 = vadd.f32 %v5020_v50, %v5062_v32  ;;  %v5081_v59 = vmul.f32 0.25, %v748_v38  ;;  %v992_v40 = vadd.f32 %v5023_v23, %v5066_v22  ;;  %v401_v35 = vadd.f32 %v393_v62, %v377_v54 }
  0x57   : > { %v5054_v18 = vld.sshfl [vmem:[#allocation1 + $0x20] sm:$0xff pattern:$0x73625140]  ;;  %1247 = vst [vmem:[#allocation1 + $0x3] ss:$4 sm:$0xff] %v920_v57  ;;  %v5087_v57 = vadd.f32 %v377_v54, %v369_v5  ;;  %v993_v63 = vadd.f32 %v5025_v12, %v5069_v11  ;;  %v994_v10 = vadd.f32 %v858_v24, %v5073_v31  ;;  %v320_v50 = vrot.slane %v5092_v51, 7 }
  0x58   : > { %1248 = vst [vmem:[#allocation1 + $0x20] ss:$4 sm:$0xff] %v921_v8  ;;  %v995_v8 = vadd.f32 %v859_v25, %v5077_v34  ;;  %v5097_v23 = vmul.f32 0.75, %v741_v58  ;;  %v996_v61 = vadd.f32 %v860_v43, %v5081_v59  ;;  %v345_v12 = vrot.slane %v5092_v51, 1 }
  0x59   : > { %1249 = vst [vmem:[#allocation1 + $0x21] ss:$4 sm:$0xff] %v922_v47  ;;  %v441_v47 = vrot.slane %v5087_v57, 1  ;;  %v561_v7 = vrot.slane %v401_v35, 1  ;;  %v5104_v49 = vmul.f32 0.75, %v742_v27  ;;  %v442_v24 = vrot.slane %v5087_v57, 2 }
  0x5a   : > { %1250 = vst [vmem:[#allocation1 + $0x22] ss:$4 sm:$0xff] %v923_v19  ;;  %v443_v25 = vrot.slane %v5087_v57, 3  ;;  %v562_v19 = vrot.slane %v401_v35, 2  ;;  %v5108_v58 = vmul.f32 0.75, %v743_v6  ;;  %v444_v43 = vrot.slane %v5087_v57, 4 }
  0x5b   : > { %1251 = vst [vmem:[#allocation1 + $0x23] ss:$4 sm:$0xff] %v924_v46  ;;  %v563_v21 = vrot.slane %v401_v35, 3  ;;  %v564_v46 = vrot.slane %v401_v35, 4  ;;  %v5111_v14 = vmul.f32 0.75, %v744_v13  ;;  %v565_v5 = vrot.slane %v401_v35, 5 }
  0x5c   : > { %v621_v54 = vperm.slane %v401_v35, 0  ;;  %v5113_v27 = vmul.f32 0.75, %v745_v41  ;;  %v925_v62 = vadd.f32 %v5097_v23, %v4963_v60  ;;  %v866_v6 = vmul.f32 0.75, %v746_v16 }
  0x5d   : > { %v927_v13 = vadd.f32 %v5108_v58, %v4974_v56  ;;  %v624_v41 = vperm.slane %v563_v21, 0  ;;  %v868_v0 = vmul.f32 0.75, %v748_v38  ;;  %v928_v60 = vadd.f32 %v5111_v14, %v4978_v9 }
  0x5e   : > { %v5085_v3 = vld.sshfl [vmem:[#allocation1] sm:$0xff pattern:$0x73625140]  ;;  %v446_v16 = vrot.slane %v5087_v57, 6  ;;  %v447_v56 = vrot.slane %v5087_v57, 7 }
  0x5f   : > { %1254 = vst [vmem:[#allocation1] ss:$4 sm:$0xff] %v989_v4  ;;  %v566_v4 = vrot.slane %v401_v35, 6 }
  0x60   : > { %1255 = vst [vmem:[#allocation1 + $0x1] ss:$4 sm:$0xff] %v990_v29  ;;  %v622_v29 = vperm.slane %v561_v7, 0  ;;  %v625_v7 = vperm.slane %v564_v46, 0 }
  0x61   : > { %1256 = vst [vmem:[#allocation1 + $0x2] ss:$4 sm:$0xff] %v991_v36  ;;  %v926_v36 = vadd.f32 %v5104_v49, %v4971_v30  ;;  %v749_v30 = vsel %vm331_vm1, %v5087_v57, %v621_v54  ;;  %v627_v9 = vperm.slane %v566_v4, 0  ;;  %v337_v54 = vsel %vm331_vm1, %v5092_v51, %v320_v50 }
  0x62   : > { %v5100_v26 = vld.sshfl [vmem:[#allocation1 + $0x20] sm:$0xff pattern:$0x73625140]  ;;  %1257 = vst [vmem:[#allocation1 + $0x3] ss:$4 sm:$0xff] %v992_v40  ;;  %v567_v40 = vrot.slane %v401_v35, 7  ;;  %v750_v38 = vsel %vm331_vm1, %v441_v47, %v622_v29 }
  0x63   : > { %1258 = vst [vmem:[#allocation1 + $0x20] ss:$4 sm:$0xff] %v993_v63  ;;  %v623_v63 = vperm.slane %v562_v19, 0  ;;  %v626_v35 = vperm.slane %v565_v5, 0  ;;  %v930_v19 = vadd.f32 %v866_v6, %v4985_v37  ;;  %v362_v37 = vsel %vm356_vm0, %v345_v12, %v5092_v51 }
  0x64   : > { %1259 = vst [vmem:[#allocation1 + $0x21] ss:$4 sm:$0xff] %v994_v10  ;;  %v867_v10 = vmul.f32 0.75, %v747_v20  ;;  %v929_v20 = vadd.f32 %v5113_v27, %v4981_v33  ;;  %v628_v21 = vperm.slane %v567_v40, 0  ;;  %v752_v33 = vsel %vm331_vm1, %v443_v25, %v624_v41 }
  0x65   : > { %1260 = vst [vmem:[#allocation1 + $0x22] ss:$4 sm:$0xff] %v995_v8  ;;  %v445_v8 = vrot.slane %v5087_v57, 5  ;;  %v751_v1 = vsel %vm331_vm1, %v442_v24, %v623_v63  ;;  %v932_v57 = vadd.f32 %v868_v0, %v4993_v42  ;;  %v753_v24 = vsel %vm331_vm1, %v444_v43, %v625_v7 }
  0x66   : > { %1261 = vst [vmem:[#allocation1 + $0x23] ss:$4 sm:$0xff] %v996_v61  ;;  %v931_v46 = vadd.f32 %v867_v10, %v4989_v39  ;;  %v5147_v5 = vmul.f32 0.25, %v750_v38  ;;  %v5150_v50 = vmul.f32 0.25, %v751_v1  ;;  %v370_v25 = vmul.f32 0.25, %v337_v54 }
  0x67   : > { %v754_v39 = vsel %vm331_vm1, %v445_v8, %v626_v35  ;;  %v378_v4 = vmul.f32 0.75, %v5092_v51  ;;  %v755_v42 = vsel %vm331_vm1, %v446_v16, %v627_v9  ;;  %v5154_v29 = vmul.f32 0.25, %v752_v33 }
  0x68   : > { %v756_v12 = vsel %vm331_vm1, %v447_v56, %v628_v21  ;;  %v5157_v43 = vmul.f32 0.25, %v753_v24  ;;  %v5161_v63 = vmul.f32 0.25, %v754_v39  ;;  %v998_v51 = vadd.f32 %v5104_v49, %v5147_v5  ;;  %v5180_v49 = vld [vmem:[%s4807_s8 + $0x30] sm:$0xff] }
  0x69   : > { %v5124_v61 = vld.sshfl [vmem:[#allocation1] sm:$0xff pattern:$0x73625140]  ;;  %v999_v8 = vadd.f32 %v5108_v58, %v5150_v50  ;;  %v5169_v41 = vmul.f32 0.25, %v756_v12  ;;  %v5175_v7 = vadd.f32 %v378_v4, %v370_v25  ;;  %v321_v58 = vrot.slane %v5180_v49, 7 }
  0x6a   : > { %1264 = vst [vmem:[#allocation1] ss:$4 sm:$0xff] %v925_v62  ;;  %v5139_v62 = vmul.f32 0.25, %v749_v30  ;;  %v1002_v56 = vadd.f32 %v866_v6, %v5161_v63  ;;  %v5192_v54 = vmul.f32 0.75, %v750_v38  ;;  %v5201_v38 = vmul.f32 0.75, %v753_v24 }
  0x6b   : > { %1265 = vst [vmem:[#allocation1 + $0x1] ss:$4 sm:$0xff] %v926_v36  ;;  %v394_v36 = vmul.f32 0.25, %v362_v37  ;;  %v448_v21 = vrot.slane %v5175_v7, 1  ;;  %v449_v6 = vrot.slane %v5175_v7, 2 }
  0x6c   : > { %1266 = vst [vmem:[#allocation1 + $0x2] ss:$4 sm:$0xff] %v927_v13  ;;  %v997_v40 = vadd.f32 %v5097_v23, %v5139_v62  ;;  %v5165_v13 = vmul.f32 0.25, %v755_v42 }
  0x6d   : > { %v5142_v47 = vld.sshfl [vmem:[#allocation1 + $0x20] sm:$0xff pattern:$0x73625140]  ;;  %1267 = vst [vmem:[#allocation1 + $0x3] ss:$4 sm:$0xff] %v928_v60  ;;  %v1000_v60 = vadd.f32 %v5111_v14, %v5154_v29  ;;  %v402_v23 = vadd.f32 %v394_v36, %v378_v4  ;;  %v5185_v14 = vmul.f32 0.75, %v749_v30 }
  0x6e   : > { %1268 = vst [vmem:[#allocation1 + $0x20] ss:$4 sm:$0xff] %v929_v20  ;;  %v1001_v20 = vadd.f32 %v5113_v27, %v5157_v43  ;;  %v1003_v35 = vadd.f32 %v867_v10, %v5165_v13  ;;  %v346_v27 = vrot.slane %v5180_v49, 1  ;;  %v450_v10 = vrot.slane %v5175_v7, 3 }
  0x6f   : > { %1269 = vst [vmem:[#allocation1 + $0x21] ss:$4 sm:$0xff] %v930_v19  ;;  %v1004_v19 = vadd.f32 %v868_v0, %v5169_v41  ;;  %v5196_v30 = vmul.f32 0.75, %v751_v1  ;;  %v451_v0 = vrot.slane %v5175_v7, 4  ;;  %v570_v37 = vrot.slane %v402_v23, 3 }
  0x70   : > { %1270 = vst [vmem:[#allocation1 + $0x22] ss:$4 sm:$0xff] %v931_v46  ;;  %v568_v46 = vrot.slane %v402_v23, 1  ;;  %v571_v25 = vrot.slane %v402_v23, 4  ;;  %v5199_v4 = vmul.f32 0.75, %v752_v33  ;;  %v572_v36 = vrot.slane %v402_v23, 5 }
  0x71   : > { %1271 = vst [vmem:[#allocation1 + $0x23] ss:$4 sm:$0xff] %v932_v57  ;;  %v569_v57 = vrot.slane %v402_v23, 2  ;;  %v874_v1 = vmul.f32 0.75, %v754_v39  ;;  %v935_v33 = vadd.f32 %v5196_v30, %v5062_v32  ;;  %v632_v24 = vperm.slane %v570_v37, 0 }
  0x72   : > { %v453_v39 = vrot.slane %v5175_v7, 6  ;;  %v454_v32 = vrot.slane %v5175_v7, 7 }
  0x73   : > { %v631_v2 = vperm.slane %v569_v57, 0  ;;  %v938_v57 = vadd.f32 %v874_v1, %v5073_v31  ;;  %v363_v31 = vsel %vm356_vm0, %v346_v27, %v5180_v49 }
  0x74   : > { %v5173_v16 = vld.sshfl [vmem:[#allocation1] sm:$0xff pattern:$0x73625140] }
  0x75   : > { %8311 = vst [vmem:[#allocation4_spill] sm:$0xff] %v5173_v16  ;;  %v876_v16 = vmul.f32 0.75, %v756_v12 }
  0x76   : > { %1274 = vst [vmem:[#allocation1] ss:$4 sm:$0xff] %v997_v40  ;;  %v629_v40 = vperm.slane %v402_v23, 0 }
  0x77   : > { %1275 = vst [vmem:[#allocation1 + $0x1] ss:$4 sm:$0xff] %v998_v51  ;;  %v933_v51 = vadd.f32 %v5185_v14, %v5051_v55  ;;  %v936_v55 = vadd.f32 %v5199_v4, %v5066_v22 }
  0x78   : > { %1276 = vst [vmem:[#allocation1 + $0x2] ss:$4 sm:$0xff] %v999_v8  ;;  %v5188_v9 = vld.sshfl [vmem:[#allocation1 + $0x20] sm:$0xff pattern:$0x73625140]  ;;  %v573_v8 = vrot.slane %v402_v23, 6 }
  0x79   : > { %8312 = vst [vmem:[#allocation5_spill] sm:$0xff] %v5188_v9  ;;  %v875_v9 = vmul.f32 0.75, %v755_v42  ;;  %v937_v42 = vadd.f32 %v5201_v38, %v5069_v11  ;;  %v760_v11 = vsel %vm331_vm1, %v450_v10, %v632_v24 }
  0x7a   : > { %1277 = vst [vmem:[#allocation1 + $0x3] ss:$4 sm:$0xff] %v1000_v60  ;;  %v630_v60 = vperm.slane %v568_v46, 0  ;;  %v633_v46 = vperm.slane %v571_v25, 0  ;;  %v635_v22 = vperm.slane %v573_v8, 0  ;;  %v5242_v8 = vmul.f32 0.25, %v760_v11 }
  0x7b   : > { %1278 = vst [vmem:[#allocation1 + $0x20] ss:$4 sm:$0xff] %v1001_v20  ;;  %v934_v20 = vadd.f32 %v5192_v54, %v5059_v52  ;;  %v757_v52 = vsel %vm331_vm1, %v5175_v7, %v629_v40  ;;  %v939_v25 = vadd.f32 %v875_v9, %v5077_v34  ;;  %v338_v40 = vsel %vm331_vm1, %v5180_v49, %v321_v58 }
  0x7c   : > { %1279 = vst [vmem:[#allocation1 + $0x21] ss:$4 sm:$0xff] %v1002_v56  ;;  %v574_v56 = vrot.slane %v402_v23, 7  ;;  %v634_v23 = vperm.slane %v572_v36, 0  ;;  %v758_v12 = vsel %vm331_vm1, %v448_v21, %v630_v60  ;;  %v371_v10 = vmul.f32 0.25, %v338_v40 }
  0x7d   : > { %1280 = vst [vmem:[#allocation1 + $0x22] ss:$4 sm:$0xff] %v1003_v35  ;;  %v452_v35 = vrot.slane %v5175_v7, 5  ;;  %v940_v7 = vadd.f32 %v876_v16, %v5081_v59  ;;  %v379_v36 = vmul.f32 0.75, %v5180_v49  ;;  %v763_v59 = vsel %vm331_vm1, %v453_v39, %v635_v22 }
  0x7e   : > { %1281 = vst [vmem:[#allocation1 + $0x23] ss:$4 sm:$0xff] %v1004_v19  ;;  %v636_v37 = vperm.slane %v574_v56, 0  ;;  %v395_v60 = vmul.f32 0.25, %v363_v31  ;;  %v5280_v40 = vmul.f32 0.75, %v758_v12 }
  0x7f   : > { %v762_v34 = vsel %vm331_vm1, %v452_v35, %v634_v23 }
  0x80   : > { %v764_v27 = vsel %vm331_vm1, %v454_v32, %v636_v37  ;;  %v5249_v56 = vmul.f32 0.25, %v762_v34 }
  0x81   : > { %v5212_v19 = vld.sshfl [vmem:[#allocation1] sm:$0xff pattern:$0x73625140]  ;;  %v5257_v24 = vmul.f32 0.25, %v764_v27 }
  0x82   : > { %8313 = vst [vmem:[#allocation6_spill] sm:$0xff] %v5212_v19  ;;  %v759_v19 = vsel %vm331_vm1, %v449_v6, %v631_v2  ;;  %v761_v2 = vsel %vm331_vm1, %v451_v0, %v633_v46  ;;  %v5235_v6 = vmul.f32 0.25, %v758_v12  ;;  %v5263_v46 = vadd.f32 %v379_v36, %v371_v10 }
  0x83   : > { %1284 = vst [vmem:[#allocation1] ss:$4 sm:$0xff] %v933_v51  ;;  %v5227_v51 = vmul.f32 0.25, %v757_v52  ;;  %v5238_v58 = vmul.f32 0.25, %v759_v19  ;;  %v5245_v0 = vmul.f32 0.25, %v761_v2  ;;  %v1010_v32 = vadd.f32 %v874_v1, %v5249_v56 }
  0x84   : > { %1285 = vst [vmem:[#allocation1 + $0x1] ss:$4 sm:$0xff] %v934_v20  ;;  %v1006_v49 = vadd.f32 %v5192_v54, %v5235_v6  ;;  %v5268_v54 = vld [vmem:[%s4807_s8 + $0x38] sm:$0xff]  ;;  %v455_v37 = vrot.slane %v5263_v46, 1  ;;  %v456_v1 = vrot.slane %v5263_v46, 2  ;;  %v5289_v12 = vmul.f32 0.75, %v761_v2 }
  0x85   : > { %1286 = vst [vmem:[#allocation1 + $0x2] ss:$4 sm:$0xff] %v935_v33  ;;  %v5230_v21 = vld.sshfl [vmem:[#allocation1 + $0x20] sm:$0xff pattern:$0x73625140]  ;;  %v1005_v20 = vadd.f32 %v5185_v14, %v5227_v51  ;;  %v5253_v33 = vmul.f32 0.25, %v763_v59  ;;  %v1007_v35 = vadd.f32 %v5196_v30, %v5238_v58  ;;  %v403_v14 = vadd.f32 %v395_v60, %v379_v36 }
  0x86   : > { %8314 = vst [vmem:[#allocation7_spill] sm:$0xff] %v5230_v21  ;;  %v322_v30 = vrot.slane %v5268_v54, 7  ;;  %v5287_v36 = vmul.f32 0.75, %v760_v11  ;;  %v884_v21 = vmul.f32 0.75, %v764_v27  ;;  %s4736_s8 = smov 92  }
  0x87   : > { %1287 = vst [vmem:[#allocation1 + $0x3] ss:$4 sm:$0xff] %v936_v55  ;;  %v1008_v55 = vadd.f32 %v5199_v4, %v5242_v8  ;;  %v1011_v23 = vadd.f32 %v875_v9, %v5253_v33  ;;  %v5273_v4 = vmul.f32 0.75, %v757_v52  ;;  %v457_v9 = vrot.slane %v5263_v46, 3 }
  0x88   : > { %1288 = vst [vmem:[#allocation1 + $0x20] ss:$4 sm:$0xff] %v937_v42  ;;  %v1009_v42 = vadd.f32 %v5201_v38, %v5245_v0  ;;  %v347_v38 = vrot.slane %v5268_v54, 1  ;;  %v5284_v52 = vmul.f32 0.75, %v759_v19  ;;  %v577_v31 = vrot.slane %v403_v14, 3 }
  0x89   : > { %1289 = vst [vmem:[#allocation1 + $0x21] ss:$4 sm:$0xff] %v938_v57  ;;  %v1012_v57 = vadd.f32 %v876_v16, %v5257_v24  ;;  %v458_v16 = vrot.slane %v5263_v46, 4  ;;  %v578_v10 = vrot.slane %v403_v14, 4  ;;  %v579_v60 = vrot.slane %v403_v14, 5 }
  0x8a   : > { %1290 = vst [vmem:[#allocation1 + $0x22] ss:$4 sm:$0xff] %v939_v25  ;;  %v575_v25 = vrot.slane %v403_v14, 1  ;;  %v882_v19 = vmul.f32 0.75, %v762_v34  ;;  %v943_v11 = vadd.f32 %v5284_v52, %v5150_v50  ;;  %v640_v2 = vperm.slane %v577_v31, 0 }
  0x8b   : > { %1291 = vst [vmem:[#allocation1 + $0x23] ss:$4 sm:$0xff] %v940_v7  ;;  %v576_v7 = vrot.slane %v403_v14, 2  ;;  %v460_v34 = vrot.slane %v5263_v46, 6  ;;  %v461_v50 = vrot.slane %v5263_v46, 7 }
  0x8e   : > { %v5261_v39 = vld.sshfl [vmem:[#allocation1] sm:$0xff pattern:$0x73625140] }
  0x8f   : > { %8315 = vst [vmem:[#allocation8_spill] sm:$0xff] %v5261_v39  ;;  %v883_v39 = vmul.f32 0.75, %v763_v59  ;;  %v945_v59 = vadd.f32 %v5289_v12, %v5157_v43  ;;  %v768_v43 = vsel %vm331_vm1, %v457_v9, %v640_v2 }
  0x90   : > { %1294 = vst [vmem:[#allocation1] ss:$4 sm:$0xff] %v1005_v20  ;;  %v637_v20 = vperm.slane %v403_v14, 0 }
  0x91   : > { %1295 = vst [vmem:[#allocation1 + $0x1] ss:$4 sm:$0xff] %v1006_v49  ;;  %v941_v49 = vadd.f32 %v5273_v4, %v5139_v62  ;;  %v944_v62 = vadd.f32 %v5287_v36, %v5154_v29 }
  0x92   : > { %1296 = vst [vmem:[#allocation1 + $0x2] ss:$4 sm:$0xff] %v1007_v35  ;;  %v5276_v22 = vld.sshfl [vmem:[#allocation1 + $0x20] sm:$0xff pattern:$0x73625140]  ;;  %v580_v35 = vrot.slane %v403_v14, 6 }
  0x93   : > { %8316 = vst [vmem:[#allocation9_spill] sm:$0xff] %v5276_v22  ;;  %v639_v22 = vperm.slane %v576_v7, 0  ;;  %v946_v7 = vadd.f32 %v882_v19, %v5161_v63  ;;  %v364_v63 = vsel %vm356_vm0, %v347_v38, %v5268_v54 }
  0x94   : > { %1297 = vst [vmem:[#allocation1 + $0x3] ss:$4 sm:$0xff] %v1008_v55  ;;  %v638_v55 = vperm.slane %v575_v25, 0  ;;  %v641_v25 = vperm.slane %v578_v10, 0  ;;  %v643_v29 = vperm.slane %v580_v35, 0  ;;  %v947_v10 = vadd.f32 %v883_v39, %v5165_v13 }
  0x95   : > { %1298 = vst [vmem:[#allocation1 + $0x20] ss:$4 sm:$0xff] %v1009_v42  ;;  %v942_v42 = vadd.f32 %v5280_v40, %v5147_v5  ;;  %v765_v5 = vsel %vm331_vm1, %v5263_v46, %v637_v20  ;;  %v339_v20 = vsel %vm331_vm1, %v5268_v54, %v322_v30  ;;  %v5330_v35 = vmul.f32 0.25, %v768_v43 }
  0x96   : > { %1299 = vst [vmem:[#allocation1 + $0x21] ss:$4 sm:$0xff] %v1010_v32  ;;  %v581_v32 = vrot.slane %v403_v14, 7  ;;  %v642_v14 = vperm.slane %v579_v60, 0  ;;  %v766_v27 = vsel %vm331_vm1, %v455_v37, %v638_v55  ;;  %v372_v9 = vmul.f32 0.25, %v339_v20 }
  0x97   : > { %1300 = vst [vmem:[#allocation1 + $0x22] ss:$4 sm:$0xff] %v1011_v23  ;;  %v459_v23 = vrot.slane %v5263_v46, 5  ;;  %v948_v46 = vadd.f32 %v884_v21, %v5169_v41  ;;  %v380_v60 = vmul.f32 0.75, %v5268_v54  ;;  %v771_v41 = vsel %vm331_vm1, %v460_v34, %v643_v29 }
  0x98   : > { %1301 = vst [vmem:[#allocation1 + $0x23] ss:$4 sm:$0xff] %v1012_v57  ;;  %v644_v31 = vperm.slane %v581_v32, 0  ;;  %v396_v55 = vmul.f32 0.25, %v364_v63  ;;  %v5341_v54 = vmul.f32 0.25, %v771_v41 }
  0x99   : > { %v770_v13 = vsel %vm331_vm1, %v459_v23, %v642_v14 }
  0x9a   : > { %v772_v38 = vsel %vm331_vm1, %v461_v50, %v644_v31  ;;  %v5337_v32 = vmul.f32 0.25, %v770_v13  ;;  %v1019_v50 = vadd.f32 %v883_v39, %v5341_v54  ;;  %v5363_v31 = vmul.f32 0.75, %v766_v27 }
  0x9b   : > { %v5300_v57 = vld.sshfl [vmem:[#allocation1] sm:$0xff pattern:$0x73625140]  ;;  %v5345_v2 = vmul.f32 0.25, %v772_v38 }
  0x9c   : > { %8317 = vst [vmem:[#allocation10_spill] sm:$0xff] %v5300_v57  ;;  %v767_v57 = vsel %vm331_vm1, %v456_v1, %v639_v22  ;;  %v769_v22 = vsel %vm331_vm1, %v458_v16, %v641_v25  ;;  %v5323_v1 = vmul.f32 0.25, %v766_v27  ;;  %v5351_v25 = vadd.f32 %v380_v60, %v372_v9 }
  0x9d   : > { %1304 = vst [vmem:[#allocation1] ss:$4 sm:$0xff] %v941_v49  ;;  %v5315_v49 = vmul.f32 0.25, %v765_v5  ;;  %v5326_v30 = vmul.f32 0.25, %v767_v57  ;;  %v5333_v16 = vmul.f32 0.25, %v769_v22  ;;  %v1020_v14 = vadd.f32 %v884_v21, %v5345_v2 }
  0x9e   : > { %1305 = vst [vmem:[#allocation1 + $0x1] ss:$4 sm:$0xff] %v942_v42  ;;  %v887_v39 = vmul.f32 0.75, %v767_v57  ;;  %v950_v57 = vadd.f32 %v5363_v31, %v5235_v6 }
  0x9f   : > { %1306 = vst [vmem:[#allocation1 + $0x2] ss:$4 sm:$0xff] %v943_v11  ;;  %v5318_v37 = vld.sshfl [vmem:[#allocation1 + $0x20] sm:$0xff pattern:$0x73625140]  ;;  %v1013_v42 = vadd.f32 %v5273_v4, %v5315_v49  ;;  %v1014_v11 = vadd.f32 %v5280_v40, %v5323_v1  ;;  %v1015_v23 = vadd.f32 %v5284_v52, %v5326_v30  ;;  %v404_v4 = vadd.f32 %v396_v55, %v380_v60 }
  0xa0   : > { %1307 = vst [vmem:[#allocation1 + $0x3] ss:$4 sm:$0xff] %v944_v62  ;;  %v1016_v62 = vadd.f32 %v5287_v36, %v5330_v35  ;;  %v1018_v40 = vadd.f32 %v882_v19, %v5337_v32  ;;  %v5357_v52 = vmul.f32 0.75, %v765_v5  ;;  %v464_v19 = vrot.slane %v5351_v25, 3 }
  0xa1   : > { %1308 = vst [vmem:[#allocation1 + $0x20] ss:$4 sm:$0xff] %v945_v59  ;;  %v1017_v59 = vadd.f32 %v5289_v12, %v5333_v16  ;;  %v582_v29 = vrot.slane %v404_v4, 1  ;;  %v463_v12 = vrot.slane %v5351_v25, 2  ;;  %v465_v5 = vrot.slane %v5351_v25, 4 }
  0xa2   : > { %1309 = vst [vmem:[#allocation1 + $0x21] ss:$4 sm:$0xff] %v946_v7  ;;  %v462_v7 = vrot.slane %v5351_v25, 1  ;;  %v584_v20 = vrot.slane %v404_v4, 3  ;;  %v585_v21 = vrot.slane %v404_v4, 4  ;;  %v586_v63 = vrot.slane %v404_v4, 5 }
  0xa3   : > { %1310 = vst [vmem:[#allocation1 + $0x22] ss:$4 sm:$0xff] %v947_v10  ;;  %v583_v10 = vrot.slane %v404_v4, 2  ;;  %v645_v9 = vperm.slane %v404_v4, 0  ;;  %v889_v60 = vmul.f32 0.75, %v769_v22  ;;  %v949_v27 = vadd.f32 %v5357_v52, %v5227_v51 }
  0xa4   : > { %1311 = vst [vmem:[#allocation1 + $0x23] ss:$4 sm:$0xff] %v948_v46  ;;  %v888_v46 = vmul.f32 0.75, %v768_v43  ;;  %v587_v55 = vrot.slane %v404_v4, 6  ;;  %v466_v43 = vrot.slane %v5351_v25, 5  ;;  %v467_v51 = vrot.slane %v5351_v25, 6 }
  0xa5   : > { %v953_v6 = vadd.f32 %v889_v60, %v5245_v0 }
  0xa6   : > { %v952_v22 = vadd.f32 %v888_v46, %v5242_v8  ;;  %v651_v8 = vperm.slane %v587_v55, 0 }
  0xa7   : > { %v5349_v34 = vld.sshfl [vmem:[#allocation1] sm:$0xff pattern:$0x73625140] }
  0xa8   : > { %8318 = vst [vmem:[#allocation11_spill] sm:$0xff] %v5349_v34 }
  0xa9   : > { %1314 = vst [vmem:[#allocation1] ss:$4 sm:$0xff] %v1013_v42  ;;  %v646_v42 = vperm.slane %v582_v29, 0 }
  0xaa   : > { %1315 = vst [vmem:[#allocation1 + $0x1] ss:$4 sm:$0xff] %v1014_v11  ;;  %v890_v11 = vmul.f32 0.75, %v770_v13  ;;  %v773_v13 = vsel %vm331_vm1, %v5351_v25, %v645_v9 }
  0xab   : > { %1316 = vst [vmem:[#allocation1 + $0x2] ss:$4 sm:$0xff] %v1015_v23  ;;  %v5360_v36 = vld.sshfl [vmem:[#allocation1 + $0x20] sm:$0xff pattern:$0x73625140]  ;;  %v588_v23 = vrot.slane %v404_v4, 7  ;;  %v774_v4 = vsel %vm331_vm1, %v462_v7, %v646_v42 }
  0xac   : > { %8319 = vst [vmem:[#allocation12_spill] sm:$0xff] %v5360_v36  ;;  %v892_v36 = vmul.f32 0.75, %v772_v38  ;;  %v954_v38 = vadd.f32 %v890_v11, %v5249_v56  ;;  %v965_v9 = vmul.f32 0.25, %v773_v13  ;;  %v966_v7 = vmul.f32 0.25, %v774_v4 }
  0xad   : > { %1317 = vst [vmem:[#allocation1 + $0x3] ss:$4 sm:$0xff] %v1016_v62  ;;  %v647_v62 = vperm.slane %v583_v10, 0  ;;  %v652_v29 = vperm.slane %v588_v23, 0 }
  0xae   : > { %1318 = vst [vmem:[#allocation1 + $0x20] ss:$4 sm:$0xff] %v1017_v59  ;;  %v891_v59 = vmul.f32 0.75, %v771_v41  ;;  %v468_v41 = vrot.slane %v5351_v25, 7  ;;  %v956_v0 = vadd.f32 %v892_v36, %v5257_v24  ;;  %v1021_v24 = vadd.f32 %v965_v9, %v5357_v52 }
  0xaf   : > { %1319 = vst [vmem:[#allocation1 + $0x21] ss:$4 sm:$0xff] %v1018_v40  ;;  %v951_v40 = vadd.f32 %v887_v39, %v5238_v58  ;;  %v650_v58 = vperm.slane %v586_v63, 0  ;;  %v775_v10 = vsel %vm331_vm1, %v463_v12, %v647_v62  ;;  %v779_v12 = vsel %vm331_vm1, %v467_v51, %v651_v8 }
  0xb0   : > { %1320 = vst [vmem:[#allocation1 + $0x22] ss:$4 sm:$0xff] %v1019_v50  ;;  %v648_v50 = vperm.slane %v584_v20, 0  ;;  %v955_v20 = vadd.f32 %v891_v59, %v5253_v33  ;;  %v967_v63 = vmul.f32 0.25, %v775_v10  ;;  %v894_v52 = vmul.f32 0.75, %v774_v4 }
  0xb1   : > { %1321 = vst [vmem:[#allocation1 + $0x23] ss:$4 sm:$0xff] %v1020_v14  ;;  %v649_v14 = vperm.slane %v585_v21, 0  ;;  %v778_v56 = vsel %vm331_vm1, %v466_v43, %v650_v58 }
  0xb2   : > { %v776_v21 = vsel %vm331_vm1, %v464_v19, %v648_v50  ;;  %v780_v19 = vsel %vm331_vm1, %v468_v41, %v652_v29  ;;  %v970_v42 = vmul.f32 0.25, %v778_v56  ;;  %v1023_v23 = vadd.f32 %v967_v63, %v887_v39 }
  0xb3   : > { %v777_v25 = vsel %vm331_vm1, %v465_v5, %v649_v14  ;;  %v968_v33 = vmul.f32 0.25, %v776_v21  ;;  %v971_v5 = vmul.f32 0.25, %v779_v12  ;;  %v972_v62 = vmul.f32 0.25, %v780_v19 }
  0xb4   : > { %v5375_v34 = vld.sshfl [vmem:[#allocation1] sm:$0xff pattern:$0x73625140]  ;;  %v969_v55 = vmul.f32 0.25, %v777_v25  ;;  %v893_v14 = vmul.f32 0.75, %v773_v13  ;;  %v896_v39 = vmul.f32 0.75, %v776_v21 }
  0xb5   : > { %1324 = vst [vmem:[#allocation1] ss:$4 sm:$0xff] %v949_v27  ;;  %v1027_v51 = vadd.f32 %v971_v5, %v891_v59  ;;  %v899_v59 = vmul.f32 0.75, %v779_v12  ;;  %v1368_v12 = vrot.slane %v4917_v53, 2  ;;  %vm4046_vm1 = vcmask 588800  }
  0xb6   : > { %1325 = vst [vmem:[#allocation1 + $0x1] ss:$4 sm:$0xff] %v950_v57  ;;  %v1022_v57 = vadd.f32 %v966_v7, %v5363_v31  ;;  %v1025_v50 = vadd.f32 %v969_v55, %v889_v60  ;;  %v895_v31 = vmul.f32 0.75, %v775_v10  ;;  %v957_v58 = vadd.f32 %v893_v14, %v5315_v49 }
  0xb7   : > { %1326 = vst [vmem:[#allocation1 + $0x2] ss:$4 sm:$0xff] %v951_v40  ;;  %v1024_v40 = vadd.f32 %v968_v33, %v888_v46  ;;  %v897_v46 = vmul.f32 0.75, %v777_v25  ;;  %v898_v60 = vmul.f32 0.75, %v778_v56  ;;  %v963_v49 = vadd.f32 %v899_v59, %v5341_v54 }
  0xb8   : > { %v5388_v27 = vld.sshfl [vmem:[#allocation1 + $0x20] sm:$0xff pattern:$0x73625140]  ;;  %1327 = vst [vmem:[#allocation1 + $0x3] ss:$4 sm:$0xff] %v952_v22  ;;  %v1026_v22 = vadd.f32 %v970_v42, %v890_v11  ;;  %v958_v11 = vadd.f32 %v894_v52, %v5323_v1  ;;  %v959_v13 = vadd.f32 %v895_v31, %v5326_v30  ;;  %v1029_v30 = vadd.f32 %v965_v9, %v893_v14 }
  0xb9   : > { %1328 = vst [vmem:[#allocation1 + $0x20] ss:$4 sm:$0xff] %v953_v6  ;;  %v1028_v6 = vadd.f32 %v972_v62, %v892_v36  ;;  %v900_v36 = vmul.f32 0.75, %v780_v19  ;;  %v961_v4 = vadd.f32 %v897_v46, %v5333_v16  ;;  %v962_v29 = vadd.f32 %v898_v60, %v5337_v32 }
  0xba   : > { %1329 = vst [vmem:[#allocation1 + $0x21] ss:$4 sm:$0xff] %v954_v38  ;;  %v960_v38 = vadd.f32 %v896_v39, %v5330_v35  ;;  %v1030_v35 = vadd.f32 %v966_v7, %v894_v52  ;;  %v1032_v16 = vadd.f32 %v968_v33, %v896_v39  ;;  %v1033_v32 = vadd.f32 %v969_v55, %v897_v46 }
  0xbb   : > { %1330 = vst [vmem:[#allocation1 + $0x22] ss:$4 sm:$0xff] %v955_v20  ;;  %v964_v10 = vadd.f32 %v900_v36, %v5345_v2  ;;  %v1031_v20 = vadd.f32 %v967_v63, %v895_v31  ;;  %v1035_v54 = vadd.f32 %v971_v5, %v899_v59  ;;  %v1036_v2 = vadd.f32 %v972_v62, %v900_v36 }
  0xbc   : > { %1331 = vst [vmem:[#allocation1 + $0x23] ss:$4 sm:$0xff] %v956_v0  ;;  %v1034_v0 = vadd.f32 %v970_v42, %v898_v60  ;;  %v1365_v9 = vrot.slane %v4894_v15, 2  ;;  %v1366_v7 = vrot.slane %v4894_v15, 4  ;;  %v1367_v63 = vrot.slane %v4894_v15, 6 }
  0xbd   : > { %v1369_v33 = vrot.slane %v4917_v53, 4  ;;  %v1370_v55 = vrot.slane %v4917_v53, 6  ;;  %v8320_v5 = vmov 0.0   ;;  %v1380_v14 = vrot.slane %v5012_v48, 2 }
  0xbe   : > { %v1382_v52 = vrot.slane %v5012_v48, 6  ;;  %v1383_v39 = vrot.slane %v5036_v45, 2  ;;  %v1385_v46 = vrot.slane %v5036_v45, 6  ;;  %v1387_v60 = vrot.slane %v5054_v18, 4 }
  0xbf   : > { %v5396_v43 = vld.sshfl [vmem:[#allocation1] sm:$0xff pattern:$0x73625140]  ;;  %v1390_v36 = vrot.slane %v5085_v3, 4 }
  0xc0   : > { %1334 = vst [vmem:[#allocation1] ss:$4 sm:$0xff] %v1021_v24  ;;  %v1371_v24 = vrot.slane %v4948_v17, 2 }
  0xc1   : > { %1335 = vst [vmem:[#allocation1 + $0x1] ss:$4 sm:$0xff] %v1022_v57  ;;  %v1373_v57 = vrot.slane %v4948_v17, 6 }
  0xc2   : > { %1336 = vst [vmem:[#allocation1 + $0x2] ss:$4 sm:$0xff] %v1023_v23  ;;  %v1374_v23 = vrot.slane %v4966_v28, 2 }
  0xc3   : > { %v5398_v41 = vld.sshfl [vmem:[#allocation1 + $0x20] sm:$0xff pattern:$0x73625140]  ;;  %1337 = vst [vmem:[#allocation1 + $0x3] ss:$4 sm:$0xff] %v1024_v40  ;;  %v1376_v40 = vrot.slane %v4966_v28, 6 }
  0xc4   : > { %1338 = vst [vmem:[#allocation1 + $0x20] ss:$4 sm:$0xff] %v1025_v50  ;;  %v1377_v50 = vrot.slane %v4997_v44, 2 }
  0xc5   : > { %1339 = vst [vmem:[#allocation1 + $0x21] ss:$4 sm:$0xff] %v1026_v22 }
  0xc6   : > { %1340 = vst [vmem:[#allocation1 + $0x22] ss:$4 sm:$0xff] %v1027_v51  ;;  %v1379_v51 = vrot.slane %v4997_v44, 6 }
  0xc7   : > { %1341 = vst [vmem:[#allocation1 + $0x23] ss:$4 sm:$0xff] %v1028_v6 }
  0xca   : > { %v5404_v8 = vld.sshfl [vmem:[#allocation1] sm:$0xff pattern:$0x73625140] }
  0xcb   : > { %1344 = vst [vmem:[#allocation1] ss:$4 sm:$0xff] %v957_v58 }
  0xcc   : > { %1345 = vst [vmem:[#allocation1 + $0x1] ss:$4 sm:$0xff] %v958_v11  ;;  %v1388_v11 = vrot.slane %v5054_v18, 6 }
  0xcd   : > { %1346 = vst [vmem:[#allocation1 + $0x2] ss:$4 sm:$0xff] %v959_v13  ;;  %v1389_v13 = vrot.slane %v5085_v3, 2 }
  0xce   : > { %v5410_v1 = vld.sshfl [vmem:[#allocation1 + $0x20] sm:$0xff pattern:$0x73625140]  ;;  %1347 = vst [vmem:[#allocation1 + $0x3] ss:$4 sm:$0xff] %v960_v38 }
  0xcf   : > { %1348 = vst [vmem:[#allocation1 + $0x20] ss:$4 sm:$0xff] %v961_v4  ;;  %v1393_v4 = vrot.slane %v5100_v26, 4 }
  0xd0   : > { %1349 = vst [vmem:[#allocation1 + $0x21] ss:$4 sm:$0xff] %v962_v29  ;;  %v1394_v29 = vrot.slane %v5100_v26, 6 }
  0xd1   : > { %1350 = vst [vmem:[#allocation1 + $0x22] ss:$4 sm:$0xff] %v963_v49 }
  0xd2   : > { %1351 = vst [vmem:[#allocation1 + $0x23] ss:$4 sm:$0xff] %v964_v10  ;;  %v1395_v10 = vrot.slane %v5124_v61, 2 }
  0xd5   : > { %v5412_v21 = vld.sshfl [vmem:[#allocation1] sm:$0xff pattern:$0x73625140] }
  0xd6   : > { %1354 = vst [vmem:[#allocation1] ss:$4 sm:$0xff] %v1029_v30  ;;  %v1396_v30 = vrot.slane %v5124_v61, 4 }
  0xd7   : > { %1355 = vst [vmem:[#allocation1 + $0x1] ss:$4 sm:$0xff] %v1030_v35  ;;  %v1397_v35 = vrot.slane %v5124_v61, 6 }
  0xd8   : > { %1356 = vst [vmem:[#allocation1 + $0x2] ss:$4 sm:$0xff] %v1031_v20  ;;  %v1398_v20 = vrot.slane %v5142_v47, 2 }
  0xd9   : > { %v5414_v25 = vld.sshfl [vmem:[#allocation1 + $0x20] sm:$0xff pattern:$0x73625140]  ;;  %1357 = vst [vmem:[#allocation1 + $0x3] ss:$4 sm:$0xff] %v1032_v16 }
  0xda   : > { %1358 = vst [vmem:[#allocation1 + $0x20] ss:$4 sm:$0xff] %v1033_v32  ;;  %v1400_v32 = vrot.slane %v5142_v47, 6 }
  0xdb   : > { %1359 = vst [vmem:[#allocation1 + $0x21] ss:$4 sm:$0xff] %v1034_v0  ;;  %v8321_v0 = vld [vmem:[#allocation4_spill] sm:$0xff] }
  0xdc   : > { %1360 = vst [vmem:[#allocation1 + $0x22] ss:$4 sm:$0xff] %v1035_v54  ;;  %v1401_v54 = vrot.slane %v8321_v0, 2 }
  0xdd   : > { %1361 = vst [vmem:[#allocation1 + $0x23] ss:$4 sm:$0xff] %v1036_v2 }
  0xe0   : > { %v5418_v56 = vld.sshfl [vmem:[#allocation1] sm:$0xff pattern:$0x73625140] }
  0xe1   : > { %1589 = vst [vmem:[#allocation1] ss:$4 sm:$0xff] %v4894_v15  ;;  %v1372_v15 = vrot.slane %v4948_v17, 4 }
  0xe2   : > { %1591 = vst [vmem:[#allocation1 + $0x1] ss:$4 sm:$0xff] %v1365_v9  ;;  %v1403_v9 = vrot.slane %v8321_v0, 6 }
  0xe3   : > { %1593 = vst [vmem:[#allocation1 + $0x2] ss:$4 sm:$0xff] %v1366_v7  ;;  %v8322_v7 = vld [vmem:[#allocation5_spill] sm:$0xff] }
  0xe4   : > { %v5424_v19 = vld.sshfl [vmem:[#allocation1 + $0x20] sm:$0xff pattern:$0x73625140]  ;;  %1595 = vst [vmem:[#allocation1 + $0x3] ss:$4 sm:$0xff] %v1367_v63  ;;  %v1404_v63 = vrot.slane %v8322_v7, 2 }
  0xe5   : > { %1597 = vst [vmem:[#allocation1 + $0x20] ss:$4 sm:$0xff] %v4917_v53  ;;  %v1375_v53 = vrot.slane %v4966_v28, 4 }
  0xe6   : > { %1599 = vst [vmem:[#allocation1 + $0x21] ss:$4 sm:$0xff] %v1368_v12 }
  0xe7   : > { %1601 = vst [vmem:[#allocation1 + $0x22] ss:$4 sm:$0xff] %v1369_v33  ;;  %v1406_v33 = vrot.slane %v8322_v7, 6 }
  0xe8   : > { %1603 = vst [vmem:[#allocation1 + $0x23] ss:$4 sm:$0xff] %v1370_v55 }
  0xeb   : > { %v5430_v42 = vld.sshfl [vmem:[#allocation1] sm:$0xff pattern:$0x73625140] }
  0xec   : > { %1606 = vst [vmem:[#allocation1] ss:$4 sm:$0xff] %v8320_v5 }
  0xed   : > { %1607 = vst [vmem:[#allocation1 + $0x1] ss:$4 sm:$0xff] %v4948_v17  ;;  %v1378_v17 = vrot.slane %v4997_v44, 4 }
  0xee   : > { %1608 = vst [vmem:[#allocation1 + $0x2] ss:$4 sm:$0xff] %v1371_v24  ;;  %v8323_v24 = vld [vmem:[#allocation6_spill] sm:$0xff] }
  0xef   : > { %v5437_v62 = vld.sshfl [vmem:[#allocation1 + $0x20] sm:$0xff pattern:$0x73625140]  ;;  %1609 = vst [vmem:[#allocation1 + $0x3] ss:$4 sm:$0xff] %v1372_v15  ;;  %v1407_v15 = vrot.slane %v8323_v24, 2 }
  0xf0   : > { %1610 = vst [vmem:[#allocation1 + $0x20] ss:$4 sm:$0xff] %v1373_v57  ;;  %v1408_v57 = vrot.slane %v8323_v24, 4 }
  0xf1   : > { %1611 = vst [vmem:[#allocation1 + $0x21] ss:$4 sm:$0xff] %v4966_v28  ;;  %v1381_v28 = vrot.slane %v5012_v48, 4 }
  0xf2   : > { %1612 = vst [vmem:[#allocation1 + $0x22] ss:$4 sm:$0xff] %v1374_v23  ;;  %v1409_v23 = vrot.slane %v8323_v24, 6 }
  0xf3   : > { %1613 = vst [vmem:[#allocation1 + $0x23] ss:$4 sm:$0xff] %v1375_v53 }
  0xf6   : > { %v5442_v22 = vld.sshfl [vmem:[#allocation1] sm:$0xff pattern:$0x73625140] }
  0xf7   : > { %1616 = vst [vmem:[#allocation1] ss:$4 sm:$0xff] %v1376_v40  ;;  %v8324_v40 = vld [vmem:[#allocation7_spill] sm:$0xff] }
  0xf8   : > { %1617 = vst [vmem:[#allocation1 + $0x1] ss:$4 sm:$0xff] %v8320_v5 }
  0xf9   : > { %1618 = vst [vmem:[#allocation1 + $0x2] ss:$4 sm:$0xff] %v4997_v44  ;;  %v1384_v44 = vrot.slane %v5036_v45, 4 }
  0xfa   : > { %v5449_v6 = vld.sshfl [vmem:[#allocation1 + $0x20] sm:$0xff pattern:$0x73625140]  ;;  %1619 = vst [vmem:[#allocation1 + $0x3] ss:$4 sm:$0xff] %v1377_v50  ;;  %v1410_v50 = vrot.slane %v8324_v40, 2 }
  0xfb   : > { %1620 = vst [vmem:[#allocation1 + $0x20] ss:$4 sm:$0xff] %v1378_v17  ;;  %v1411_v17 = vrot.slane %v8324_v40, 4 }
  0xfc   : > { %1621 = vst [vmem:[#allocation1 + $0x21] ss:$4 sm:$0xff] %v1379_v51  ;;  %v1412_v51 = vrot.slane %v8324_v40, 6 }
  0xfd   : > { %1622 = vst [vmem:[#allocation1 + $0x22] ss:$4 sm:$0xff] %v5012_v48  ;;  %v1386_v48 = vrot.slane %v5054_v18, 2 }
  0xfe   : > { %1623 = vst [vmem:[#allocation1 + $0x23] ss:$4 sm:$0xff] %v1380_v14 }
 0x101   : > { %v5454_v31 = vld.sshfl [vmem:[#allocation1] sm:$0xff pattern:$0x73625140] }
 0x102   : > { %1626 = vst [vmem:[#allocation1] ss:$4 sm:$0xff] %v1381_v28  ;;  %v8325_v28 = vld [vmem:[#allocation8_spill] sm:$0xff] }
 0x103   : > { %1627 = vst [vmem:[#allocation1 + $0x1] ss:$4 sm:$0xff] %v1382_v52  ;;  %v1413_v52 = vrot.slane %v8325_v28, 2 }
 0x104   : > { %1628 = vst [vmem:[#allocation1 + $0x2] ss:$4 sm:$0xff] %v8320_v5 }
 0x105   : > { %v5460_v58 = vld.sshfl [vmem:[#allocation1 + $0x20] sm:$0xff pattern:$0x73625140]  ;;  %1629 = vst [vmem:[#allocation1 + $0x3] ss:$4 sm:$0xff] %v5036_v45  ;;  %v1391_v45 = vrot.slane %v5085_v3, 6 }
 0x106   : > { %1630 = vst [vmem:[#allocation1 + $0x20] ss:$4 sm:$0xff] %v1383_v39  ;;  %v1414_v39 = vrot.slane %v8325_v28, 4 }
 0x107   : > { %1631 = vst [vmem:[#allocation1 + $0x21] ss:$4 sm:$0xff] %v1384_v44  ;;  %v1415_v44 = vrot.slane %v8325_v28, 6 }
 0x108   : > { %1632 = vst [vmem:[#allocation1 + $0x22] ss:$4 sm:$0xff] %v1385_v46 }
 0x109   : > { %1633 = vst [vmem:[#allocation1 + $0x23] ss:$4 sm:$0xff] %v5054_v18  ;;  %v1392_v18 = vrot.slane %v5100_v26, 2 }
 0x10c   : > { %v5467_v59 = vld.sshfl [vmem:[#allocation1] sm:$0xff pattern:$0x73625140] }
 0x10d   : > { %1636 = vst [vmem:[#allocation1] ss:$4 sm:$0xff] %v1386_v48  ;;  %v8326_v48 = vld [vmem:[#allocation9_spill] sm:$0xff] }
 0x10e   : > { %1637 = vst [vmem:[#allocation1 + $0x1] ss:$4 sm:$0xff] %v1387_v60  ;;  %v1416_v60 = vrot.slane %v8326_v48, 2 }
 0x10f   : > { %1638 = vst [vmem:[#allocation1 + $0x2] ss:$4 sm:$0xff] %v1388_v11  ;;  %v1417_v11 = vrot.slane %v8326_v48, 4 }
 0x110   : > { %v5472_v38 = vld.sshfl [vmem:[#allocation1 + $0x20] sm:$0xff pattern:$0x73625140]  ;;  %1639 = vst [vmem:[#allocation1 + $0x3] ss:$4 sm:$0xff] %v8320_v5 }
 0x111   : > { %1640 = vst [vmem:[#allocation1 + $0x20] ss:$4 sm:$0xff] %v5085_v3 }
 0x112   : > { %1641 = vst [vmem:[#allocation1 + $0x21] ss:$4 sm:$0xff] %v1389_v13  ;;  %v1418_v13 = vrot.slane %v8326_v48, 6 }
 0x113   : > { %1642 = vst [vmem:[#allocation1 + $0x22] ss:$4 sm:$0xff] %v1390_v36 }
 0x114   : > { %1643 = vst [vmem:[#allocation1 + $0x23] ss:$4 sm:$0xff] %v1391_v45  ;;  %v8327_v45 = vld [vmem:[#allocation10_spill] sm:$0xff] }
 0x117   : > { %v5479_v49 = vld.sshfl [vmem:[#allocation1] sm:$0xff pattern:$0x73625140] }
 0x118   : > { %1646 = vst [vmem:[#allocation1] ss:$4 sm:$0xff] %v5100_v26  ;;  %v1399_v26 = vrot.slane %v5142_v47, 4 }
 0x119   : > { %1647 = vst [vmem:[#allocation1 + $0x1] ss:$4 sm:$0xff] %v1392_v18  ;;  %v1419_v18 = vrot.slane %v8327_v45, 2 }
 0x11a   : > { %1648 = vst [vmem:[#allocation1 + $0x2] ss:$4 sm:$0xff] %v1393_v4  ;;  %v1420_v4 = vrot.slane %v8327_v45, 4 }
 0x11b   : > { %v5484_v3 = vld.sshfl [vmem:[#allocation1 + $0x20] sm:$0xff pattern:$0x73625140]  ;;  %1649 = vst [vmem:[#allocation1 + $0x3] ss:$4 sm:$0xff] %v1394_v29 }
 0x11c   : > { %1650 = vst [vmem:[#allocation1 + $0x20] ss:$4 sm:$0xff] %v8320_v5 }
 0x11d   : > { %1651 = vst [vmem:[#allocation1 + $0x21] ss:$4 sm:$0xff] %v5124_v61  ;;  %v1402_v61 = vrot.slane %v8321_v0, 4 }
 0x11e   : > { %1652 = vst [vmem:[#allocation1 + $0x22] ss:$4 sm:$0xff] %v1395_v10  ;;  %v1421_v10 = vrot.slane %v8327_v45, 6 }
 0x11f   : > { %1653 = vst [vmem:[#allocation1 + $0x23] ss:$4 sm:$0xff] %v1396_v30  ;;  %v1422_v30 = vrot.slane %v5318_v37, 2 }
 0x122   : > { %v5491_v16 = vld.sshfl [vmem:[#allocation1] sm:$0xff pattern:$0x73625140] }
 0x123   : > { %1656 = vst [vmem:[#allocation1] ss:$4 sm:$0xff] %v1397_v35 }
 0x124   : > { %1657 = vst [vmem:[#allocation1 + $0x1] ss:$4 sm:$0xff] %v5142_v47  ;;  %v1405_v47 = vrot.slane %v8322_v7, 4 }
 0x125   : > { %1658 = vst [vmem:[#allocation1 + $0x2] ss:$4 sm:$0xff] %v1398_v20  ;;  %v1423_v20 = vrot.slane %v5318_v37, 4 }
 0x126   : > { %v5496_v2 = vld.sshfl [vmem:[#allocation1 + $0x20] sm:$0xff pattern:$0x73625140]  ;;  %1659 = vst [vmem:[#allocation1 + $0x3] ss:$4 sm:$0xff] %v1399_v26  ;;  %v1424_v26 = vrot.slane %v5318_v37, 6 }
 0x127   : > { %1660 = vst [vmem:[#allocation1 + $0x20] ss:$4 sm:$0xff] %v1400_v32  ;;  %v8328_v32 = vld [vmem:[#allocation11_spill] sm:$0xff] }
 0x128   : > { %1661 = vst [vmem:[#allocation1 + $0x21] ss:$4 sm:$0xff] %v8320_v5 }
 0x129   : > { %1662 = vst [vmem:[#allocation1 + $0x22] ss:$4 sm:$0xff] %v8321_v0  ;;  %v1425_v0 = vrot.slane %v8328_v32, 2 }
 0x12a   : > { %1663 = vst [vmem:[#allocation1 + $0x23] ss:$4 sm:$0xff] %v1401_v54 }
 0x12d   : > { %v5503_v12 = vld.sshfl [vmem:[#allocation1] sm:$0xff pattern:$0x73625140] }
 0x12e   : > { %1666 = vst [vmem:[#allocation1] ss:$4 sm:$0xff] %v1402_v61  ;;  %v1426_v61 = vrot.slane %v8328_v32, 4 }
 0x12f   : > { %1667 = vst [vmem:[#allocation1 + $0x1] ss:$4 sm:$0xff] %v1403_v9  ;;  %v1427_v9 = vrot.slane %v8328_v32, 6 }
 0x130   : > { %1668 = vst [vmem:[#allocation1 + $0x2] ss:$4 sm:$0xff] %v8322_v7  ;;  %v8329_v7 = vld [vmem:[#allocation12_spill] sm:$0xff] }
 0x131   : > { %v5508_v55 = vld.sshfl [vmem:[#allocation1 + $0x20] sm:$0xff pattern:$0x73625140]  ;;  %1669 = vst [vmem:[#allocation1 + $0x3] ss:$4 sm:$0xff] %v1404_v63  ;;  %v1428_v63 = vrot.slane %v8329_v7, 2 }
 0x132   : > { %1670 = vst [vmem:[#allocation1 + $0x20] ss:$4 sm:$0xff] %v1405_v47 }
 0x133   : > { %1671 = vst [vmem:[#allocation1 + $0x21] ss:$4 sm:$0xff] %v1406_v33  ;;  %v1430_v33 = vrot.slane %v8329_v7, 6 }
 0x134   : > { %1672 = vst [vmem:[#allocation1 + $0x22] ss:$4 sm:$0xff] %v8320_v5 }
 0x135   : > { %1673 = vst [vmem:[#allocation1 + $0x23] ss:$4 sm:$0xff] %v8323_v24 }
 0x138   : > { %v5515_v53 = vld.sshfl [vmem:[#allocation1] sm:$0xff pattern:$0x73625140] }
 0x139   : > { %1676 = vst [vmem:[#allocation1] ss:$4 sm:$0xff] %v1407_v15  ;;  %v1431_v15 = vrot.slane %v5375_v34, 2 }
 0x13a   : > { %1677 = vst [vmem:[#allocation1 + $0x1] ss:$4 sm:$0xff] %v1408_v57  ;;  %v1432_v57 = vrot.slane %v5375_v34, 4 }
 0x13b   : > { %1678 = vst [vmem:[#allocation1 + $0x2] ss:$4 sm:$0xff] %v1409_v23  ;;  %v1433_v23 = vrot.slane %v5375_v34, 6 }
 0x13c   : > { %v5520_v14 = vld.sshfl [vmem:[#allocation1 + $0x20] sm:$0xff pattern:$0x73625140]  ;;  %1679 = vst [vmem:[#allocation1 + $0x3] ss:$4 sm:$0xff] %v8324_v40 }
 0x13d   : > { %1680 = vst [vmem:[#allocation1 + $0x20] ss:$4 sm:$0xff] %v1410_v50  ;;  %v1434_v50 = vrot.slane %v5388_v27, 2 }
 0x13e   : > { %1681 = vst [vmem:[#allocation1 + $0x21] ss:$4 sm:$0xff] %v1411_v17  ;;  %v1435_v17 = vrot.slane %v5388_v27, 4 }
 0x13f   : > { %1682 = vst [vmem:[#allocation1 + $0x22] ss:$4 sm:$0xff] %v1412_v51  ;;  %v1436_v51 = vrot.slane %v5388_v27, 6 }
 0x140   : > { %1683 = vst [vmem:[#allocation1 + $0x23] ss:$4 sm:$0xff] %v8320_v5 }
 0x143   : > { %v5527_v46 = vld.sshfl [vmem:[#allocation1] sm:$0xff pattern:$0x73625140] }
 0x144   : > { %1686 = vst [vmem:[#allocation1] ss:$4 sm:$0xff] %v8325_v28 }
 0x145   : > { %1687 = vst [vmem:[#allocation1 + $0x1] ss:$4 sm:$0xff] %v1413_v52  ;;  %v1438_v52 = vrot.slane %v5396_v43, 4 }
 0x146   : > { %1688 = vst [vmem:[#allocation1 + $0x2] ss:$4 sm:$0xff] %v1414_v39  ;;  %v1439_v39 = vrot.slane %v5396_v43, 6 }
 0x147   : > { %v5533_v36 = vld.sshfl [vmem:[#allocation1 + $0x20] sm:$0xff pattern:$0x73625140]  ;;  %1689 = vst [vmem:[#allocation1 + $0x3] ss:$4 sm:$0xff] %v1415_v44 }
 0x148   : > { %1690 = vst [vmem:[#allocation1 + $0x20] ss:$4 sm:$0xff] %v8326_v48  ;;  %v1441_v48 = vrot.slane %v5398_v41, 4 }
 0x149   : > { %1691 = vst [vmem:[#allocation1 + $0x21] ss:$4 sm:$0xff] %v1416_v60  ;;  %v1442_v60 = vrot.slane %v5398_v41, 6 }
 0x14a   : > { %1692 = vst [vmem:[#allocation1 + $0x22] ss:$4 sm:$0xff] %v1417_v11 }
 0x14b   : > { %1693 = vst [vmem:[#allocation1 + $0x23] ss:$4 sm:$0xff] %v1418_v13  ;;  %v1443_v13 = vrot.slane %v5404_v8, 2 }
 0x14e   : > { %v5538_v29 = vld.sshfl [vmem:[#allocation1] sm:$0xff pattern:$0x73625140] }
 0x14f   : > { %1696 = vst [vmem:[#allocation1] ss:$4 sm:$0xff] %v8320_v5 }
 0x150   : > { %1697 = vst [vmem:[#allocation1 + $0x1] ss:$4 sm:$0xff] %v8327_v45 }
 0x151   : > { %1698 = vst [vmem:[#allocation1 + $0x2] ss:$4 sm:$0xff] %v1419_v18  ;;  %v1445_v18 = vrot.slane %v5404_v8, 6 }
 0x152   : > { %v5544_v35 = vld.sshfl [vmem:[#allocation1 + $0x20] sm:$0xff pattern:$0x73625140]  ;;  %1699 = vst [vmem:[#allocation1 + $0x3] ss:$4 sm:$0xff] %v1420_v4  ;;  %v1446_v4 = vrot.slane %v5410_v1, 2 }
 0x153   : > { %1701 = vst [vmem:[#allocation1 + $0x21] ss:$4 sm:$0xff] %v5318_v37  ;;  %v1429_v37 = vrot.slane %v8329_v7, 4 }
 0x154   : > { %1700 = vst [vmem:[#allocation1 + $0x20] ss:$4 sm:$0xff] %v1421_v10 }
 0x155   : > { %1702 = vst [vmem:[#allocation1 + $0x22] ss:$4 sm:$0xff] %v1422_v30  ;;  %v1448_v30 = vrot.slane %v5410_v1, 6 }
 0x156   : > { %1703 = vst [vmem:[#allocation1 + $0x23] ss:$4 sm:$0xff] %v1423_v20  ;;  %v1449_v20 = vrot.slane %v5412_v21, 2 }
 0x159   : > { %v5550_v54 = vld.sshfl [vmem:[#allocation1] sm:$0xff pattern:$0x73625140] }
 0x15a   : > { %1706 = vst [vmem:[#allocation1] ss:$4 sm:$0xff] %v1424_v26 }
 0x15b   : > { %1707 = vst [vmem:[#allocation1 + $0x1] ss:$4 sm:$0xff] %v8320_v5 }
 0x15c   : > { %1708 = vst [vmem:[#allocation1 + $0x2] ss:$4 sm:$0xff] %v8328_v32  ;;  %v1451_v32 = vrot.slane %v5412_v21, 6 }
 0x15d   : > { %1709 = vst [vmem:[#allocation1 + $0x3] ss:$4 sm:$0xff] %v1425_v0  ;;  %v5557_v47 = vld.sshfl [vmem:[#allocation1 + $0x20] sm:$0xff pattern:$0x73625140]  ;;  %v1452_v0 = vrot.slane %v5414_v25, 2 }
 0x15e   : > { %1710 = vst [vmem:[#allocation1 + $0x20] ss:$4 sm:$0xff] %v1426_v61  ;;  %v1453_v61 = vrot.slane %v5414_v25, 4 }
 0x15f   : > { %1711 = vst [vmem:[#allocation1 + $0x21] ss:$4 sm:$0xff] %v1427_v9  ;;  %v1454_v9 = vrot.slane %v5414_v25, 6 }
 0x160   : > { %1712 = vst [vmem:[#allocation1 + $0x22] ss:$4 sm:$0xff] %v8329_v7 }
 0x161   : > { %1713 = vst [vmem:[#allocation1 + $0x23] ss:$4 sm:$0xff] %v1428_v63  ;;  %v1456_v63 = vrot.slane %v5418_v56, 4 }
 0x164   : > { %v5562_v24 = vld.sshfl [vmem:[#allocation1] sm:$0xff pattern:$0x73625140] }
 0x165   : > { %1716 = vst [vmem:[#allocation1] ss:$4 sm:$0xff] %v1429_v37  ;;  %v1457_v37 = vrot.slane %v5418_v56, 6 }
 0x166   : > { %1717 = vst [vmem:[#allocation1 + $0x1] ss:$4 sm:$0xff] %v1430_v33 }
 0x167   : > { %1718 = vst [vmem:[#allocation1 + $0x2] ss:$4 sm:$0xff] %v8320_v5 }
 0x168   : > { %1719 = vst [vmem:[#allocation1 + $0x3] ss:$4 sm:$0xff] %v5375_v34  ;;  %v5569_v40 = vld.sshfl [vmem:[#allocation1 + $0x20] sm:$0xff pattern:$0x73625140]  ;;  %v1437_v34 = vrot.slane %v5396_v43, 2 }
 0x169   : > { %1720 = vst [vmem:[#allocation1 + $0x20] ss:$4 sm:$0xff] %v1431_v15  ;;  %v1459_v15 = vrot.slane %v5424_v19, 4 }
 0x16a   : > { %1721 = vst [vmem:[#allocation1 + $0x21] ss:$4 sm:$0xff] %v1432_v57 }
 0x16b   : > { %1722 = vst [vmem:[#allocation1 + $0x22] ss:$4 sm:$0xff] %v1433_v23  ;;  %v1037_v23 = vld [vmem:[%s5630_s12] sm:$0xff] }
 0x16c   : > { %1723 = vst [vmem:[#allocation1 + $0x23] ss:$4 sm:$0xff] %v5388_v27  ;;  %v1440_v27 = vrot.slane %v5398_v41, 2 }
 0x16f   : > { %v5575_v28 = vld.sshfl [vmem:[#allocation1] sm:$0xff pattern:$0x73625140] }
 0x170   : > { %1726 = vst [vmem:[#allocation1] ss:$4 sm:$0xff] %v1434_v50  ;;  %v1493_v50 = vrot.slane %v1037_v23, 2 }
 0x171   : > { %1727 = vst [vmem:[#allocation1 + $0x1] ss:$4 sm:$0xff] %v1435_v17  ;;  %v1494_v17 = vrot.slane %v1037_v23, 4 }
 0x172   : > { %1728 = vst [vmem:[#allocation1 + $0x2] ss:$4 sm:$0xff] %v1436_v51  ;;  %v1495_v51 = vrot.slane %v1037_v23, 6 }
 0x173   : > { %1729 = vst [vmem:[#allocation1 + $0x3] ss:$4 sm:$0xff] %v8320_v5  ;;  %v5581_v44 = vld.sshfl [vmem:[#allocation1 + $0x20] sm:$0xff pattern:$0x73625140] }
 0x174   : > { %1730 = vst [vmem:[#allocation1 + $0x20] ss:$4 sm:$0xff] %v5396_v43  ;;  %v1444_v43 = vrot.slane %v5404_v8, 4 }
 0x175   : > { %1731 = vst [vmem:[#allocation1 + $0x21] ss:$4 sm:$0xff] %v1437_v34 }
 0x176   : > { %1732 = vst [vmem:[#allocation1 + $0x22] ss:$4 sm:$0xff] %v1438_v52  ;;  %v1038_v52 = vld [vmem:[%s5630_s12 + $0x8] sm:$0xff] }
 0x177   : > { %1733 = vst [vmem:[#allocation1 + $0x23] ss:$4 sm:$0xff] %v1439_v39  ;;  %v1496_v39 = vrot.slane %v1038_v52, 2 }
 0x17a   : > { %v5587_v11 = vld.sshfl [vmem:[#allocation1] sm:$0xff pattern:$0x73625140] }
 0x17b   : > { %1736 = vst [vmem:[#allocation1] ss:$4 sm:$0xff] %v5398_v41  ;;  %v1447_v41 = vrot.slane %v5410_v1, 4 }
 0x17c   : > { %1737 = vst [vmem:[#allocation1 + $0x1] ss:$4 sm:$0xff] %v1440_v27  ;;  %v1498_v27 = vrot.slane %v1038_v52, 6 }
 0x17d   : > { %1738 = vst [vmem:[#allocation1 + $0x2] ss:$4 sm:$0xff] %v1441_v48 }
 0x17e   : > { %1739 = vst [vmem:[#allocation1 + $0x3] ss:$4 sm:$0xff] %v1442_v60  ;;  %v5592_v45 = vld.sshfl [vmem:[#allocation1 + $0x20] sm:$0xff pattern:$0x73625140]  ;;  %v1039_v60 = vld [vmem:[%s5630_s12 + $0x10] sm:$0xff] }
 0x17f   : > { %1740 = vst [vmem:[#allocation1 + $0x20] ss:$4 sm:$0xff] %v8320_v5 }
 0x180   : > { %1741 = vst [vmem:[#allocation1 + $0x21] ss:$4 sm:$0xff] %v5404_v8  ;;  %v1450_v8 = vrot.slane %v5412_v21, 4 }
 0x181   : > { %1742 = vst [vmem:[#allocation1 + $0x22] ss:$4 sm:$0xff] %v1443_v13  ;;  %v1499_v13 = vrot.slane %v1039_v60, 2 }
 0x182   : > { %1743 = vst [vmem:[#allocation1 + $0x23] ss:$4 sm:$0xff] %v1444_v43 }
 0x185   : > { %v5599_v10 = vld.sshfl [vmem:[#allocation1] sm:$0xff pattern:$0x73625140] }
 0x186   : > { %1746 = vst [vmem:[#allocation1] ss:$4 sm:$0xff] %v1445_v18  ;;  %v1500_v18 = vrot.slane %v1039_v60, 4 }
 0x187   : > { %1747 = vst [vmem:[#allocation1 + $0x1] ss:$4 sm:$0xff] %v5410_v1 }
 0x188   : > { %1748 = vst [vmem:[#allocation1 + $0x2] ss:$4 sm:$0xff] %v1446_v4  ;;  %v1040_v4 = vld [vmem:[%s5630_s12 + $0x18] sm:$0xff] }
 0x189   : > { %1749 = vst [vmem:[#allocation1 + $0x3] ss:$4 sm:$0xff] %v1447_v41  ;;  %v5604_v26 = vld.sshfl [vmem:[#allocation1 + $0x20] sm:$0xff pattern:$0x73625140]  ;;  %v1501_v41 = vrot.slane %v1039_v60, 6 }
 0x18a   : > { %1750 = vst [vmem:[#allocation1 + $0x20] ss:$4 sm:$0xff] %v1448_v30  ;;  %v1502_v30 = vrot.slane %v1040_v4, 2 }
 0x18b   : > { %1751 = vst [vmem:[#allocation1 + $0x21] ss:$4 sm:$0xff] %v8320_v5 }
 0x18c   : > { %1752 = vst [vmem:[#allocation1 + $0x22] ss:$4 sm:$0xff] %v5412_v21  ;;  %v1455_v21 = vrot.slane %v5418_v56, 2 }
 0x18d   : > { %1753 = vst [vmem:[#allocation1 + $0x23] ss:$4 sm:$0xff] %v1449_v20 }
 0x190   : > { %v5611_v1 = vld.sshfl [vmem:[#allocation1] sm:$0xff pattern:$0x73625140] }
 0x191   : > { %1756 = vst [vmem:[#allocation1] ss:$4 sm:$0xff] %v1450_v8  ;;  %v1503_v8 = vrot.slane %v1040_v4, 4 }
 0x192   : > { %1757 = vst [vmem:[#allocation1 + $0x1] ss:$4 sm:$0xff] %v1451_v32  ;;  %v1041_v32 = vld [vmem:[%s5630_s12 + $0x20] sm:$0xff] }
 0x193   : > { %1758 = vst [vmem:[#allocation1 + $0x2] ss:$4 sm:$0xff] %v5414_v25  ;;  %v1458_v25 = vrot.slane %v5424_v19, 2 }
 0x194   : > { %1759 = vst [vmem:[#allocation1 + $0x3] ss:$4 sm:$0xff] %v1452_v0  ;;  %v5616_v7 = vld.sshfl [vmem:[#allocation1 + $0x20] sm:$0xff pattern:$0x73625140]  ;;  %v1504_v0 = vrot.slane %v1040_v4, 6 }
 0x195   : > { %1760 = vst [vmem:[#allocation1 + $0x20] ss:$4 sm:$0xff] %v1453_v61 }
 0x196   : > { %1761 = vst [vmem:[#allocation1 + $0x21] ss:$4 sm:$0xff] %v1454_v9  ;;  %v1505_v9 = vrot.slane %v1041_v32, 2 }
 0x197   : > { %1762 = vst [vmem:[#allocation1 + $0x22] ss:$4 sm:$0xff] %v8320_v5 }
 0x198   : > { %1763 = vst [vmem:[#allocation1 + $0x23] ss:$4 sm:$0xff] %v5418_v56  ;;  %v1460_v56 = vrot.slane %v5424_v19, 6 }
 0x19b   : > { %v5624_v33 = vld.sshfl [vmem:[#allocation1] sm:$0xff pattern:$0x73625140] }
 0x19c   : > { %8330 = vst [vmem:[#allocation4_spill] sm:$0xff] %v5624_v33 }
 0x19d   : > { %1766 = vst [vmem:[#allocation1] ss:$4 sm:$0xff] %v1455_v21  ;;  %v1506_v21 = vrot.slane %v1041_v32, 4 }
 0x19e   : > { %1767 = vst [vmem:[#allocation1 + $0x1] ss:$4 sm:$0xff] %v1456_v63  ;;  %v1042_v63 = vld [vmem:[%s5630_s12 + $0x28] sm:$0xff] }
 0x19f   : > { %1768 = vst [vmem:[#allocation1 + $0x2] ss:$4 sm:$0xff] %v1457_v37  ;;  %v5635_v57 = vld.sshfl [vmem:[#allocation1 + $0x20] sm:$0xff pattern:$0x73625140]  ;;  %v1507_v37 = vrot.slane %v1041_v32, 6 }
 0x1a0   : > { %1769 = vst [vmem:[#allocation1 + $0x3] ss:$4 sm:$0xff] %v5424_v19  ;;  %v1497_v19 = vrot.slane %v1038_v52, 4 }
 0x1a1   : > { %8331 = vst [vmem:[#allocation5_spill] sm:$0xff] %v5635_v57 }
 0x1a2   : > { %1770 = vst [vmem:[#allocation1 + $0x20] ss:$4 sm:$0xff] %v1458_v25 }
 0x1a3   : > { %1771 = vst [vmem:[#allocation1 + $0x21] ss:$4 sm:$0xff] %v1459_v15  ;;  %v1508_v15 = vrot.slane %v1042_v63, 2 }
 0x1a4   : > { %1772 = vst [vmem:[#allocation1 + $0x22] ss:$4 sm:$0xff] %v1460_v56  ;;  %v1509_v56 = vrot.slane %v1042_v63, 4 }
 0x1a5   : > { %1773 = vst [vmem:[#allocation1 + $0x23] ss:$4 sm:$0xff] %v8320_v5 }
 0x1a7   : > { %v5639_v34 = vld.sshfl [vmem:[#allocation1] sm:$0xff pattern:$0x73625140] }
 0x1a8   : > { %1812 = vst [vmem:[#allocation1] ss:$4 sm:$0xff] %v1037_v23  ;;  %v1043_v23 = vld [vmem:[%s5630_s12 + $0x30] sm:$0xff] }
 0x1a9   : > { %1814 = vst [vmem:[#allocation1 + $0x1] ss:$4 sm:$0xff] %v1493_v50  ;;  %v1510_v50 = vrot.slane %v1042_v63, 6 }
 0x1aa   : > { %1816 = vst [vmem:[#allocation1 + $0x2] ss:$4 sm:$0xff] %v1494_v17 }
 0x1ab   : > { %1818 = vst [vmem:[#allocation1 + $0x3] ss:$4 sm:$0xff] %v1495_v51  ;;  %v1511_v51 = vrot.slane %v1043_v23, 2 }
 0x1ac   : > { %v5642_v48 = vld.sshfl [vmem:[#allocation1 + $0x20] sm:$0xff pattern:$0x73625140] }
 0x1ad   : > { %1820 = vst [vmem:[#allocation1 + $0x20] ss:$4 sm:$0xff] %v1038_v52  ;;  %v1512_v52 = vrot.slane %v1043_v23, 4 }
 0x1ae   : > { %1822 = vst [vmem:[#allocation1 + $0x21] ss:$4 sm:$0xff] %v1496_v39  ;;  %v1513_v39 = vrot.slane %v1043_v23, 6 }
 0x1af   : > { %1824 = vst [vmem:[#allocation1 + $0x22] ss:$4 sm:$0xff] %v1497_v19 }
 0x1b0   : > { %1826 = vst [vmem:[#allocation1 + $0x23] ss:$4 sm:$0xff] %v1498_v27  ;;  %v1044_v27 = vld [vmem:[%s5630_s12 + $0x38] sm:$0xff] }
 0x1b2   : > { %v1827_v43 = vld.sshfl [vmem:[#allocation1] sm:$0xff pattern:$0x73625140] }
 0x1b3   : > { %1999 = vrot.lane.b32.xlu0 %v1827_v43, %s4725_s13  ;;  %1829 = vst [vmem:[#allocation1] ss:$4 sm:$0xff] %v8320_v5 }
 0x1b4   : > { %1830 = vst [vmem:[#allocation1 + $0x1] ss:$4 sm:$0xff] %v1039_v60  ;;  %v1514_v60 = vrot.slane %v1044_v27, 2 }
 0x1b5   : > { %1831 = vst [vmem:[#allocation1 + $0x2] ss:$4 sm:$0xff] %v1499_v13  ;;  %v1515_v13 = vrot.slane %v1044_v27, 4 }
 0x1b6   : > { %1832 = vst [vmem:[#allocation1 + $0x3] ss:$4 sm:$0xff] %v1500_v18  ;;  %v1516_v18 = vrot.slane %v1044_v27, 6 }
 0x1b7   : > { %v1828_v20 = vld.sshfl [vmem:[#allocation1 + $0x20] sm:$0xff pattern:$0x73625140] }
 0x1b8   : > { %1833 = vst [vmem:[#allocation1 + $0x20] ss:$4 sm:$0xff] %v1501_v41 }
 0x1b9   : > { %1834 = vst [vmem:[#allocation1 + $0x21] ss:$4 sm:$0xff] %v1040_v4  ;;  %v1045_v4 = vld [vmem:[%s5630_s12 + $0x40] sm:$0xff] }
 0x1ba   : > { %1835 = vst [vmem:[#allocation1 + $0x22] ss:$4 sm:$0xff] %v1502_v30  ;;  %v1517_v41 = vrot.slane %v1045_v4, 2  ;;  %v1518_v30 = vrot.slane %v1045_v4, 4 }
 0x1bb   : > { %2001 = vrot.lane.b32.xlu0 %v1828_v20, %s4725_s13  ;;  %1836 = vst [vmem:[#allocation1 + $0x23] ss:$4 sm:$0xff] %v1503_v8  ;;  %v1519_v8 = vrot.slane %v1045_v4, 6 }
 0x1bd   : > { %v1837_v61 = vld.sshfl [vmem:[#allocation1] sm:$0xff pattern:$0x73625140] }
 0x1be   : > { %2003 = vrot.lane.b32.xlu1 %v1837_v61, %s4725_s13  ;;  %1840 = vst [vmem:[#allocation1 + $0x1] ss:$4 sm:$0xff] %v8320_v5 }
 0x1bf   : > { %1839 = vst [vmem:[#allocation1] ss:$4 sm:$0xff] %v1504_v0 }
 0x1c0   : > { %1841 = vst [vmem:[#allocation1 + $0x2] ss:$4 sm:$0xff] %v1041_v32  ;;  %v1046_v32 = vld [vmem:[%s5630_s12 + $0x48] sm:$0xff] }
 0x1c1   : > { %1842 = vst [vmem:[#allocation1 + $0x3] ss:$4 sm:$0xff] %v1505_v9  ;;  %v1520_v0 = vrot.slane %v1046_v32, 2  ;;  %v1521_v61 = vrot.slane %v1046_v32, 4  ;;  %v1522_v9 = vrot.slane %v1046_v32, 6 }
 0x1c2   : > { %v1838_v25 = vld.sshfl [vmem:[#allocation1 + $0x20] sm:$0xff pattern:$0x73625140] }
 0x1c3   : > { %1843 = vst [vmem:[#allocation1 + $0x20] ss:$4 sm:$0xff] %v1506_v21 }
 0x1c4   : > { %1844 = vst [vmem:[#allocation1 + $0x21] ss:$4 sm:$0xff] %v1507_v37 }
 0x1c5   : > { %1845 = vst [vmem:[#allocation1 + $0x22] ss:$4 sm:$0xff] %v1042_v63  ;;  %v1047_v63 = vld [vmem:[%s5630_s12 + $0x50] sm:$0xff] }
 0x1c6   : > { %2005 = vrot.lane.b32.xlu1 %v1838_v25, %s4725_s13  ;;  %1846 = vst [vmem:[#allocation1 + $0x23] ss:$4 sm:$0xff] %v1508_v15  ;;  %v1523_v37 = vrot.slane %v1047_v63, 2  ;;  %v1524_v15 = vrot.slane %v1047_v63, 4 }
 0x1c8   : > { %v1847_v17 = vld.sshfl [vmem:[#allocation1] sm:$0xff pattern:$0x73625140] }
 0x1c9   : > { %2007 = vrot.lane.b32.xlu2 %v1847_v17, %s4725_s13  ;;  %1851 = vst [vmem:[#allocation1 + $0x2] ss:$4 sm:$0xff] %v8320_v5 }
 0x1ca   : > { %1849 = vst [vmem:[#allocation1] ss:$4 sm:$0xff] %v1509_v56  ;;  %v1048_v56 = vld [vmem:[%s5630_s12 + $0x58] sm:$0xff] }
 0x1cb   : > { %1850 = vst [vmem:[#allocation1 + $0x1] ss:$4 sm:$0xff] %v1510_v50  ;;  %v1526_v50 = vrot.slane %v1048_v56, 2 }
 0x1cc   : > { %1852 = vst [vmem:[#allocation1 + $0x3] ss:$4 sm:$0xff] %v1043_v23  ;;  %v1525_v23 = vrot.slane %v1047_v63, 6 }
 0x1cd   : > { %v1848_v19 = vld.sshfl [vmem:[#allocation1 + $0x20] sm:$0xff pattern:$0x73625140] }
 0x1ce   : > { %1853 = vst [vmem:[#allocation1 + $0x20] ss:$4 sm:$0xff] %v1511_v51  ;;  %v1527_v51 = vrot.slane %v1048_v56, 4 }
 0x1cf   : > { %1854 = vst [vmem:[#allocation1 + $0x21] ss:$4 sm:$0xff] %v1512_v52  ;;  %v1049_v52 = vld [vmem:[%s5630_s12 + $0x60] sm:$0xff] }
 0x1d0   : > { %1855 = vst [vmem:[#allocation1 + $0x22] ss:$4 sm:$0xff] %v1513_v39  ;;  %v1528_v39 = vrot.slane %v1048_v56, 6 }
 0x1d1   : > { %2009 = vrot.lane.b32.xlu2 %v1848_v19, %s4725_s13  ;;  %1856 = vst [vmem:[#allocation1 + $0x23] ss:$4 sm:$0xff] %v1044_v27  ;;  %v1529_v19 = vrot.slane %v1049_v52, 2 }
 0x1d3   : > { %v1857_v43 = vld.sshfl [vmem:[#allocation1] sm:$0xff pattern:$0x73625140] }
 0x1d4   : > { %2011 = vrot.lane.b32.xlu0 %v1857_v43, %s4725_s13  ;;  %1862 = vst [vmem:[#allocation1 + $0x3] ss:$4 sm:$0xff] %v8320_v5  ;;  %v1531_v43 = vrot.slane %v1049_v52, 6 }
 0x1d5   : > { %1859 = vst [vmem:[#allocation1] ss:$4 sm:$0xff] %v1514_v60  ;;  %v1530_v60 = vrot.slane %v1049_v52, 4 }
 0x1d6   : > { %1860 = vst [vmem:[#allocation1 + $0x1] ss:$4 sm:$0xff] %v1515_v13  ;;  %v1050_v13 = vld [vmem:[%s5630_s12 + $0x68] sm:$0xff] }
 0x1d7   : > { %1861 = vst [vmem:[#allocation1 + $0x2] ss:$4 sm:$0xff] %v1516_v18 }
 0x1d8   : > { %v1858_v20 = vld.sshfl [vmem:[#allocation1 + $0x20] sm:$0xff pattern:$0x73625140] }
 0x1d9   : > { %2013 = vrot.lane.b32.xlu1 %v1858_v20, %s4725_s13  ;;  %1863 = vst [vmem:[#allocation1 + $0x20] ss:$4 sm:$0xff] %v1045_v4  ;;  %v1532_v4 = vrot.slane %v1050_v13, 2 }
 0x1da   : > { %1864 = vst [vmem:[#allocation1 + $0x21] ss:$4 sm:$0xff] %v1517_v41  ;;  %v1533_v41 = vrot.slane %v1050_v13, 4 }
 0x1db   : > { %1865 = vst [vmem:[#allocation1 + $0x22] ss:$4 sm:$0xff] %v1518_v30  ;;  %v1534_v30 = vrot.slane %v1050_v13, 6 }
 0x1dc   : > { %1866 = vst [vmem:[#allocation1 + $0x23] ss:$4 sm:$0xff] %v1519_v8  ;;  %v1051_v8 = vld [vmem:[%s5630_s12 + $0x70] sm:$0xff] }
 0x1de   : > { %v1867_v21 = vld.sshfl [vmem:[#allocation1] sm:$0xff pattern:$0x73625140] }
 0x1df   : > { %1869 = vst [vmem:[#allocation1] ss:$4 sm:$0xff] %v1046_v32  ;;  %2015 = vrot.lane.b32.xlu2 %v1867_v21, %s4725_s13  ;;  %v1535_v32 = vrot.slane %v1051_v8, 2 }
 0x1e0   : > { %1870 = vst [vmem:[#allocation1 + $0x1] ss:$4 sm:$0xff] %v1520_v0  ;;  %v1536_v0 = vrot.slane %v1051_v8, 4 }
 0x1e1   : > { %1871 = vst [vmem:[#allocation1 + $0x2] ss:$4 sm:$0xff] %v1521_v61  ;;  %v1537_v61 = vrot.slane %v1051_v8, 6 }
 0x1e2   : > { %1872 = vst [vmem:[#allocation1 + $0x3] ss:$4 sm:$0xff] %v1522_v9  ;;  %v1052_v9 = vld [vmem:[%s5630_s12 + $0x78] sm:$0xff] }
 0x1e3   : > { %v1868_v25 = vld.sshfl [vmem:[#allocation1 + $0x20] sm:$0xff pattern:$0x73625140] }
 0x1e4   : > { %2017 = vrot.lane.b32.xlu0 %v1868_v25, %s4725_s13  ;;  %1873 = vst [vmem:[#allocation1 + $0x20] ss:$4 sm:$0xff] %v8320_v5 }
 0x1e5   : > { %1874 = vst [vmem:[#allocation1 + $0x21] ss:$4 sm:$0xff] %v1047_v63  ;;  %v1538_v63 = vrot.slane %v1052_v9, 2 }
 0x1e6   : > { %1875 = vst [vmem:[#allocation1 + $0x22] ss:$4 sm:$0xff] %v1523_v37  ;;  %v1539_v37 = vrot.slane %v1052_v9, 4 }
 0x1e7   : > { %1876 = vst [vmem:[#allocation1 + $0x23] ss:$4 sm:$0xff] %v1524_v15  ;;  %v1540_v15 = vrot.slane %v1052_v9, 6 }
 0x1e9   : > { %v1877_v17 = vld.sshfl [vmem:[#allocation1] sm:$0xff pattern:$0x73625140] }
 0x1ea   : > { %2019 = vrot.lane.b32.xlu1 %v1877_v17, %s4725_s13  ;;  %1879 = vst [vmem:[#allocation1] ss:$4 sm:$0xff] %v1525_v23 }
 0x1eb   : > { %1880 = vst [vmem:[#allocation1 + $0x1] ss:$4 sm:$0xff] %v1048_v56  ;;  %v1053_v56 = vld [vmem:[%s5630_s12 + $0x80] sm:$0xff] }
 0x1ec   : > { %1881 = vst [vmem:[#allocation1 + $0x2] ss:$4 sm:$0xff] %v1526_v50  ;;  %v1541_v23 = vrot.slane %v1053_v56, 2  ;;  %v1542_v50 = vrot.slane %v1053_v56, 4 }
 0x1ed   : > { %1882 = vst [vmem:[#allocation1 + $0x3] ss:$4 sm:$0xff] %v1527_v51  ;;  %v1054_v51 = vld [vmem:[%s5630_s12 + $0x88] sm:$0xff] }
 0x1ee   : > { %v1878_v27 = vld.sshfl [vmem:[#allocation1 + $0x20] sm:$0xff pattern:$0x73625140] }
 0x1ef   : > { %1883 = vst [vmem:[#allocation1 + $0x20] ss:$4 sm:$0xff] %v1528_v39  ;;  %2021 = vrot.lane.b32.xlu2 %v1878_v27, %s4725_s13  ;;  %v1544_v39 = vrot.slane %v1054_v51, 2  ;;  %v1546_v27 = vrot.slane %v1054_v51, 6 }
 0x1f0   : > { %1884 = vst [vmem:[#allocation1 + $0x21] ss:$4 sm:$0xff] %v8320_v5 }
 0x1f1   : > { %1885 = vst [vmem:[#allocation1 + $0x22] ss:$4 sm:$0xff] %v1049_v52  ;;  %v1543_v52 = vrot.slane %v1053_v56, 6 }
 0x1f2   : > { %1886 = vst [vmem:[#allocation1 + $0x23] ss:$4 sm:$0xff] %v1529_v19  ;;  %v1545_v19 = vrot.slane %v1054_v51, 4 }
 0x1f4   : > { %v1887_v18 = vld.sshfl [vmem:[#allocation1] sm:$0xff pattern:$0x73625140] }
 0x1f5   : > { %2023 = vrot.lane.b32.xlu0 %v1887_v18, %s4725_s13  ;;  %1889 = vst [vmem:[#allocation1] ss:$4 sm:$0xff] %v1530_v60 }
 0x1f6   : > { %1890 = vst [vmem:[#allocation1 + $0x1] ss:$4 sm:$0xff] %v1531_v43 }
 0x1f7   : > { %1891 = vst [vmem:[#allocation1 + $0x2] ss:$4 sm:$0xff] %v1050_v13  ;;  %v1055_v13 = vld [vmem:[%s5630_s12 + $0x90] sm:$0xff] }
 0x1f8   : > { %1892 = vst [vmem:[#allocation1 + $0x3] ss:$4 sm:$0xff] %v1532_v4  ;;  %v1547_v43 = vrot.slane %v1055_v13, 2  ;;  %v1548_v4 = vrot.slane %v1055_v13, 4 }
 0x1f9   : > { %v1888_v20 = vld.sshfl [vmem:[#allocation1 + $0x20] sm:$0xff pattern:$0x73625140] }
 0x1fa   : > { %2025 = vrot.lane.b32.xlu1 %v1888_v20, %s4725_s13  ;;  %1895 = vst [vmem:[#allocation1 + $0x22] ss:$4 sm:$0xff] %v8320_v5 }
 0x1fb   : > { %1893 = vst [vmem:[#allocation1 + $0x20] ss:$4 sm:$0xff] %v1533_v41  ;;  %v1056_v41 = vld [vmem:[%s5630_s12 + $0x98] sm:$0xff] }
 0x1fc   : > { %1894 = vst [vmem:[#allocation1 + $0x21] ss:$4 sm:$0xff] %v1534_v30  ;;  %v1549_v30 = vrot.slane %v1055_v13, 6  ;;  %v1550_v20 = vrot.slane %v1056_v41, 2 }
 0x1fd   : > { %1896 = vst [vmem:[#allocation1 + $0x23] ss:$4 sm:$0xff] %v1051_v8 }
 0x1ff   : > { %v1897_v21 = vld.sshfl [vmem:[#allocation1] sm:$0xff pattern:$0x73625140] }
 0x200   : > { %1899 = vst [vmem:[#allocation1] ss:$4 sm:$0xff] %v1535_v32  ;;  %2027 = vrot.lane.b32.xlu2 %v1897_v21, %s4725_s13  ;;  %v1551_v32 = vrot.slane %v1056_v41, 4 }
 0x201   : > { %1900 = vst [vmem:[#allocation1 + $0x1] ss:$4 sm:$0xff] %v1536_v0  ;;  %v1552_v0 = vrot.slane %v1056_v41, 6 }
 0x202   : > { %1901 = vst [vmem:[#allocation1 + $0x2] ss:$4 sm:$0xff] %v1537_v61  ;;  %v1057_v61 = vld [vmem:[%s5630_s12 + $0xa0] sm:$0xff] }
 0x203   : > { %1902 = vst [vmem:[#allocation1 + $0x3] ss:$4 sm:$0xff] %v1052_v9  ;;  %v1553_v9 = vrot.slane %v1057_v61, 2 }
 0x204   : > { %v1898_v25 = vld.sshfl [vmem:[#allocation1 + $0x20] sm:$0xff pattern:$0x73625140] }
 0x205   : > { %2029 = vrot.lane.b32.xlu0 %v1898_v25, %s4725_s13  ;;  %1906 = vst [vmem:[#allocation1 + $0x23] ss:$4 sm:$0xff] %v8320_v5  ;;  %v1555_v25 = vrot.slane %v1057_v61, 6 }
 0x206   : > { %1903 = vst [vmem:[#allocation1 + $0x20] ss:$4 sm:$0xff] %v1538_v63  ;;  %v1554_v63 = vrot.slane %v1057_v61, 4 }
 0x207   : > { %1904 = vst [vmem:[#allocation1 + $0x21] ss:$4 sm:$0xff] %v1539_v37  ;;  %v1058_v37 = vld [vmem:[%s5630_s12 + $0xa8] sm:$0xff] }
 0x208   : > { %1905 = vst [vmem:[#allocation1 + $0x22] ss:$4 sm:$0xff] %v1540_v15 }
 0x20a   : > { %v1907_v17 = vld.sshfl [vmem:[#allocation1] sm:$0xff pattern:$0x73625140] }
 0x20b   : > { %2031 = vrot.lane.b32.xlu1 %v1907_v17, %s4725_s13  ;;  %1909 = vst [vmem:[#allocation1] ss:$4 sm:$0xff] %v1053_v56  ;;  %v1556_v56 = vrot.slane %v1058_v37, 2  ;;  %v1558_v17 = vrot.slane %v1058_v37, 6 }
 0x20c   : > { %1910 = vst [vmem:[#allocation1 + $0x1] ss:$4 sm:$0xff] %v1541_v23  ;;  %v1557_v23 = vrot.slane %v1058_v37, 4 }
 0x20d   : > { %1911 = vst [vmem:[#allocation1 + $0x2] ss:$4 sm:$0xff] %v1542_v50  ;;  %v1059_v50 = vld [vmem:[%s5630_s12 + $0xb0] sm:$0xff] }
 0x20e   : > { %1912 = vst [vmem:[#allocation1 + $0x3] ss:$4 sm:$0xff] %v1543_v52  ;;  %v1559_v52 = vrot.slane %v1059_v50, 2 }
 0x20f   : > { %v1908_v60 = vld.sshfl [vmem:[#allocation1 + $0x20] sm:$0xff pattern:$0x73625140] }
 0x210   : > { %1913 = vst [vmem:[#allocation1 + $0x20] ss:$4 sm:$0xff] %v1054_v51  ;;  %2033 = vrot.lane.b32.xlu2 %v1908_v60, %s4725_s13  ;;  %v1060_v60 = vld [vmem:[%s5630_s12 + $0xb8] sm:$0xff] }
 0x211   : > { %1914 = vst [vmem:[#allocation1 + $0x21] ss:$4 sm:$0xff] %v1544_v39  ;;  %v1560_v39 = vrot.slane %v1059_v50, 4 }
 0x212   : > { %1915 = vst [vmem:[#allocation1 + $0x22] ss:$4 sm:$0xff] %v1545_v19  ;;  %v1561_v19 = vrot.slane %v1059_v50, 6 }
 0x213   : > { %1916 = vst [vmem:[#allocation1 + $0x23] ss:$4 sm:$0xff] %v1546_v27 }
 0x215   : > { %v1917_v18 = vld.sshfl [vmem:[#allocation1] sm:$0xff pattern:$0x73625140] }
 0x216   : > { %2035 = vrot.lane.b32.xlu0 %v1917_v18, %s4725_s13  ;;  %1919 = vst [vmem:[#allocation1] ss:$4 sm:$0xff] %v8320_v5  ;;  %v1563_v18 = vrot.slane %v1060_v60, 4 }
 0x217   : > { %1920 = vst [vmem:[#allocation1 + $0x1] ss:$4 sm:$0xff] %v1055_v13  ;;  %v5701_v13 = vpop.permute.xlu0 %2363 }
 0x218   : > { %1921 = vst [vmem:[#allocation1 + $0x2] ss:$4 sm:$0xff] %v1547_v43  ;;  %v1562_v43 = vrot.slane %v1060_v60, 2 }
 0x219   : > { %1922 = vst [vmem:[#allocation1 + $0x3] ss:$4 sm:$0xff] %v1548_v4  ;;  %v1564_v4 = vrot.slane %v1060_v60, 6 }
 0x21a   : > { %v1918_v8 = vld.sshfl [vmem:[#allocation1 + $0x20] sm:$0xff pattern:$0x73625140]  ;;  %8332 = vst [vmem:[#allocation6_spill] sm:$0xff] %v5701_v13 }
 0x21b   : > { %2037 = vrot.lane.b32.xlu1 %v1918_v8, %s4725_s13  ;;  %1923 = vst [vmem:[#allocation1 + $0x20] ss:$4 sm:$0xff] %v1549_v30  ;;  %v1061_v30 = vld [vmem:[%s5630_s12 + $0xc0] sm:$0xff] }
 0x21c   : > { %1924 = vst [vmem:[#allocation1 + $0x21] ss:$4 sm:$0xff] %v1056_v41  ;;  %v1566_v8 = vrot.slane %v1061_v30, 4 }
 0x21d   : > { %1925 = vst [vmem:[#allocation1 + $0x22] ss:$4 sm:$0xff] %v1550_v20  ;;  %v1565_v20 = vrot.slane %v1061_v30, 2 }
 0x21e   : > { %1926 = vst [vmem:[#allocation1 + $0x23] ss:$4 sm:$0xff] %v1551_v32 }
 0x220   : > { %v1927_v21 = vld.sshfl [vmem:[#allocation1] sm:$0xff pattern:$0x73625140] }
 0x221   : > { %1929 = vst [vmem:[#allocation1] ss:$4 sm:$0xff] %v1552_v0  ;;  %2039 = vrot.lane.b32.xlu2 %v1927_v21, %s4725_s13  ;;  %v1567_v0 = vrot.slane %v1061_v30, 6 }
 0x222   : > { %1930 = vst [vmem:[#allocation1 + $0x1] ss:$4 sm:$0xff] %v8320_v5 }
 0x223   : > { %1931 = vst [vmem:[#allocation1 + $0x2] ss:$4 sm:$0xff] %v1057_v61  ;;  %v1062_v61 = vld [vmem:[%s5630_s12 + $0xc8] sm:$0xff] }
 0x224   : > { %1932 = vst [vmem:[#allocation1 + $0x3] ss:$4 sm:$0xff] %v1553_v9  ;;  %v1568_v21 = vrot.slane %v1062_v61, 2 }
 0x225   : > { %v1928_v15 = vld.sshfl [vmem:[#allocation1 + $0x20] sm:$0xff pattern:$0x73625140]  ;;  %v2000_v9 = vpop.permute.xlu0 %1999 }
 0x226   : > { %2041 = vrot.lane.b32.xlu0 %v1928_v15, %s4725_s13  ;;  %1933 = vst [vmem:[#allocation1 + $0x20] ss:$4 sm:$0xff] %v1554_v63  ;;  %v1569_v63 = vrot.slane %v1062_v61, 4  ;;  %v1063_v15 = vld [vmem:[%s5630_s12 + $0xd0] sm:$0xff] }
 0x227   : > { %1934 = vst [vmem:[#allocation1 + $0x21] ss:$4 sm:$0xff] %v1555_v25 }
 0x228   : > { %1935 = vst [vmem:[#allocation1 + $0x22] ss:$4 sm:$0xff] %v1058_v37  ;;  %v1570_v37 = vrot.slane %v1062_v61, 6 }
 0x229   : > { %1936 = vst [vmem:[#allocation1 + $0x23] ss:$4 sm:$0xff] %v1556_v56  ;;  %v1571_v56 = vrot.slane %v1063_v15, 2 }
 0x22b   : > { %v1937_v51 = vld.sshfl [vmem:[#allocation1] sm:$0xff pattern:$0x73625140] }
 0x22c   : > { %2043 = vrot.lane.b32.xlu1 %v1937_v51, %s4725_s13  ;;  %1941 = vst [vmem:[#allocation1 + $0x2] ss:$4 sm:$0xff] %v8320_v5  ;;  %v1064_v51 = vld [vmem:[%s5630_s12 + $0xd8] sm:$0xff] }
 0x22d   : > { %1939 = vst [vmem:[#allocation1] ss:$4 sm:$0xff] %v1557_v23  ;;  %v1572_v23 = vrot.slane %v1063_v15, 4 }
 0x22e   : > { %1940 = vst [vmem:[#allocation1 + $0x1] ss:$4 sm:$0xff] %v1558_v17  ;;  %v2002_v17 = vpop.permute.xlu0 %2001 }
 0x22f   : > { %1942 = vst [vmem:[#allocation1 + $0x3] ss:$4 sm:$0xff] %v1059_v50 }
 0x230   : > { %v1938_v27 = vld.sshfl [vmem:[#allocation1 + $0x20] sm:$0xff pattern:$0x73625140] }
 0x231   : > { %1943 = vst [vmem:[#allocation1 + $0x20] ss:$4 sm:$0xff] %v1559_v52  ;;  %2045 = vrot.lane.b32.xlu2 %v1938_v27, %s4725_s13  ;;  %v1573_v52 = vrot.slane %v1063_v15, 6  ;;  %v1574_v27 = vrot.slane %v1064_v51, 2 }
 0x232   : > { %1944 = vst [vmem:[#allocation1 + $0x21] ss:$4 sm:$0xff] %v1560_v39  ;;  %v5715_v39 = vsel %vm2107_vm2, %v5437_v62, %v2002_v17  ;;  %v5727_v62 = vpop.permute.xlu1 %2547 }
 0x233   : > { %1945 = vst [vmem:[#allocation1 + $0x22] ss:$4 sm:$0xff] %v1561_v19  ;;  %v2108_v19 = vsel %vm2107_vm2, %v5430_v42, %v2000_v9  ;;  %v5735_v9 = vpop.permute.xlu2 %2007 }
 0x234   : > { %1946 = vst [vmem:[#allocation1 + $0x23] ss:$4 sm:$0xff] %v1060_v60 }
 0x235   : > { %8334 = vst [vmem:[#allocation8_spill] sm:$0xff] %v5727_v62 }
 0x236   : > { %v1947_v41 = vld.sshfl [vmem:[#allocation1] sm:$0xff pattern:$0x73625140] }
 0x237   : > { %2047 = vrot.lane.b32.xlu0 %v1947_v41, %s4725_s13  ;;  %1949 = vst [vmem:[#allocation1] ss:$4 sm:$0xff] %v1562_v43  ;;  %v1575_v43 = vrot.slane %v1064_v51, 4  ;;  %v1065_v41 = vld [vmem:[%s5630_s12 + $0xe0] sm:$0xff] }
 0x238   : > { %1950 = vst [vmem:[#allocation1 + $0x1] ss:$4 sm:$0xff] %v1563_v18  ;;  %v2182_v18 = vrot.slane %v5715_v39, 4 }
 0x239   : > { %1951 = vst [vmem:[#allocation1 + $0x2] ss:$4 sm:$0xff] %v1564_v4  ;;  %v2181_v4 = vrot.slane %v2108_v19, 4 }
 0x23a   : > { %1952 = vst [vmem:[#allocation1 + $0x3] ss:$4 sm:$0xff] %v8320_v5 }
 0x23b   : > { %v1948_v32 = vld.sshfl [vmem:[#allocation1 + $0x20] sm:$0xff pattern:$0x73625140]  ;;  %v5725_v42 = vsel %vm2180_vm3, %v2181_v4, %v2182_v18 }
 0x23c   : > { %2049 = vrot.lane.b32.xlu1 %v1948_v32, %s4725_s13  ;;  %1953 = vst [vmem:[#allocation1 + $0x20] ss:$4 sm:$0xff] %v1061_v30  ;;  %v1576_v30 = vrot.slane %v1064_v51, 6  ;;  %v5730_v32 = vsel %vm2180_vm3, 0.0, %v2181_v4 }
 0x23d   : > { %1954 = vst [vmem:[#allocation1 + $0x21] ss:$4 sm:$0xff] %v1565_v20  ;;  %v1577_v20 = vrot.slane %v1065_v41, 2 }
 0x23e   : > { %1955 = vst [vmem:[#allocation1 + $0x22] ss:$4 sm:$0xff] %v1566_v8 }
 0x23f   : > { %1956 = vst [vmem:[#allocation1 + $0x23] ss:$4 sm:$0xff] %v1567_v0  ;;  %v2295_v0 = vrot.slane %v5725_v42, 1 }
 0x240   : > { %8333 = vst [vmem:[#allocation7_spill] sm:$0xff] %v5725_v42 }
 0x241   : > { %v1957_v25 = vld.sshfl [vmem:[#allocation1] sm:$0xff pattern:$0x73625140]  ;;  %8335 = vst [vmem:[#allocation9_spill] sm:$0xff] %v5730_v32 }
 0x242   : > { %1959 = vst [vmem:[#allocation1] ss:$4 sm:$0xff] %v1062_v61  ;;  %2051 = vrot.lane.b32.xlu2 %v1957_v25, %s4725_s13  ;;  %v1578_v61 = vrot.slane %v1065_v41, 4 }
 0x243   : > { %1960 = vst [vmem:[#allocation1 + $0x1] ss:$4 sm:$0xff] %v1568_v21  ;;  %v1579_v21 = vrot.slane %v1065_v41, 6 }
 0x244   : > { %1961 = vst [vmem:[#allocation1 + $0x2] ss:$4 sm:$0xff] %v1569_v63  ;;  %v2293_v63 = vrot.slane %v5730_v32, 1 }
 0x245   : > { %1962 = vst [vmem:[#allocation1 + $0x3] ss:$4 sm:$0xff] %v1570_v37  ;;  %v1066_v37 = vld [vmem:[%s5630_s12 + $0xe8] sm:$0xff] }
 0x246   : > { %v1958_v50 = vld.sshfl [vmem:[#allocation1 + $0x20] sm:$0xff pattern:$0x73625140]  ;;  %v1581_v17 = vrot.slane %v1066_v37, 4 }
 0x247   : > { %1963 = vst [vmem:[#allocation1 + $0x20] ss:$4 sm:$0xff] %v8320_v5  ;;  %2053 = vrot.lane.b32.xlu0 %v1958_v50, %s4725_s13  ;;  %v2479_v50 = vrot.slane %v5725_v42, 2 }
 0x248   : > { %1964 = vst [vmem:[#allocation1 + $0x21] ss:$4 sm:$0xff] %v1063_v15  ;;  %v2296_v15 = vsel %vm356_vm0, %v2293_v63, %v2295_v0 }
 0x249   : > { %1965 = vst [vmem:[#allocation1 + $0x22] ss:$4 sm:$0xff] %v1571_v56  ;;  %v1580_v56 = vrot.slane %v1066_v37, 2 }
 0x24a   : > { %1966 = vst [vmem:[#allocation1 + $0x23] ss:$4 sm:$0xff] %v1572_v23  ;;  %v2004_v23 = vpop.permute.xlu1 %2003 }
 0x24c   : > { %v1967_v60 = vld.sshfl [vmem:[#allocation1] sm:$0xff pattern:$0x73625140] }
 0x24d   : > { %2055 = vrot.lane.b32.xlu1 %v1967_v60, %s4725_s13  ;;  %1969 = vst [vmem:[#allocation1] ss:$4 sm:$0xff] %v1573_v52  ;;  %v1582_v52 = vrot.slane %v1066_v37, 6  ;;  %v1067_v60 = vld [vmem:[%s5630_s12 + $0xf0] sm:$0xff] }
 0x24e   : > { %1970 = vst [vmem:[#allocation1 + $0x1] ss:$4 sm:$0xff] %v1064_v51  ;;  %v2477_v51 = vrot.slane %v5730_v32, 2  ;;  %v1583_v4 = vrot.slane %v1067_v60, 2 }
 0x24f   : > { %1971 = vst [vmem:[#allocation1 + $0x2] ss:$4 sm:$0xff] %v1574_v27 }
 0x250   : > { %1972 = vst [vmem:[#allocation1 + $0x3] ss:$4 sm:$0xff] %v1575_v43  ;;  %v2480_v27 = vsel %vm2474_vm4, %v2477_v51, %v2479_v50  ;;  %v5752_v43 = vpop.permute.xlu2 %2009 }
 0x251   : > { %v1968_v8 = vld.sshfl [vmem:[#allocation1 + $0x20] sm:$0xff pattern:$0x73625140] }
 0x252   : > { %1973 = vst [vmem:[#allocation1 + $0x20] ss:$4 sm:$0xff] %v1576_v30  ;;  %2057 = vrot.lane.b32.xlu2 %v1968_v8, %s4725_s13  ;;  %v8336_v30 = vld [vmem:[#allocation3_spill] sm:$0xff]  ;;  %v1585_v8 = vrot.slane %v1067_v60, 6 }
 0x253   : > { %1974 = vst [vmem:[#allocation1 + $0x21] ss:$4 sm:$0xff] %v8320_v5 }
 0x254   : > { %1975 = vst [vmem:[#allocation1 + $0x22] ss:$4 sm:$0xff] %v1065_v41  ;;  %v1584_v41 = vrot.slane %v1067_v60, 4 }
 0x255   : > { %1976 = vst [vmem:[#allocation1 + $0x23] ss:$4 sm:$0xff] %v1577_v20  ;;  %v2478_v20 = vsel %vm2474_vm4, %v8336_v30, %v2477_v51 }
 0x257   : > { %v1977_v25 = vld.sshfl [vmem:[#allocation1] sm:$0xff pattern:$0x73625140] }
 0x258   : > { %2059 = vrot.lane.b32.xlu0 %v1977_v25, %s4725_s13  ;;  %1979 = vst [vmem:[#allocation1] ss:$4 sm:$0xff] %v1578_v61  ;;  %v8337_v25 = vld [vmem:[#allocation2_spill] sm:$0xff]  ;;  %v5767_v51 = vpop.permute.xlu2 %2015 }
 0x259   : > { %1980 = vst [vmem:[#allocation1 + $0x1] ss:$4 sm:$0xff] %v1579_v21  ;;  %v2006_v21 = vpop.permute.xlu1 %2005 }
 0x25a   : > { %2367 = vrot.lane.b32.xlu2 %v2296_v15, %s4723_s26  ;;  %1981 = vst [vmem:[#allocation1 + $0x2] ss:$4 sm:$0xff] %v1066_v37  ;;  %v2776_v37 = vrot.slane %v5725_v42, 3  ;;  %v2294_v15 = vsel %vm356_vm0, %v8337_v25, %v2293_v63  ;;  %v2110_v63 = vsel %vm2107_vm2, %v5442_v22, %v2004_v23 }
 0x25b   : > { %1982 = vst [vmem:[#allocation1 + $0x3] ss:$4 sm:$0xff] %v1580_v56  ;;  %v2775_v56 = vrot.slane %v5730_v32, 3 }
 0x25c   : > { %v1978_v19 = vld.sshfl [vmem:[#allocation1 + $0x20] sm:$0xff pattern:$0x73625140] }
 0x25d   : > { %2061 = vrot.lane.b32.xlu1 %v1978_v19, %s4725_s13  ;;  %1985 = vst [vmem:[#allocation1 + $0x22] ss:$4 sm:$0xff] %v8320_v5 }
 0x25e   : > { %1983 = vst [vmem:[#allocation1 + $0x20] ss:$4 sm:$0xff] %v1581_v17  ;;  %v5765_v17 = vsel %vm2107_vm2, %v5449_v6, %v2006_v21 }
 0x25f   : > { %1984 = vst [vmem:[#allocation1 + $0x21] ss:$4 sm:$0xff] %v1582_v52  ;;  %v2777_v52 = vsel %vm2774_vm5, %v2775_v56, %v2776_v37  ;;  %v2186_v6 = vrot.slane %v5765_v17, 4 }
 0x260   : > { %2551 = vrot.lane.b32.xlu0 %v2480_v27, %s4724_s27  ;;  %1986 = vst [vmem:[#allocation1 + $0x23] ss:$4 sm:$0xff] %v1067_v60  ;;  %v2960_v60 = vrot.slane %v5725_v42, 4 }
 0x262   : > { %2549 = vrot.lane.b32.xlu2 %v2478_v20, %s4724_s27  ;;  %v1987_v61 = vld.sshfl [vmem:[#allocation1] sm:$0xff pattern:$0x73625140]  ;;  %v1068_v20 = vld [vmem:[%s5630_s12 + $0xf8] sm:$0xff]  ;;  %s4740_s12 = smov 91  }
 0x263   : > { %1989 = vst [vmem:[#allocation1] ss:$4 sm:$0xff] %v1583_v4  ;;  %v2959_v4 = vrot.slane %v5730_v32, 4  ;;  %v1586_v23 = vrot.slane %v1068_v20, 2  ;;  %v1588_v21 = vrot.slane %v1068_v20, 6 }
 0x264   : > { %1990 = vst [vmem:[#allocation1 + $0x1] ss:$4 sm:$0xff] %v1584_v41  ;;  %v2184_v41 = vrot.slane %v2110_v63, 4 }
 0x265   : > { %2365 = vrot.lane.b32.xlu1 %v2294_v15, %s4723_s26  ;;  %1991 = vst [vmem:[#allocation1 + $0x2] ss:$4 sm:$0xff] %v1585_v8  ;;  %v2961_v30 = vsel %vm2180_vm3, %v2959_v4, %v2960_v60  ;;  %v1587_v8 = vrot.slane %v1068_v20, 4  ;;  %v5793_v15 = vpop.permute.xlu2 %2021  ;;  %v2012_v4 = vpop.permute.xlu0 %2011 }
 0x266   : > { %v5783_v22 = vsel %vm2180_vm3, %v2184_v41, %v2186_v6  ;;  %1992 = vst [vmem:[#allocation1 + $0x3] ss:$4 sm:$0xff] %v1068_v20  ;;  %v5789_v25 = vsel %vm2180_vm3, %v2182_v18, %v2184_v41  ;;  %v5819_v20 = vsel %vm2107_vm2, %v5460_v58, %v5752_v43 }
 0x267   : > { %v1988_v19 = vld.sshfl [vmem:[#allocation1 + $0x20] sm:$0xff pattern:$0x73625140]  ;;  %8338 = vst [vmem:[#allocation10_spill] sm:$0xff] %v5783_v22  ;;  %v2297_v56 = vrot.slane %v5789_v25, 1  ;;  %v2483_v39 = vrot.slane %v5783_v22, 2 }
 0x268   : > { %2848 = vrot.lane.b32.xlu0 %v2777_v52, %s4726_s14  ;;  %1996 = vst [vmem:[#allocation1 + $0x23] ss:$4 sm:$0xff] %v8320_v5  ;;  %v2481_v18 = vrot.slane %v5789_v25, 2  ;;  %v2780_v41 = vrot.slane %v5783_v22, 3  ;;  %v2962_v58 = vrot.slane %v5789_v25, 4 }
 0x269   : > { %8339 = vst [vmem:[#allocation11_spill] sm:$0xff] %v5789_v25  ;;  %v2298_v52 = vsel %vm356_vm0, %v2295_v0, %v2297_v56  ;;  %v2014_v0 = vpop.permute.xlu1 %2013 }
 0x26a   : > { %2663 = vrot.lane.b32.xlu2 %v2480_v27, %s4727_s15  ;;  %1993 = vst [vmem:[#allocation1 + $0x20] ss:$4 sm:$0xff] %v1586_v23  ;;  %v2299_v27 = vrot.slane %v5783_v22, 1 }
 0x26b   : > { %1994 = vst [vmem:[#allocation1 + $0x21] ss:$4 sm:$0xff] %v1587_v8  ;;  %v2964_v8 = vrot.slane %v5783_v22, 4 }
 0x26c   : > { %1995 = vst [vmem:[#allocation1 + $0x22] ss:$4 sm:$0xff] %v1588_v21  ;;  %v2300_v17 = vsel %vm356_vm0, %v2297_v56, %v2299_v27  ;;  %v2190_v21 = vrot.slane %v5819_v20, 4 }
 0x26d   : > { %3032 = vrot.lane.b32.xlu1 %v2961_v30, %s4728_s16  ;;  %v5807_v63 = vpop.permute.xlu2 %2027  ;;  %v2778_v30 = vrot.slane %v5789_v25, 3  ;;  %v5828_v56 = vpop.permute.xlu0 %2017 }
 0x26f   : > { %v2781_v23 = vsel %vm2774_vm5, %v2778_v30, %v2780_v41  ;;  %v2779_v20 = vsel %vm2774_vm5, %v2776_v37, %v2778_v30 }
 0x270   : > { %2065 = vrot.lane.b32.xlu0 %v1988_v19, %s4725_s13  ;;  %v2484_v19 = vsel %vm2474_vm4, %v2481_v18, %v2483_v39 }
 0x272   : > { %2063 = vrot.lane.b32.xlu2 %v1987_v61, %s4725_s13  ;;  %v2482_v61 = vsel %vm2474_vm4, %v2479_v50, %v2481_v18  ;;  %v2112_v50 = vsel %vm2107_vm2, %v5454_v31, %v5735_v9  ;;  %v5835_v18 = vsel %vm2180_vm3, %v2962_v58, %v2964_v8  ;;  %v5842_v31 = vpop.permute.xlu1 %2019  ;;  %v2963_v9 = vsel %vm2180_vm3, %v2960_v60, %v2962_v58  ;;  %v1997_v58 = vld.sshfl [vmem:[#allocation1] sm:$0xff pattern:$0x73625140] }
 0x273   : > { %v2188_v43 = vrot.slane %v2112_v50, 4  ;;  %8340 = vst [vmem:[#allocation12_spill] sm:$0xff] %v5835_v18 }
 0x275   : > { %2371 = vrot.lane.b32.xlu1 %v2300_v17, %s4723_s26  ;;  %v5830_v17 = vpop.permute.xlu2 %2033  ;;  %v5855_v50 = vpop.permute.xlu0 %2023 }
 0x278   : > { %2369 = vrot.lane.b32.xlu0 %v2298_v52, %s4723_s26  ;;  %v5838_v52 = vsel %vm2180_vm3, %v2188_v43, %v2190_v21 }
 0x279   : > { %8341 = vst [vmem:[#allocation3_spill] sm:$0xff] %v5838_v52  ;;  %v2487_v30 = vrot.slane %v5838_v52, 2 }
 0x27a   : > { %2555 = vrot.lane.b32.xlu2 %v2484_v19, %s4724_s27 }
 0x27d   : > { %2553 = vrot.lane.b32.xlu1 %v2482_v61, %s4724_s27  ;;  %v5857_v62 = vpop.permute.xlu2 %2039 }
 0x280   : > { %2665 = vrot.lane.b32.xlu0 %v2482_v61, %s4727_s15  ;;  %v5846_v61 = vsel %vm2180_vm3, %v2186_v6, %v2188_v43  ;;  %v1998_v6 = vld.sshfl [vmem:[#allocation1 + $0x20] sm:$0xff pattern:$0x73625140] }
 0x281   : > { %8342 = vst [vmem:[#allocation2_spill] sm:$0xff] %v5846_v61  ;;  %v2485_v43 = vrot.slane %v5846_v61, 2  ;;  %v2782_v42 = vrot.slane %v5846_v61, 3 }
 0x282   : > { %2852 = vrot.lane.b32.xlu2 %v2781_v23, %s4726_s14  ;;  %v2301_v23 = vrot.slane %v5846_v61, 1 }
 0x283   : > { %v2486_v37 = vsel %vm2474_vm4, %v2483_v39, %v2485_v43  ;;  %v8235_v39 = vrot.slane %v5838_v52, 3 }
 0x285   : > { %2667 = vrot.lane.b32.xlu1 %v2484_v19, %s4727_s15  ;;  %v2303_v19 = vrot.slane %v5838_v52, 1 }
 0x287   : > { %v2304_v60 = vsel %vm356_vm0, %v2301_v23, %v2303_v19 }
 0x288   : > { %3036 = vrot.lane.b32.xlu0 %v5835_v18, %s4728_s16 }
 0x28a   : > { %3034 = vrot.lane.b32.xlu2 %v2963_v9, %s4728_s16  ;;  %v5863_v9 = vpop.permute.xlu1 %2025 }
 0x28b   : > { %v5871_v13 = vpop.permute.xlu2 %2045 }
 0x28d   : > { %2850 = vrot.lane.b32.xlu1 %v2779_v20, %s4726_s14  ;;  %v5869_v20 = vpop.permute.xlu0 %2029 }
 0x290   : > { %2375 = vrot.lane.b32.xlu0 %v2304_v60, %s4723_s26  ;;  %v2302_v60 = vsel %vm356_vm0, %v2299_v27, %v2301_v23  ;;  %v2114_v23 = vsel %vm2107_vm2, %v5467_v59, %v2012_v4 }
 0x292   : > { %2069 = vrot.lane.b32.xlu2 %v1998_v6, %s4725_s13  ;;  %v2488_v6 = vsel %vm2474_vm4, %v2485_v43, %v2487_v30  ;;  %v5877_v32 = vpop.permute.xlu1 %2031 }
 0x295   : > { %2067 = vrot.lane.b32.xlu1 %v1997_v58, %s4725_s13  ;;  %v2115_v58 = vsel %vm2107_vm2, %v5472_v38, %v2014_v0  ;;  %v5884_v18 = vpop.permute.xlu0 %2035  ;;  %v2968_v38 = vrot.slane %v5838_v52, 4  ;;  %v2192_v0 = vrot.slane %v2114_v23, 4  ;;  %s4741_s13 = smov 127  }
 0x296   : > { %v2194_v43 = vrot.slane %v2115_v58, 4 }
 0x297   : > { %v5908_v4 = vsel %vm2180_vm3, %v2190_v21, %v2192_v0 }
 0x298   : > { %2557 = vrot.lane.b32.xlu0 %v2486_v37, %s4724_s27  ;;  %v5901_v22 = vsel %vm2180_vm3, %v2192_v0, %v2194_v43  ;;  %8345 = vst [vmem:[#allocation15_spill] sm:$0xff] %v5908_v4  ;;  %v2305_v0 = vrot.slane %v5908_v4, 1 }
 0x299   : > { %8343 = vst [vmem:[#allocation13_spill] sm:$0xff] %v5901_v22  ;;  %v2491_v58 = vrot.slane %v5901_v22, 2  ;;  %v2307_v21 = vrot.slane %v5901_v22, 1 }
 0x29a   : > { %2373 = vrot.lane.b32.xlu2 %v2302_v60, %s4723_s26  ;;  %v2785_v60 = vsel %vm2774_vm5, %v2782_v42, %v8235_v39  ;;  %v5897_v25 = vpop.permute.xlu1 %2037 }
 0x29c   : > { %v5887_v27 = vpop.permute.xlu2 %2051 }
 0x29d   : > { %2559 = vrot.lane.b32.xlu1 %v2488_v6, %s4724_s27 }
 0x2a0   : > { %2671 = vrot.lane.b32.xlu0 %v2488_v6, %s4727_s15  ;;  %v2966_v6 = vrot.slane %v5846_v61, 4 }
 0x2a2   : > { %2669 = vrot.lane.b32.xlu2 %v2486_v37, %s4727_s15  ;;  %v2783_v37 = vsel %vm2774_vm5, %v2780_v41, %v2782_v42  ;;  %v5905_v59 = vsel %vm2180_vm3, %v2966_v6, %v2968_v38  ;;  %v5914_v23 = vsel %vm2180_vm3, %v2964_v8, %v2966_v6  ;;  %v5916_v42 = vpop.permute.xlu0 %2041  ;;  %v5927_v39 = vpop.permute.xlu1 %2043  ;;  %v2308_v8 = vsel %vm356_vm0, %v2305_v0, %v2307_v21 }
 0x2a3   : > { %8344 = vst [vmem:[#allocation14_spill] sm:$0xff] %v5905_v59  ;;  %v8241_v6 = vrot.slane %v5901_v22, 3 }
 0x2a4   : > { %8346 = vst [vmem:[#allocation16_spill] sm:$0xff] %v5914_v23 }
 0x2a5   : > { %2856 = vrot.lane.b32.xlu1 %v2785_v60, %s4726_s14  ;;  %v2489_v60 = vrot.slane %v5908_v4, 2 }
 0x2a8   : > { %2854 = vrot.lane.b32.xlu0 %v2783_v37, %s4726_s14  ;;  %v2492_v37 = vsel %vm2474_vm4, %v2489_v60, %v2491_v58 }
 0x2aa   : > { %3040 = vrot.lane.b32.xlu2 %v5905_v59, %s4728_s16  ;;  %v2786_v59 = vrot.slane %v5908_v4, 3  ;;  %v5937_v5 = vpop.permute.xlu0 %2047 }
 0x2ac   : > { %v5918_v41 = vpop.permute.xlu2 %2057  ;;  %v2789_v33 = vsel %vm2774_vm5, %v2786_v59, %v8241_v6 }
 0x2ad   : > { %3038 = vrot.lane.b32.xlu1 %v5914_v23, %s4728_s16  ;;  %v2306_v23 = vsel %vm356_vm0, %v2303_v19, %v2305_v0  ;;  %v2490_v19 = vsel %vm2474_vm4, %v2487_v30, %v2489_v60 }
 0x2ae   : > { %v5948_v0 = vpop.permute.xlu1 %2049 }
 0x2b0   : > { %2563 = vrot.lane.b32.xlu0 %v2492_v37, %s4724_s27 }
 0x2b2   : > { %2379 = vrot.lane.b32.xlu2 %v2308_v8, %s4723_s26  ;;  %v2116_v8 = vsel %vm2107_vm2, %v5479_v49, %v5767_v51  ;;  %v2972_v51 = vrot.slane %v5901_v22, 4 }
 0x2b4   : > { %v5933_v61 = vpop.permute.xlu2 %2367 }
 0x2b5   : > { %8347 = vst [vmem:[#allocation17_spill] sm:$0xff] %v5933_v61  ;;  %2377 = vrot.lane.b32.xlu1 %v2306_v23, %s4723_s26  ;;  %v2970_v23 = vrot.slane %v5908_v4, 4  ;;  %v2196_v61 = vrot.slane %v2116_v8, 4 }
 0x2b7   : > { %v5958_v6 = vsel %vm2180_vm3, %v2968_v38, %v2970_v23  ;;  %v5961_v49 = vsel %vm2180_vm3, %v2194_v43, %v2196_v61 }
 0x2b8   : > { %2860 = vrot.lane.b32.xlu0 %v2789_v33, %s4726_s14  ;;  %v2117_v33 = vsel %vm2107_vm2, %v5484_v3, %v5828_v56  ;;  %8349 = vst [vmem:[#allocation19_spill] sm:$0xff] %v5958_v6  ;;  %v2309_v8 = vrot.slane %v5961_v49, 1  ;;  %v5971_v3 = vsel %vm2180_vm3, %v2970_v23, %v2972_v51 }
 0x2b9   : > { %8350 = vst [vmem:[#allocation20_spill] sm:$0xff] %v5961_v49  ;;  %v5964_v30 = vpop.permute.xlu0 %2053  ;;  %v2198_v60 = vrot.slane %v2117_v33, 4 }
 0x2ba   : > { %2561 = vrot.lane.b32.xlu2 %v2490_v19, %s4724_s27  ;;  %8351 = vst [vmem:[#allocation21_spill] sm:$0xff] %v5971_v3 }
 0x2bb   : > { %v5976_v43 = vsel %vm2180_vm3, %v2196_v61, %v2198_v60  ;;  %v2493_v61 = vrot.slane %v5961_v49, 2 }
 0x2bc   : > { %v5951_v57 = vpop.permute.xlu2 %2549  ;;  %8353 = vst [vmem:[#allocation23_spill] sm:$0xff] %v5976_v43  ;;  %v2311_v33 = vrot.slane %v5976_v43, 1 }
 0x2bd   : > { %8348 = vst [vmem:[#allocation18_spill] sm:$0xff] %v5951_v57  ;;  %2673 = vrot.lane.b32.xlu1 %v2490_v19, %s4727_s15  ;;  %v2310_v19 = vsel %vm356_vm0, %v2307_v21, %v2309_v8  ;;  %v2495_v21 = vrot.slane %v5976_v43, 2 }
 0x2bf   : > { %v5980_v38 = vpop.permute.xlu1 %2055 }
 0x2c0   : > { %3042 = vrot.lane.b32.xlu0 %v5958_v6, %s4728_s16 }
 0x2c2   : > { %2675 = vrot.lane.b32.xlu2 %v2492_v37, %s4727_s15  ;;  %v8354_v37 = vrot.slane %v5838_v52, 3 }
 0x2c4   : > { %v5973_v56 = vpop.permute.xlu2 %2663  ;;  %v2787_v23 = vsel %vm2774_vm5, %v8354_v37, %v2786_v59  ;;  %v6004_v59 = vsel %vm2107_vm2, %v5496_v2, %v5793_v15  ;;  %v2496_v37 = vsel %vm2474_vm4, %v2493_v61, %v2495_v21  ;;  %v2974_v2 = vrot.slane %v5961_v49, 4 }
 0x2c5   : > { %8352 = vst [vmem:[#allocation22_spill] sm:$0xff] %v5973_v56  ;;  %3044 = vrot.lane.b32.xlu1 %v5971_v3, %s4728_s16  ;;  %v2312_v56 = vsel %vm356_vm0, %v2309_v8, %v2311_v33  ;;  %v2792_v15 = vrot.slane %v5976_v43, 3 }
 0x2c8   : > { %2381 = vrot.lane.b32.xlu0 %v2310_v19, %s4723_s26  ;;  %v2494_v19 = vsel %vm2474_vm4, %v2491_v58, %v2493_v61  ;;  %v2202_v58 = vrot.slane %v6004_v59, 4 }
 0x2ca   : > { %v5988_v57 = vpop.permute.xlu0 %2059  ;;  %2858 = vrot.lane.b32.xlu2 %v2787_v23, %s4726_s14  ;;  %v8248_v23 = vrot.slane %v5976_v43, 4 }
 0x2cc   : > { %v5993_v6 = vpop.permute.xlu2 %2063  ;;  %v6025_v3 = vsel %vm2180_vm3, %v2974_v2, %v8248_v23 }
 0x2cd   : > { %2383 = vrot.lane.b32.xlu1 %v2312_v56, %s4723_s26  ;;  %v2118_v56 = vsel %vm2107_vm2, %v5491_v16, %v5842_v31  ;;  %8358 = vst [vmem:[#allocation27_spill] sm:$0xff] %v6025_v3  ;;  %v2790_v16 = vrot.slane %v5961_v49, 3 }
 0x2ce   : > { %v2200_v61 = vrot.slane %v2118_v56, 4 }
 0x2cf   : > { %v5997_v4 = vpop.permute.xlu1 %2061 }
 0x2d0   : > { %2677 = vrot.lane.b32.xlu0 %v2494_v19, %s4727_s15  ;;  %v6029_v31 = vsel %vm2180_vm3, %v2200_v61, %v2202_v58  ;;  %v6035_v59 = vsel %vm2180_vm3, %v2198_v60, %v2200_v61  ;;  %v6052_v60 = vsel %vm2180_vm3, %v2972_v51, %v2974_v2 }
 0x2d1   : > { %v8252_v23 = vrot.slane %v6029_v31, 1  ;;  %8362 = vst [vmem:[#allocation31_spill] sm:$0xff] %v6052_v60 }
 0x2d2   : > { %v6007_v8 = vpop.permute.xlu0 %2551  ;;  %2567 = vrot.lane.b32.xlu2 %v2496_v37, %s4724_s27 }
 0x2d3   : > { %8355 = vst [vmem:[#allocation24_spill] sm:$0xff] %v6007_v8 }
 0x2d4   : > { %v6015_v52 = vpop.permute.xlu2 %2555 }
 0x2d5   : > { %8356 = vst [vmem:[#allocation25_spill] sm:$0xff] %v6015_v52  ;;  %2565 = vrot.lane.b32.xlu1 %v2494_v19, %s4724_s27  ;;  %v2793_v19 = vsel %vm2774_vm5, %v2790_v16, %v2792_v15  ;;  %v2313_v52 = vrot.slane %v6035_v59, 1 }
 0x2d7   : > { %v6020_v8 = vpop.permute.xlu1 %2365  ;;  %v2314_v2 = vsel %vm356_vm0, %v2311_v33, %v2313_v52  ;;  %v2794_v33 = vrot.slane %v6035_v59, 3 }
 0x2d8   : > { %8357 = vst [vmem:[#allocation26_spill] sm:$0xff] %v6020_v8  ;;  %3048 = vrot.lane.b32.xlu0 %v6025_v3, %s4728_s16  ;;  %v2316_v3 = vsel %vm356_vm0, %v2313_v52, %v8252_v23  ;;  %v2120_v52 = vsel %vm2107_vm2, %v5503_v12, %v5855_v50  ;;  %v2978_v12 = vrot.slane %v6035_v59, 4 }
 0x2d9   : > { %v2795_v50 = vsel %vm2774_vm5, %v2792_v15, %v2794_v33 }
 0x2da   : > { %v6037_v56 = vpop.permute.xlu0 %2848  ;;  %2864 = vrot.lane.b32.xlu2 %v2793_v19, %s4726_s14  ;;  %v8363_v19 = vrot.slane %v5901_v22, 3 }
 0x2db   : > { %8359 = vst [vmem:[#allocation28_spill] sm:$0xff] %v6037_v56 }
 0x2dc   : > { %v6041_v8 = vpop.permute.xlu2 %2852 }
 0x2dd   : > { %8360 = vst [vmem:[#allocation29_spill] sm:$0xff] %v6041_v8  ;;  %2679 = vrot.lane.b32.xlu1 %v2496_v37, %s4727_s15  ;;  %v2497_v37 = vrot.slane %v6035_v59, 2 }
 0x2df   : > { %v6045_v49 = vpop.permute.xlu1 %3032  ;;  %v2498_v51 = vsel %vm2474_vm4, %v2495_v21, %v2497_v37  ;;  %v2121_v21 = vsel %vm2107_vm2, %v5508_v55, %v5863_v9  ;;  %v2980_v55 = vrot.slane %v6029_v31, 4 }
 0x2e0   : > { %8361 = vst [vmem:[#allocation30_spill] sm:$0xff] %v6045_v49  ;;  %2387 = vrot.lane.b32.xlu0 %v2316_v3, %s4723_s26  ;;  %v2791_v49 = vsel %vm2774_vm5, %v8363_v19, %v2790_v16  ;;  %v2499_v3 = vrot.slane %v6029_v31, 2 }
 0x2e2   : > { %v6054_v61 = vpop.permute.xlu0 %2065  ;;  %3046 = vrot.lane.b32.xlu2 %v6052_v60, %s4728_s16  ;;  %v2500_v16 = vsel %vm2474_vm4, %v2497_v37, %v2499_v3 }
 0x2e4   : > { %v6062_v56 = vpop.permute.xlu2 %3034 }
 0x2e5   : > { %8364 = vst [vmem:[#allocation32_spill] sm:$0xff] %v6062_v56  ;;  %2862 = vrot.lane.b32.xlu1 %v2791_v49, %s4726_s14  ;;  %v8253_v56 = vrot.slane %v6029_v31, 3 }
 0x2e7   : > { %v6065_v23 = vpop.permute.xlu1 %2371 }
 0x2e8   : > { %8365 = vst [vmem:[#allocation33_spill] sm:$0xff] %v6065_v23  ;;  %2569 = vrot.lane.b32.xlu0 %v2498_v51, %s4724_s27 }
 0x2ea   : > { %v6071_v8 = vpop.permute.xlu0 %2369  ;;  %2385 = vrot.lane.b32.xlu2 %v2314_v2, %s4723_s26  ;;  %v2206_v2 = vrot.slane %v2121_v21, 4 }
 0x2eb   : > { %8366 = vst [vmem:[#allocation34_spill] sm:$0xff] %v6071_v8 }
 0x2ec   : > { %v2070_v19 = vpop.permute.xlu2 %2069 }
 0x2ed   : > { %2571 = vrot.lane.b32.xlu1 %v2500_v16, %s4724_s27 }
 0x2ef   : > { %v6076_v49 = vpop.permute.xlu1 %2553 }
 0x2f0   : > { %8367 = vst [vmem:[#allocation35_spill] sm:$0xff] %v6076_v49  ;;  %2683 = vrot.lane.b32.xlu0 %v2500_v16, %s4727_s15  ;;  %v2204_v49 = vrot.slane %v2120_v52, 4  ;;  %v2797_v16 = vsel %vm2774_vm5, %v2794_v33, %v8253_v56  ;;  %v6109_v52 = vsel %vm2180_vm3, %v2978_v12, %v2980_v55 }
 0x2f2   : > { %v6087_v37 = vpop.permute.xlu0 %2665  ;;  %2681 = vrot.lane.b32.xlu2 %v2498_v51, %s4727_s15  ;;  %v6102_v51 = vsel %vm2180_vm3, %v2202_v58, %v2204_v49  ;;  %v6105_v21 = vsel %vm2180_vm3, %v2204_v49, %v2206_v2  ;;  %v8372_v58 = vrot.slane %v5976_v43, 4 }
 0x2f3   : > { %8368 = vst [vmem:[#allocation36_spill] sm:$0xff] %v6087_v37  ;;  %v2501_v56 = vrot.slane %v6102_v51, 2  ;;  %v8256_v15 = vrot.slane %v6105_v21, 2  ;;  %v2319_v37 = vrot.slane %v6105_v21, 1  ;;  %v8260_v23 = vrot.slane %v6105_v21, 3 }
 0x2f4   : > { %v6093_v8 = vpop.permute.xlu2 %2373  ;;  %v6120_v33 = vsel %vm2180_vm3, %v8372_v58, %v2978_v12 }
 0x2f5   : > { %8369 = vst [vmem:[#allocation37_spill] sm:$0xff] %v6093_v8  ;;  %2868 = vrot.lane.b32.xlu1 %v2797_v16, %s4726_s14  ;;  %v8377_v8 = vrot.slane %v6029_v31, 1 }
 0x2f6   : > { %8373 = vst [vmem:[#allocation40_spill] sm:$0xff] %v6120_v33 }
 0x2f7   : > { %v6097_v9 = vpop.permute.xlu1 %2667 }
 0x2f8   : > { %8370 = vst [vmem:[#allocation38_spill] sm:$0xff] %v6097_v9  ;;  %2866 = vrot.lane.b32.xlu0 %v2795_v50, %s4726_s14  ;;  %v2317_v50 = vrot.slane %v6102_v51, 1  ;;  %v2504_v9 = vsel %vm2474_vm4, %v2501_v56, %v8256_v15 }
 0x2fa   : > { %v6111_v16 = vpop.permute.xlu0 %3036  ;;  %3052 = vrot.lane.b32.xlu2 %v6109_v52, %s4728_s16  ;;  %v2320_v12 = vsel %vm356_vm0, %v2317_v50, %v2319_v37 }
 0x2fb   : > { %8371 = vst [vmem:[#allocation39_spill] sm:$0xff] %v6111_v16 }
 0x2fc   : > { %v6122_v49 = vpop.permute.xlu2 %2669 }
 0x2fd   : > { %8374 = vst [vmem:[#allocation41_spill] sm:$0xff] %v6122_v49  ;;  %3050 = vrot.lane.b32.xlu1 %v6120_v33, %s4728_s16  ;;  %v2798_v49 = vrot.slane %v6102_v51, 3 }
 0x2ff   : > { %v6128_v16 = vpop.permute.xlu1 %2850  ;;  %v2801_v60 = vsel %vm2774_vm5, %v2798_v49, %v8260_v23 }
 0x300   : > { %8375 = vst [vmem:[#allocation42_spill] sm:$0xff] %v6128_v16  ;;  %2575 = vrot.lane.b32.xlu0 %v2504_v9, %s4724_s27  ;;  %v2318_v16 = vsel %vm356_vm0, %v8377_v8, %v2317_v50  ;;  %v2143_v8 = vsel %vm2107_vm2, %v5642_v48, %v2070_v19  ;;  %v2982_v50 = vrot.slane %v6102_v51, 4 }
 0x302   : > { %v6135_v58 = vpop.permute.xlu0 %2375  ;;  %2391 = vrot.lane.b32.xlu2 %v2320_v12, %s4723_s26  ;;  %v2122_v12 = vsel %vm2107_vm2, %v5515_v53, %v5807_v63  ;;  %v2123_v53 = vsel %vm2107_vm2, %v5520_v14, %v5869_v20  ;;  %v2250_v63 = vrot.slane %v2143_v8, 4  ;;  %v6174_v48 = vsel %vm2180_vm3, %v2980_v55, %v2982_v50 }
 0x303   : > { %8376 = vst [vmem:[#allocation43_spill] sm:$0xff] %v6135_v58  ;;  %v2502_v58 = vsel %vm2474_vm4, %v2499_v3, %v2501_v56  ;;  %v2210_v14 = vrot.slane %v2123_v53, 4 }
 0x304   : > { %v6143_v22 = vpop.permute.xlu2 %3040  ;;  %v6180_v19 = vsel %vm2180_vm3, %v2250_v63, 0.0 }
 0x305   : > { %8378 = vst [vmem:[#allocation44_spill] sm:$0xff] %v6143_v22  ;;  %2389 = vrot.lane.b32.xlu1 %v2318_v16, %s4723_s26  ;;  %v6195_v55 = vrot.slane %v6180_v19, 4 }
 0x306   : > { %8382 = vst [vmem:[#allocation48_spill] sm:$0xff] %v6180_v19 }
 0x307   : > { %v2068_v15 = vpop.permute.xlu1 %2067  ;;  %8384 = vst [vmem:[#allocation50_spill] sm:$0xff] %v6195_v55 }
 0x308   : > { %2872 = vrot.lane.b32.xlu0 %v2801_v60, %s4726_s14  ;;  %v6161_v16 = vsel %vm2107_vm2, %v5639_v34, %v2068_v15  ;;  %v2208_v60 = vrot.slane %v2122_v12, 4  ;;  %v2984_v15 = vrot.slane %v6105_v21, 4 }
 0x309   : > { %v8261_v56 = vrot.slane %v6161_v16, 4 }
 0x30a   : > { %v6154_v43 = vpop.permute.xlu0 %2557  ;;  %2573 = vrot.lane.b32.xlu2 %v2502_v58, %s4724_s27  ;;  %v6177_v34 = vsel %vm2180_vm3, %v2206_v2, %v2208_v60  ;;  %v6198_v12 = vsel %vm2180_vm3, %v2982_v50, %v2984_v15  ;;  %v6203_v53 = vsel %vm2180_vm3, %v2208_v60, %v2210_v14  ;;  %v8389_v60 = vrot.slane %v6029_v31, 3 }
 0x30b   : > { %8379 = vst [vmem:[#allocation45_spill] sm:$0xff] %v6154_v43  ;;  %v6188_v20 = vsel %vm2180_vm3, %v8261_v56, %v2250_v63  ;;  %v2321_v2 = vrot.slane %v6177_v34, 1  ;;  %v2323_v22 = vrot.slane %v6203_v53, 1 }
 0x30c   : > { %v6164_v23 = vpop.permute.xlu2 %2379  ;;  %8386 = vst [vmem:[#allocation52_spill] sm:$0xff] %v6203_v53  ;;  %v8262_v63 = vrot.slane %v6188_v20, 4 }
 0x30d   : > { %8380 = vst [vmem:[#allocation46_spill] sm:$0xff] %v6164_v23  ;;  %2685 = vrot.lane.b32.xlu1 %v2502_v58, %s4727_s15 }
 0x30e   : > { %v6215_v50 = vsel %vm2180_vm3, %v8262_v63, %v6195_v55  ;;  %v2507_v63 = vrot.slane %v6203_v53, 2 }
 0x30f   : > { %v6171_v3 = vpop.permute.xlu1 %2559  ;;  %8388 = vst [vmem:[#allocation54_spill] sm:$0xff] %v6215_v50 }
 0x310   : > { %8381 = vst [vmem:[#allocation47_spill] sm:$0xff] %v6171_v3  ;;  %3054 = vrot.lane.b32.xlu0 %v6174_v48, %s4728_s16 }
 0x312   : > { %v6190_v58 = vpop.permute.xlu0 %2671  ;;  %2687 = vrot.lane.b32.xlu2 %v2504_v9, %s4727_s15  ;;  %v2322_v9 = vsel %vm356_vm0, %v2319_v37, %v2321_v2  ;;  %v2505_v37 = vrot.slane %v6177_v34, 2 }
 0x313   : > { %8383 = vst [vmem:[#allocation49_spill] sm:$0xff] %v6190_v58  ;;  %v2799_v58 = vsel %vm2774_vm5, %v8389_v60, %v2798_v49 }
 0x314   : > { %v6200_v8 = vpop.permute.xlu2 %2561 }
 0x315   : > { %8385 = vst [vmem:[#allocation51_spill] sm:$0xff] %v6200_v8  ;;  %3056 = vrot.lane.b32.xlu1 %v6198_v12, %s4728_s16 }
 0x317   : > { %v6208_v56 = vpop.permute.xlu1 %2856 }
 0x318   : > { %8387 = vst [vmem:[#allocation53_spill] sm:$0xff] %v6208_v56  ;;  %2393 = vrot.lane.b32.xlu0 %v2322_v9, %s4723_s26  ;;  %v2324_v56 = vsel %vm356_vm0, %v2321_v2, %v2323_v22  ;;  %v8393_v9 = vrot.slane %v6105_v21, 2  ;;  %v2508_v2 = vsel %vm2474_vm4, %v2505_v37, %v2507_v63 }
 0x31a   : > { %v6222_v43 = vpop.permute.xlu0 %2854  ;;  %2870 = vrot.lane.b32.xlu2 %v2799_v58, %s4726_s14  ;;  %v2506_v49 = vsel %vm2474_vm4, %v8393_v9, %v2505_v37  ;;  %v6240_v58 = vsel %vm2107_vm2, %v5533_v36, %v5830_v17  ;;  %v2986_v36 = vrot.slane %v6177_v34, 4  ;;  %v2804_v17 = vrot.slane %v6203_v53, 3 }
 0x31b   : > { %8390 = vst [vmem:[#allocation55_spill] sm:$0xff] %v6222_v43  ;;  %v8264_v9 = vrot.slane %v6240_v58, 4 }
 0x31c   : > { %v6227_v3 = vpop.permute.xlu2 %2675 }
 0x31d   : > { %8391 = vst [vmem:[#allocation56_spill] sm:$0xff] %v6227_v3  ;;  %2395 = vrot.lane.b32.xlu1 %v2324_v56, %s4723_s26  ;;  %v2124_v56 = vsel %vm2107_vm2, %v5527_v46, %v5877_v32  ;;  %v2802_v46 = vrot.slane %v6177_v34, 3 }
 0x31e   : > { %v2212_v37 = vrot.slane %v2124_v56, 4 }
 0x31f   : > { %v6231_v8 = vpop.permute.xlu1 %3038 }
 0x320   : > { %8392 = vst [vmem:[#allocation57_spill] sm:$0xff] %v6231_v8  ;;  %2689 = vrot.lane.b32.xlu0 %v2506_v49, %s4727_s15  ;;  %v8263_v8 = vrot.slane %v6203_v53, 4  ;;  %v6267_v32 = vsel %vm2180_vm3, %v2212_v37, %v8264_v9  ;;  %v6273_v56 = vsel %vm2180_vm3, %v2210_v14, %v2212_v37  ;;  %v6290_v14 = vsel %vm2180_vm3, %v2984_v15, %v2986_v36 }
 0x321   : > { %8397 = vst [vmem:[#allocation61_spill] sm:$0xff] %v6267_v32  ;;  %v2325_v9 = vrot.slane %v6273_v56, 1  ;;  %v8268_v15 = vrot.slane %v6188_v20, 5 }
 0x322   : > { %v6243_v60 = vpop.permute.xlu0 %2563  ;;  %2579 = vrot.lane.b32.xlu2 %v2508_v2, %s4724_s27  ;;  %8398 = vst [vmem:[#allocation62_spill] sm:$0xff] %v6273_v56 }
 0x323   : > { %8394 = vst [vmem:[#allocation58_spill] sm:$0xff] %v6243_v60  ;;  %v6261_v60 = vsel %vm2180_vm3, %v2986_v36, %v8263_v8  ;;  %v8266_v8 = vrot.slane %v6267_v32, 1 }
 0x324   : > { %v6251_v43 = vpop.permute.xlu2 %2858 }
 0x325   : > { %8395 = vst [vmem:[#allocation59_spill] sm:$0xff] %v6251_v43  ;;  %2577 = vrot.lane.b32.xlu1 %v2506_v49, %s4724_s27  ;;  %v2805_v49 = vsel %vm2774_vm5, %v2802_v46, %v2804_v17  ;;  %v2328_v50 = vsel %vm356_vm0, %v2325_v9, %v8266_v8 }
 0x327   : > { %v6256_v3 = vpop.permute.xlu1 %2377 }
 0x328   : > { %8396 = vst [vmem:[#allocation60_spill] sm:$0xff] %v6256_v3  ;;  %3060 = vrot.lane.b32.xlu0 %v6261_v60, %s4728_s16 }
 0x32a   : > { %v6275_v43 = vpop.permute.xlu0 %2860  ;;  %2876 = vrot.lane.b32.xlu2 %v2805_v49, %s4726_s14  ;;  %v8267_v49 = vrot.slane %v6180_v19, 5 }
 0x32b   : > { %8399 = vst [vmem:[#allocation63_spill] sm:$0xff] %v6275_v43 }
 0x32c   : > { %v6279_v3 = vpop.permute.xlu2 %2567  ;;  %v6313_v8 = vsel %vm3257_vm6, %v8268_v15, %v8267_v49  ;;  %v8270_v49 = vrot.slane %v6188_v20, 6 }
 0x32d   : > { %8400 = vst [vmem:[#allocation64_spill] sm:$0xff] %v6279_v3  ;;  %2691 = vrot.lane.b32.xlu1 %v2508_v2, %s4727_s15  ;;  %v2509_v2 = vrot.slane %v6273_v56, 2 }
 0x32e   : > { %8406 = vst [vmem:[#allocation69_spill] sm:$0xff] %v6313_v8  ;;  %v2806_v8 = vrot.slane %v6273_v56, 3 }
 0x32f   : > { %v6283_v23 = vpop.permute.xlu1 %2673  ;;  %v2510_v36 = vsel %vm2474_vm4, %v2507_v63, %v2509_v2 }
 0x330   : > { %8401 = vst [vmem:[#allocation65_spill] sm:$0xff] %v6283_v23  ;;  %2399 = vrot.lane.b32.xlu0 %v2328_v50, %s4723_s26  ;;  %v8403_v23 = vrot.slane %v6105_v21, 3 }
 0x332   : > { %v6292_v37 = vpop.permute.xlu0 %3042  ;;  %3058 = vrot.lane.b32.xlu2 %v6290_v14, %s4728_s16  ;;  %v2803_v43 = vsel %vm2774_vm5, %v8403_v23, %v2802_v46  ;;  %v2511_v23 = vrot.slane %v6267_v32, 2 }
 0x333   : > { %8402 = vst [vmem:[#allocation66_spill] sm:$0xff] %v6292_v37  ;;  %v8269_v37 = vrot.slane %v6180_v19, 6 }
 0x334   : > { %v6301_v3 = vpop.permute.xlu2 %2864  ;;  %v2512_v63 = vsel %vm2474_vm4, %v2509_v2, %v2511_v23  ;;  %v6341_v2 = vsel %vm2107_vm2, %v5544_v35, %v5897_v25  ;;  %v2992_v35 = vrot.slane %v6267_v32, 4  ;;  %v2990_v25 = vrot.slane %v6273_v56, 4 }
 0x335   : > { %8404 = vst [vmem:[#allocation67_spill] sm:$0xff] %v6301_v3  ;;  %2874 = vrot.lane.b32.xlu1 %v2803_v43, %s4726_s14  ;;  %v2326_v43 = vsel %vm356_vm0, %v2323_v22, %v2325_v9  ;;  %v6334_v22 = vsel %vm3441_vm7, %v8270_v49, %v8269_v37  ;;  %v8271_v9 = vrot.slane %v6267_v32, 3  ;;  %v2218_v37 = vrot.slane %v6341_v2, 4 }
 0x336   : > { %8410 = vst [vmem:[#allocation73_spill] sm:$0xff] %v6334_v22 }
 0x337   : > { %v6305_v50 = vpop.permute.xlu1 %3044 }
 0x338   : > { %8405 = vst [vmem:[#allocation68_spill] sm:$0xff] %v6305_v50  ;;  %2581 = vrot.lane.b32.xlu0 %v2510_v36, %s4724_s27 }
 0x33a   : > { %v6318_v46 = vpop.permute.xlu0 %2381  ;;  %2397 = vrot.lane.b32.xlu2 %v2326_v43, %s4723_s26  ;;  %v2126_v43 = vsel %vm2107_vm2, %v5538_v29, %v5884_v18  ;;  %v2807_v18 = vsel %vm2774_vm5, %v2804_v17, %v2806_v8  ;;  %v8418_v17 = vrot.slane %v6203_v53, 4 }
 0x33b   : > { %8407 = vst [vmem:[#allocation70_spill] sm:$0xff] %v6318_v46  ;;  %v2216_v49 = vrot.slane %v2126_v43, 4 }
 0x33c   : > { %v6323_v50 = vpop.permute.xlu2 %3046 }
 0x33d   : > { %8408 = vst [vmem:[#allocation71_spill] sm:$0xff] %v6323_v50  ;;  %2583 = vrot.lane.b32.xlu1 %v2512_v63, %s4724_s27  ;;  %v6368_v43 = vsel %vm2180_vm3, %v2216_v49, %v2218_v37 }
 0x33e   : > { %8416 = vst [vmem:[#allocation78_spill] sm:$0xff] %v6368_v43 }
 0x33f   : > { %v6327_v15 = vpop.permute.xlu1 %2383 }
 0x340   : > { %8409 = vst [vmem:[#allocation72_spill] sm:$0xff] %v6327_v15  ;;  %2695 = vrot.lane.b32.xlu0 %v2512_v63, %s4727_s15  ;;  %v2809_v63 = vsel %vm2774_vm5, %v2806_v8, %v8271_v9 }
 0x342   : > { %v6347_v50 = vpop.permute.xlu0 %2677  ;;  %2693 = vrot.lane.b32.xlu2 %v2510_v36, %s4727_s15  ;;  %v8414_v36 = vrot.slane %v6240_v58, 4  ;;  %v2515_v58 = vrot.slane %v6368_v43, 2 }
 0x343   : > { %8411 = vst [vmem:[#allocation74_spill] sm:$0xff] %v6347_v50  ;;  %v2331_v50 = vrot.slane %v6368_v43, 1 }
 0x344   : > { %v6354_v22 = vpop.permute.xlu2 %2385  ;;  %v6365_v2 = vsel %vm2180_vm3, %v8414_v36, %v2216_v49  ;;  %v6383_v36 = vsel %vm2180_vm3, %v8418_v17, %v2990_v25  ;;  %v8274_v17 = vrot.slane %v6368_v43, 3 }
 0x345   : > { %8412 = vst [vmem:[#allocation75_spill] sm:$0xff] %v6354_v22  ;;  %2880 = vrot.lane.b32.xlu1 %v2809_v63, %s4726_s14  ;;  %v6372_v63 = vsel %vm2180_vm3, %v2990_v25, %v2992_v35  ;;  %v2513_v8 = vrot.slane %v6365_v2, 2  ;;  %v2810_v25 = vrot.slane %v6365_v2, 3 }
 0x346   : > { %8415 = vst [vmem:[#allocation77_spill] sm:$0xff] %v6365_v2 }
 0x347   : > { %v6358_v29 = vpop.permute.xlu1 %2565  ;;  %v2516_v3 = vsel %vm2474_vm4, %v2513_v8, %v2515_v58  ;;  %v2813_v55 = vsel %vm2774_vm5, %v2810_v25, %v8274_v17 }
 0x348   : > { %8413 = vst [vmem:[#allocation76_spill] sm:$0xff] %v6358_v29  ;;  %2878 = vrot.lane.b32.xlu0 %v2807_v18, %s4726_s14  ;;  %v2329_v18 = vrot.slane %v6365_v2, 1 }
 0x34a   : > { %v6374_v9 = vpop.permute.xlu0 %3048  ;;  %3064 = vrot.lane.b32.xlu2 %v6372_v63, %s4728_s16  ;;  %v2332_v29 = vsel %vm356_vm0, %v2329_v18, %v2331_v50 }
 0x34b   : > { %8417 = vst [vmem:[#allocation79_spill] sm:$0xff] %v6374_v9 }
 0x34c   : > { %v6385_v49 = vpop.permute.xlu2 %2681 }
 0x34d   : > { %8419 = vst [vmem:[#allocation80_spill] sm:$0xff] %v6385_v49  ;;  %3062 = vrot.lane.b32.xlu1 %v6383_v36, %s4728_s16  ;;  %v8422_v49 = vrot.slane %v6267_v32, 1 }
 0x34f   : > { %v6391_v9 = vpop.permute.xlu1 %2679  ;;  %v2330_v15 = vsel %vm356_vm0, %v8422_v49, %v2329_v18  ;;  %v2994_v49 = vrot.slane %v6365_v2, 4 }
 0x350   : > { %8420 = vst [vmem:[#allocation81_spill] sm:$0xff] %v6391_v9  ;;  %2587 = vrot.lane.b32.xlu0 %v2516_v3, %s4724_s27 }
 0x352   : > { %v6396_v46 = vpop.permute.xlu0 %2387  ;;  %2403 = vrot.lane.b32.xlu2 %v2332_v29, %s4723_s26  ;;  %v2514_v29 = vsel %vm2474_vm4, %v2511_v23, %v2513_v8  ;;  %v2128_v23 = vsel %vm2107_vm2, %v5550_v54, %v5857_v62  ;;  %v8275_v8 = vrot.slane %v6368_v43, 4 }
 0x353   : > { %8421 = vst [vmem:[#allocation82_spill] sm:$0xff] %v6396_v46 }
 0x354   : > { %v6404_v22 = vpop.permute.xlu2 %3052 }
 0x355   : > { %8423 = vst [vmem:[#allocation83_spill] sm:$0xff] %v6404_v22  ;;  %2401 = vrot.lane.b32.xlu1 %v2330_v15, %s4723_s26  ;;  %v2129_v15 = vsel %vm2107_vm2, %v5557_v47, %v5916_v42  ;;  %v2997_v47 = vsel %vm2180_vm3, %v2994_v49, %v8275_v8 }
 0x356   : > { %v2222_v17 = vrot.slane %v2129_v15, 4 }
 0x357   : > { %v6407_v9 = vpop.permute.xlu1 %2862 }
 0x358   : > { %8424 = vst [vmem:[#allocation84_spill] sm:$0xff] %v6407_v9  ;;  %2884 = vrot.lane.b32.xlu0 %v2813_v55, %s4726_s14  ;;  %v2995_v55 = vsel %vm2180_vm3, %v2992_v35, %v2994_v49 }
 0x35a   : > { %v6414_v46 = vpop.permute.xlu0 %2569  ;;  %2585 = vrot.lane.b32.xlu2 %v2514_v29, %s4724_s27 }
 0x35b   : > { %8425 = vst [vmem:[#allocation85_spill] sm:$0xff] %v6414_v46 }
 0x35c   : > { %v6418_v18 = vpop.permute.xlu2 %2391 }
 0x35d   : > { %2697 = vrot.lane.b32.xlu1 %v2514_v29, %s4727_s15  ;;  %v2220_v29 = vrot.slane %v2128_v23, 4 }
 0x35f   : > { %v6424_v9 = vpop.permute.xlu1 %2571  ;;  %v6441_v35 = vsel %vm2180_vm3, %v2220_v29, %v2222_v17  ;;  %v6445_v54 = vsel %vm2180_vm3, %v2218_v37, %v2220_v29 }
 0x360   : > { %8426 = vst [vmem:[#allocation86_spill] sm:$0xff] %v6424_v9  ;;  %3066 = vrot.lane.b32.xlu0 %v2995_v55, %s4728_s16  ;;  %v8276_v15 = vrot.slane %v6441_v35, 1  ;;  %v2333_v23 = vrot.slane %v6445_v54, 1 }
 0x361   : > { %8429 = vst [vmem:[#allocation89_spill] sm:$0xff] %v6441_v35 }
 0x362   : > { %v6432_v22 = vpop.permute.xlu0 %2683  ;;  %2699 = vrot.lane.b32.xlu2 %v2516_v3, %s4727_s15  ;;  %8430 = vst [vmem:[#allocation90_spill] sm:$0xff] %v6445_v54  ;;  %v8432_v3 = vrot.slane %v6267_v32, 3  ;;  %v2336_v37 = vsel %vm356_vm0, %v2333_v23, %v8276_v15 }
 0x363   : > { %8427 = vst [vmem:[#allocation87_spill] sm:$0xff] %v6432_v22  ;;  %v2814_v22 = vrot.slane %v6445_v54, 3 }
 0x364   : > { %v6438_v42 = vpop.permute.xlu2 %2573  ;;  %v2811_v49 = vsel %vm2774_vm5, %v8432_v3, %v2810_v25  ;;  %v2517_v25 = vrot.slane %v6445_v54, 2 }
 0x365   : > { %8428 = vst [vmem:[#allocation88_spill] sm:$0xff] %v6438_v42  ;;  %3068 = vrot.lane.b32.xlu1 %v2997_v47, %s4728_s16 }
 0x367   : > { %v6447_v62 = vpop.permute.xlu1 %2868 }
 0x368   : > { %8431 = vst [vmem:[#allocation91_spill] sm:$0xff] %v6447_v62  ;;  %3178 = vrot.lane.b32.xlu0 %v2997_v47, %s4729_s17  ;;  %v2334_v47 = vsel %vm356_vm0, %v2331_v50, %v2333_v23  ;;  %v2131_v50 = vsel %vm2107_vm2, %v5569_v40, %v5871_v13  ;;  %v2816_v40 = vrot.slane %v6441_v35, 3 }
 0x36a   : > { %v6455_v8 = vpop.permute.xlu0 %2866  ;;  %2882 = vrot.lane.b32.xlu2 %v2811_v49, %s4726_s14  ;;  %v2518_v49 = vsel %vm2474_vm4, %v2515_v58, %v2517_v25  ;;  %v2130_v58 = vsel %vm2107_vm2, %v5562_v24, %v5927_v39 }
 0x36b   : > { %8433 = vst [vmem:[#allocation92_spill] sm:$0xff] %v6455_v8  ;;  %v2224_v13 = vrot.slane %v2130_v58, 4 }
 0x36c   : > { %v6461_v29 = vpop.permute.xlu2 %2687 }
 0x36d   : > { %8434 = vst [vmem:[#allocation93_spill] sm:$0xff] %v6461_v29  ;;  %2407 = vrot.lane.b32.xlu1 %v2336_v37, %s4723_s26  ;;  %v2519_v37 = vrot.slane %v6441_v35, 2 }
 0x36f   : > { %v6464_v62 = vpop.permute.xlu1 %3050  ;;  %v2520_v23 = vsel %vm2474_vm4, %v2517_v25, %v2519_v37 }
 0x370   : > { %8435 = vst [vmem:[#allocation94_spill] sm:$0xff] %v6464_v62  ;;  %2405 = vrot.lane.b32.xlu0 %v2334_v47, %s4723_s26  ;;  %v2226_v62 = vrot.slane %v2131_v50, 4  ;;  %v2817_v50 = vsel %vm2774_vm5, %v2814_v22, %v2816_v40 }
 0x372   : > { %v6469_v3 = vpop.permute.xlu0 %2575  ;;  %3176 = vrot.lane.b32.xlu2 %v2995_v55, %s4729_s17  ;;  %v8279_v55 = vrot.slane %v6441_v35, 4  ;;  %v6505_v39 = vsel %vm2180_vm3, %v2224_v13, %v2226_v62 }
 0x374   : > { %v6473_v8 = vpop.permute.xlu2 %2870 }
 0x375   : > { %8436 = vst [vmem:[#allocation95_spill] sm:$0xff] %v6473_v8  ;;  %2589 = vrot.lane.b32.xlu1 %v2518_v49, %s4724_s27 }
 0x377   : > { %v6477_v15 = vpop.permute.xlu1 %2389 }
 0x378   : > { %8437 = vst [vmem:[#allocation96_spill] sm:$0xff] %v6477_v15  ;;  %2701 = vrot.lane.b32.xlu0 %v2518_v49, %s4727_s15  ;;  %v2998_v49 = vrot.slane %v6445_v54, 4  ;;  %v2339_v54 = vrot.slane %v6505_v39, 1 }
 0x37a   : > { %v6484_v47 = vpop.permute.xlu0 %2872  ;;  %2591 = vrot.lane.b32.xlu2 %v2520_v23, %s4724_s27  ;;  %v6502_v24 = vsel %vm2180_vm3, %v2998_v49, %v8279_v55  ;;  %v8443_v55 = vrot.slane %v6368_v43, 3 }
 0x37b   : > { %8438 = vst [vmem:[#allocation97_spill] sm:$0xff] %v6484_v47 }
 0x37c   : > { %v6491_v8 = vpop.permute.xlu2 %2579  ;;  %8440 = vst [vmem:[#allocation99_spill] sm:$0xff] %v6502_v24 }
 0x37d   : > { %2703 = vrot.lane.b32.xlu1 %v2520_v23, %s4727_s15  ;;  %v6511_v23 = vsel %vm2180_vm3, %v2222_v17, %v2224_v13  ;;  %v2523_v13 = vrot.slane %v6505_v39, 2 }
 0x37e   : > { %8441 = vst [vmem:[#allocation100_spill] sm:$0xff] %v6511_v23 }
 0x37f   : > { %v6496_v25 = vpop.permute.xlu1 %2685 }
 0x380   : > { %8439 = vst [vmem:[#allocation98_spill] sm:$0xff] %v6496_v25  ;;  %3072 = vrot.lane.b32.xlu0 %v6502_v24, %s4728_s16  ;;  %v2815_v25 = vsel %vm2774_vm5, %v8443_v55, %v2814_v22  ;;  %v2337_v24 = vrot.slane %v6511_v23, 1  ;;  %v2521_v22 = vrot.slane %v6511_v23, 2 }
 0x382   : > { %v6513_v58 = vpop.permute.xlu0 %3054  ;;  %2888 = vrot.lane.b32.xlu2 %v2817_v50, %s4726_s14  ;;  %v2340_v17 = vsel %vm356_vm0, %v2337_v24, %v2339_v54  ;;  %v8446_v50 = vrot.slane %v6368_v43, 4 }
 0x383   : > { %8442 = vst [vmem:[#allocation101_spill] sm:$0xff] %v6513_v58 }
 0x384   : > { %v6520_v46 = vpop.permute.xlu2 %2876  ;;  %v6532_v58 = vsel %vm2180_vm3, %v8446_v50, %v2998_v49  ;;  %v2522_v49 = vsel %vm2474_vm4, %v2519_v37, %v2521_v22  ;;  %v8283_v50 = vrot.slane %v6505_v39, 3 }
 0x385   : > { %8444 = vst [vmem:[#allocation102_spill] sm:$0xff] %v6520_v46  ;;  %2886 = vrot.lane.b32.xlu1 %v2815_v25, %s4726_s14  ;;  %v2524_v25 = vsel %vm2474_vm4, %v2521_v22, %v2523_v13 }
 0x386   : > { %8447 = vst [vmem:[#allocation104_spill] sm:$0xff] %v6532_v58 }
 0x387   : > { %v6524_v47 = vpop.permute.xlu1 %3056 }
 0x388   : > { %8445 = vst [vmem:[#allocation103_spill] sm:$0xff] %v6524_v47  ;;  %2411 = vrot.lane.b32.xlu0 %v2340_v17, %s4723_s26  ;;  %v2132_v17 = vsel %vm2107_vm2, %v5575_v28, %v5937_v5  ;;  %v2133_v5 = vsel %vm2107_vm2, %v5581_v44, %v5948_v0 }
 0x389   : > { %v2228_v9 = vrot.slane %v2132_v17, 4 }
 0x38a   : > { %v6535_v55 = vpop.permute.xlu0 %2393  ;;  %3070 = vrot.lane.b32.xlu2 %v6532_v58, %s4728_s16  ;;  %v8449_v58 = vrot.slane %v6441_v35, 1 }
 0x38b   : > { %v6567_v22 = vsel %vm2180_vm3, %v2226_v62, %v2228_v9 }
 0x38c   : > { %v6540_v47 = vpop.permute.xlu2 %3058  ;;  %v2338_v33 = vsel %vm356_vm0, %v8449_v58, %v2337_v24  ;;  %v2230_v24 = vrot.slane %v2133_v5, 4 }
 0x38d   : > { %8448 = vst [vmem:[#allocation105_spill] sm:$0xff] %v6540_v47  ;;  %2595 = vrot.lane.b32.xlu1 %v2524_v25, %s4724_s27  ;;  %v2818_v47 = vrot.slane %v6511_v23, 3 }
 0x38e   : > { %v6575_v44 = vsel %vm2180_vm3, %v2228_v9, %v2230_v24 }
 0x38f   : > { %v6546_v29 = vpop.permute.xlu1 %2395  ;;  %v2821_v28 = vsel %vm2774_vm5, %v2818_v47, %v8283_v50  ;;  %v2343_v5 = vrot.slane %v6575_v44, 1  ;;  %v2819_v9 = vsel %vm2774_vm5, %v2816_v40, %v2818_v47 }
 0x390   : > { %2593 = vrot.lane.b32.xlu0 %v2522_v49, %s4724_s27 }
 0x392   : > { %v6555_v42 = vpop.permute.xlu0 %2689  ;;  %2409 = vrot.lane.b32.xlu2 %v2338_v33, %s4723_s26  ;;  %v2341_v33 = vrot.slane %v6567_v22, 1 }
 0x393   : > { %8450 = vst [vmem:[#allocation106_spill] sm:$0xff] %v6555_v42 }
 0x394   : > { %v6564_v37 = vpop.permute.xlu2 %2397  ;;  %v2342_v17 = vsel %vm356_vm0, %v2339_v54, %v2341_v33  ;;  %v2525_v54 = vrot.slane %v6567_v22, 2 }
 0x395   : > { %8451 = vst [vmem:[#allocation107_spill] sm:$0xff] %v6564_v37  ;;  %2892 = vrot.lane.b32.xlu1 %v2821_v28, %s4726_s14  ;;  %v2135_v28 = vsel %vm2107_vm2, %v5592_v45, %v5964_v30  ;;  %v2527_v30 = vrot.slane %v6575_v44, 2 }
 0x396   : > { %v2234_v50 = vrot.slane %v2135_v28, 4  ;;  %v2526_v47 = vsel %vm2474_vm4, %v2523_v13, %v2525_v54 }
 0x397   : > { %v6570_v58 = vpop.permute.xlu1 %2577  ;;  %v2528_v28 = vsel %vm2474_vm4, %v2525_v54, %v2527_v30 }
 0x398   : > { %2707 = vrot.lane.b32.xlu0 %v2524_v25, %s4727_s15 }
 0x39a   : > { %v6577_v0 = vpop.permute.xlu0 %3060  ;;  %2705 = vrot.lane.b32.xlu2 %v2522_v49, %s4727_s15  ;;  %v2134_v49 = vsel %vm2107_vm2, %v5587_v11, %v5887_v27 }
 0x39b   : > { %8452 = vst [vmem:[#allocation108_spill] sm:$0xff] %v6577_v0  ;;  %v2232_v45 = vrot.slane %v2134_v49, 4 }
 0x39c   : > { %v6581_v62 = vpop.permute.xlu2 %2693 }
 0x39d   : > { %2413 = vrot.lane.b32.xlu1 %v2342_v17, %s4723_s26  ;;  %v2344_v17 = vsel %vm356_vm0, %v2341_v33, %v2343_v5  ;;  %v6605_v11 = vsel %vm2180_vm3, %v2232_v45, %v2234_v50  ;;  %v6609_v27 = vsel %vm2180_vm3, %v2230_v24, %v2232_v45 }
 0x39e   : > { %v2345_v13 = vrot.slane %v6609_v27, 1 }
 0x39f   : > { %v6588_v25 = vpop.permute.xlu1 %2691 }
 0x3a0   : > { %2890 = vrot.lane.b32.xlu0 %v2819_v9, %s4726_s14  ;;  %v8288_v9 = vrot.slane %v6605_v11, 1 }
 0x3a2   : > { %v6597_v37 = vpop.permute.xlu0 %2399  ;;  %2415 = vrot.lane.b32.xlu2 %v2344_v17, %s4723_s26  ;;  %v2822_v17 = vrot.slane %v6567_v22, 3  ;;  %v2348_v24 = vsel %vm356_vm0, %v2345_v13, %v8288_v9 }
 0x3a3   : > { %8453 = vst [vmem:[#allocation109_spill] sm:$0xff] %v6597_v37  ;;  %v2824_v37 = vrot.slane %v6575_v44, 3 }
 0x3a4   : > { %v6602_v40 = vpop.permute.xlu2 %3064 }
 0x3a5   : > { %2709 = vrot.lane.b32.xlu1 %v2526_v47, %s4727_s15  ;;  %v2825_v35 = vsel %vm2774_vm5, %v2822_v17, %v2824_v37 }
 0x3a7   : > { %v6611_v33 = vpop.permute.xlu1 %2874 }
 0x3a8   : > { %8454 = vst [vmem:[#allocation110_spill] sm:$0xff] %v6611_v33  ;;  %2599 = vrot.lane.b32.xlu0 %v2528_v28, %s4724_s27 }
 0x3aa   : > { %v6617_v49 = vpop.permute.xlu0 %2581  ;;  %2597 = vrot.lane.b32.xlu2 %v2526_v47, %s4724_s27 }
 0x3ab   : > { %8455 = vst [vmem:[#allocation111_spill] sm:$0xff] %v6617_v49  ;;  %v2529_v49 = vrot.slane %v6609_v27, 2 }
 0x3ac   : > { %v6625_v45 = vpop.permute.xlu2 %2403 }
 0x3ad   : > { %8456 = vst [vmem:[#allocation112_spill] sm:$0xff] %v6625_v45  ;;  %2419 = vrot.lane.b32.xlu1 %v2348_v24, %s4723_s26  ;;  %v2530_v23 = vsel %vm2474_vm4, %v2527_v30, %v2529_v49  ;;  %v2346_v24 = vsel %vm356_vm0, %v2343_v5, %v2345_v13  ;;  %v2136_v5 = vsel %vm2107_vm2, %v5599_v10, %v5980_v38 }
 0x3af   : > { %v6628_v54 = vpop.permute.xlu1 %2583 }
 0x3b0   : > { %8457 = vst [vmem:[#allocation113_spill] sm:$0xff] %v6628_v54  ;;  %2896 = vrot.lane.b32.xlu0 %v2825_v35, %s4726_s14  ;;  %v2531_v54 = vrot.slane %v6605_v11, 2  ;;  %v2137_v35 = vsel %vm2107_vm2, %v5604_v26, %v5918_v41  ;;  %v2236_v26 = vrot.slane %v2136_v5, 4 }
 0x3b1   : > { %v2238_v13 = vrot.slane %v2137_v35, 4 }
 0x3b2   : > { %v6633_v47 = vpop.permute.xlu0 %2695  ;;  %2711 = vrot.lane.b32.xlu2 %v2528_v28, %s4727_s15  ;;  %v8459_v28 = vrot.slane %v6505_v39, 3 }
 0x3b4   : > { %v6637_v33 = vpop.permute.xlu2 %2585  ;;  %v2823_v30 = vsel %vm2774_vm5, %v8459_v28, %v2822_v17  ;;  %v6664_v17 = vsel %vm2180_vm3, %v2236_v26, %v2238_v13  ;;  %v2826_v28 = vrot.slane %v6609_v27, 3 }
 0x3b5   : > { %8458 = vst [vmem:[#allocation114_spill] sm:$0xff] %v6637_v33  ;;  %2601 = vrot.lane.b32.xlu1 %v2530_v23, %s4724_s27  ;;  %v2532_v33 = vsel %vm2474_vm4, %v2529_v49, %v2531_v54  ;;  %v2351_v38 = vrot.slane %v6664_v17, 1 }
 0x3b6   : > { %v2827_v49 = vsel %vm2774_vm5, %v2824_v37, %v2826_v28 }
 0x3b7   : > { %v6640_v9 = vpop.permute.xlu1 %2880 }
 0x3b8   : > { %2417 = vrot.lane.b32.xlu0 %v2346_v24, %s4723_s26 }
 0x3ba   : > { %v6651_v45 = vpop.permute.xlu0 %2878  ;;  %2894 = vrot.lane.b32.xlu2 %v2823_v30, %s4726_s14  ;;  %v6669_v30 = vsel %vm2180_vm3, %v2234_v50, %v2236_v26  ;;  %v2535_v26 = vrot.slane %v6664_v17, 2 }
 0x3bb   : > { %v2349_v5 = vrot.slane %v6669_v30, 1  ;;  %v2533_v37 = vrot.slane %v6669_v30, 2  ;;  %v2830_v46 = vrot.slane %v6669_v30, 3 }
 0x3bc   : > { %v6658_v24 = vpop.permute.xlu2 %2699 }
 0x3bd   : > { %8460 = vst [vmem:[#allocation115_spill] sm:$0xff] %v6658_v24  ;;  %2715 = vrot.lane.b32.xlu1 %v2532_v33, %s4727_s15  ;;  %v2828_v24 = vrot.slane %v6605_v11, 3  ;;  %v2352_v50 = vsel %vm356_vm0, %v2349_v5, %v2351_v38 }
 0x3bf   : > { %v6661_v41 = vpop.permute.xlu1 %3062 }
 0x3c0   : > { %2713 = vrot.lane.b32.xlu0 %v2530_v23, %s4727_s15 }
 0x3c2   : > { %v6671_v10 = vpop.permute.xlu0 %2587  ;;  %2603 = vrot.lane.b32.xlu2 %v2532_v33, %s4724_s27  ;;  %v2829_v33 = vsel %vm2774_vm5, %v2826_v28, %v2828_v24  ;;  %v2534_v28 = vsel %vm2474_vm4, %v2531_v54, %v2533_v37 }
 0x3c3   : > { %8461 = vst [vmem:[#allocation116_spill] sm:$0xff] %v6671_v10 }
 0x3c4   : > { %v6676_v35 = vpop.permute.xlu2 %2882 }
 0x3c5   : > { %8462 = vst [vmem:[#allocation117_spill] sm:$0xff] %v6676_v35  ;;  %2898 = vrot.lane.b32.xlu1 %v2827_v49, %s4726_s14  ;;  %v2536_v49 = vsel %vm2474_vm4, %v2533_v37, %v2535_v26 }
 0x3c7   : > { %v6681_v23 = vpop.permute.xlu1 %2401 }
 0x3c8   : > { %8463 = vst [vmem:[#allocation118_spill] sm:$0xff] %v6681_v23  ;;  %2423 = vrot.lane.b32.xlu0 %v2352_v50, %s4723_s26  ;;  %v2138_v23 = vsel %vm2107_vm2, %v5611_v1, %v5988_v57  ;;  %v8289_v50 = vrot.slane %v6664_v17, 3  ;;  %v2139_v1 = vsel %vm2107_vm2, %v5616_v7, %v5997_v4 }
 0x3ca   : > { %v6688_v10 = vpop.permute.xlu0 %2884  ;;  %2900 = vrot.lane.b32.xlu2 %v2829_v33, %s4726_s14  ;;  %v8466_v33 = vrot.slane %v6605_v11, 1  ;;  %v2833_v57 = vsel %vm2774_vm5, %v2830_v46, %v8289_v50 }
 0x3cb   : > { %8464 = vst [vmem:[#allocation119_spill] sm:$0xff] %v6688_v10  ;;  %v2240_v10 = vrot.slane %v2138_v23, 4 }
 0x3cc   : > { %v6692_v35 = vpop.permute.xlu2 %3176  ;;  %v2350_v0 = vsel %vm356_vm0, %v8466_v33, %v2349_v5  ;;  %v2242_v5 = vrot.slane %v2139_v1, 4 }
 0x3cd   : > { %2607 = vrot.lane.b32.xlu1 %v2536_v49, %s4724_s27  ;;  %v6719_v23 = vsel %vm2180_vm3, %v2238_v13, %v2240_v10 }
 0x3ce   : > { %v6727_v7 = vsel %vm2180_vm3, %v2240_v10, %v2242_v5  ;;  %v2831_v10 = vsel %vm2774_vm5, %v2828_v24, %v2830_v46 }
 0x3cf   : > { %v6698_v42 = vpop.permute.xlu1 %2697  ;;  %8470 = vst [vmem:[#allocation124_spill] sm:$0xff] %v6727_v7  ;;  %v2355_v1 = vrot.slane %v6727_v7, 1 }
 0x3d0   : > { %8465 = vst [vmem:[#allocation120_spill] sm:$0xff] %v6698_v42  ;;  %2605 = vrot.lane.b32.xlu0 %v2534_v28, %s4724_s27 }
 0x3d2   : > { %v6707_v15 = vpop.permute.xlu0 %3066  ;;  %2421 = vrot.lane.b32.xlu2 %v2350_v0, %s4723_s26  ;;  %v2353_v0 = vrot.slane %v6719_v23, 1 }
 0x3d3   : > { %8467 = vst [vmem:[#allocation121_spill] sm:$0xff] %v6707_v15  ;;  %v8474_v15 = vld [vmem:[#allocation4_spill] sm:$0xff] }
 0x3d4   : > { %v6716_v54 = vpop.permute.xlu2 %2591  ;;  %v2354_v33 = vsel %vm356_vm0, %v2351_v38, %v2353_v0  ;;  %v2537_v38 = vrot.slane %v6719_v23, 2 }
 0x3d5   : > { %8468 = vst [vmem:[#allocation122_spill] sm:$0xff] %v6716_v54  ;;  %2904 = vrot.lane.b32.xlu1 %v2833_v57, %s4726_s14  ;;  %v8472_v57 = vld [vmem:[#allocation5_spill] sm:$0xff] }
 0x3d6   : > { %v2141_v50 = vsel %vm2107_vm2, %v8472_v57, %v6054_v61  ;;  %v2539_v57 = vrot.slane %v6727_v7, 2  ;;  %v2538_v46 = vsel %vm2474_vm4, %v2535_v26, %v2537_v38 }
 0x3d7   : > { %v6722_v37 = vpop.permute.xlu1 %3068  ;;  %v2246_v42 = vrot.slane %v2141_v50, 4 }
 0x3d8   : > { %8469 = vst [vmem:[#allocation123_spill] sm:$0xff] %v6722_v37  ;;  %2719 = vrot.lane.b32.xlu0 %v2536_v49, %s4727_s15 }
 0x3da   : > { %v6729_v4 = vpop.permute.xlu0 %3178  ;;  %2717 = vrot.lane.b32.xlu2 %v2534_v28, %s4727_s15  ;;  %v2140_v28 = vsel %vm2107_vm2, %v8474_v15, %v5993_v6  ;;  %vm4212_vm2 = vcmask 556032  }
 0x3db   : > { %v2244_v61 = vrot.slane %v2140_v28, 4 }
 0x3dc   : > { %v6733_v13 = vpop.permute.xlu2 %2888 }
 0x3dd   : > { %8471 = vst [vmem:[#allocation125_spill] sm:$0xff] %v6733_v13  ;;  %2425 = vrot.lane.b32.xlu1 %v2354_v33, %s4723_s26  ;;  %v2356_v33 = vsel %vm356_vm0, %v2353_v0, %v2355_v1  ;;  %v6757_v6 = vsel %vm2180_vm3, %v2244_v61, %v2246_v42  ;;  %v6761_v15 = vsel %vm2180_vm3, %v2242_v5, %v2244_v61 }
 0x3de   : > { %8477 = vst [vmem:[#allocation127_spill] sm:$0xff] %v6757_v6  ;;  %v2540_v0 = vsel %vm2474_vm4, %v2537_v38, %v2539_v57  ;;  %v2357_v26 = vrot.slane %v6761_v15, 1 }
 0x3df   : > { %v6740_v49 = vpop.permute.xlu1 %2407  ;;  %8478 = vst [vmem:[#allocation128_spill] sm:$0xff] %v6761_v15 }
 0x3e0   : > { %8473 = vst [vmem:[#allocation5_spill] sm:$0xff] %v6740_v49  ;;  %2902 = vrot.lane.b32.xlu0 %v2831_v10, %s4726_s14  ;;  %v8290_v10 = vrot.slane %v6757_v6, 1  ;;  %v3022_v49 = vrot.slane %v6761_v15, 4 }
 0x3e2   : > { %v6749_v37 = vpop.permute.xlu0 %2405  ;;  %2427 = vrot.lane.b32.xlu2 %v2356_v33, %s4723_s26  ;;  %v2834_v33 = vrot.slane %v6719_v23, 3  ;;  %v2360_v5 = vsel %vm356_vm0, %v2357_v26, %v8290_v10 }
 0x3e3   : > { %8475 = vst [vmem:[#allocation4_spill] sm:$0xff] %v6749_v37 }
 0x3e4   : > { %v6754_v24 = vpop.permute.xlu2 %3070 }
 0x3e5   : > { %8476 = vst [vmem:[#allocation126_spill] sm:$0xff] %v6754_v24  ;;  %2721 = vrot.lane.b32.xlu1 %v2538_v46, %s4727_s15  ;;  %v2836_v24 = vrot.slane %v6727_v7, 3 }
 0x3e7   : > { %v6763_v50 = vpop.permute.xlu1 %2589  ;;  %v2837_v13 = vsel %vm2774_vm5, %v2834_v33, %v2836_v24 }
 0x3e8   : > { %8479 = vst [vmem:[#allocation129_spill] sm:$0xff] %v6763_v50  ;;  %2611 = vrot.lane.b32.xlu0 %v2540_v0, %s4724_s27 }
 0x3ea   : > { %v6769_v28 = vpop.permute.xlu0 %2701  ;;  %2609 = vrot.lane.b32.xlu2 %v2538_v46, %s4724_s27 }
 0x3eb   : > { %8480 = vst [vmem:[#allocation130_spill] sm:$0xff] %v6769_v28  ;;  %v2541_v28 = vrot.slane %v6761_v15, 2 }
 0x3ec   : > { %v6777_v61 = vpop.permute.xlu2 %2409 }
 0x3ed   : > { %8481 = vst [vmem:[#allocation131_spill] sm:$0xff] %v6777_v61  ;;  %2431 = vrot.lane.b32.xlu1 %v2360_v5, %s4723_s26  ;;  %v2542_v50 = vsel %vm2474_vm4, %v2539_v57, %v2541_v28  ;;  %v2358_v5 = vsel %vm356_vm0, %v2355_v1, %v2357_v26  ;;  %v2838_v1 = vrot.slane %v6761_v15, 3 }
 0x3ef   : > { %v6780_v38 = vpop.permute.xlu1 %2703 }
 0x3f0   : > { %8482 = vst [vmem:[#allocation132_spill] sm:$0xff] %v6780_v38  ;;  %2908 = vrot.lane.b32.xlu0 %v2837_v13, %s4726_s14  ;;  %v2543_v38 = vrot.slane %v6757_v6, 2  ;;  %v8486_v13 = vrot.slane %v6664_v17, 3 }
 0x3f2   : > { %v6785_v46 = vpop.permute.xlu0 %3072  ;;  %2723 = vrot.lane.b32.xlu2 %v2540_v0, %s4727_s15  ;;  %v2544_v57 = vsel %vm2474_vm4, %v2541_v28, %v2543_v38  ;;  %v2839_v28 = vsel %vm2774_vm5, %v2836_v24, %v2838_v1 }
 0x3f3   : > { %8483 = vst [vmem:[#allocation133_spill] sm:$0xff] %v6785_v46  ;;  %v2835_v46 = vsel %vm2774_vm5, %v8486_v13, %v2834_v33  ;;  %v8491_v33 = vrot.slane %v6161_v16, 4  ;;  %v2840_v13 = vrot.slane %v6757_v6, 3 }
 0x3f4   : > { %v6789_v37 = vpop.permute.xlu2 %2705 }
 0x3f5   : > { %8484 = vst [vmem:[#allocation134_spill] sm:$0xff] %v6789_v37  ;;  %2613 = vrot.lane.b32.xlu1 %v2542_v50, %s4724_s27  ;;  %v2841_v16 = vsel %vm2774_vm5, %v2838_v1, %v2840_v13  ;;  %v2846_v1 = vrot.slane %v6180_v19, 3 }
 0x3f7   : > { %v6792_v10 = vpop.permute.xlu1 %2886 }
 0x3f8   : > { %8485 = vst [vmem:[#allocation135_spill] sm:$0xff] %v6792_v10  ;;  %2429 = vrot.lane.b32.xlu0 %v2358_v5, %s4723_s26 }
 0x3fa   : > { %v6800_v54 = vpop.permute.xlu0 %2411  ;;  %2906 = vrot.lane.b32.xlu2 %v2835_v46, %s4726_s14  ;;  %v6817_v46 = vsel %vm2180_vm3, %v2246_v42, %v8491_v33  ;;  %v8291_v42 = vrot.slane %v6727_v7, 4 }
 0x3fb   : > { %8487 = vst [vmem:[#allocation136_spill] sm:$0xff] %v6800_v54  ;;  %v2361_v37 = vrot.slane %v6817_v46, 1 }
 0x3fc   : > { %v6804_v0 = vpop.permute.xlu2 %2415  ;;  %8492 = vst [vmem:[#allocation140_spill] sm:$0xff] %v6817_v46  ;;  %v6837_v24 = vsel %vm2180_vm3, %v8291_v42, %v3022_v49  ;;  %v2545_v42 = vrot.slane %v6817_v46, 2 }
 0x3fd   : > { %8488 = vst [vmem:[#allocation137_spill] sm:$0xff] %v6804_v0  ;;  %2727 = vrot.lane.b32.xlu1 %v2544_v57, %s4727_s15 }
 0x3ff   : > { %v6807_v10 = vpop.permute.xlu1 %2595 }
 0x400   : > { %8489 = vst [vmem:[#allocation138_spill] sm:$0xff] %v6807_v10  ;;  %2725 = vrot.lane.b32.xlu0 %v2542_v50, %s4727_s15  ;;  %v2661_v10 = vrot.slane %v6180_v19, 2  ;;  %v2844_v19 = vrot.slane %v6188_v20, 3 }
 0x402   : > { %v6811_v26 = vpop.permute.xlu0 %2593  ;;  %2615 = vrot.lane.b32.xlu2 %v2544_v57, %s4724_s27 }
 0x403   : > { %8490 = vst [vmem:[#allocation139_spill] sm:$0xff] %v6811_v26 }
 0x404   : > { %v6820_v5 = vpop.permute.xlu2 %2597 }
 0x405   : > { %8493 = vst [vmem:[#allocation141_spill] sm:$0xff] %v6820_v5  ;;  %2910 = vrot.lane.b32.xlu1 %v2839_v28, %s4726_s14  ;;  %v3024_v28 = vrot.slane %v6757_v6, 4 }
 0x407   : > { %v6825_v50 = vpop.permute.xlu1 %2892 }
 0x408   : > { %8494 = vst [vmem:[#allocation142_spill] sm:$0xff] %v6825_v50  ;;  %2435 = vrot.lane.b32.xlu0 %v2361_v37, %s4723_s26 }
 0x40a   : > { %v6831_v57 = vpop.permute.xlu0 %2707  ;;  %2912 = vrot.lane.b32.xlu2 %v2841_v16, %s4726_s14  ;;  %v6849_v16 = vsel %vm2180_vm3, %v3022_v49, %v3024_v28  ;;  %v2659_v49 = vrot.slane %v6188_v20, 2 }
 0x40b   : > { %8495 = vst [vmem:[#allocation143_spill] sm:$0xff] %v6831_v57 }
 0x40c   : > { %v6839_v33 = vpop.permute.xlu2 %2711  ;;  %v2662_v54 = vsel %vm2474_vm4, %v2659_v49, %v2661_v10 }
 0x40d   : > { %8496 = vst [vmem:[#allocation144_spill] sm:$0xff] %v6839_v33  ;;  %3094 = vrot.lane.b32.xlu1 %v6837_v24, %s4728_s16  ;;  %v2546_v33 = vsel %vm2474_vm4, %v2543_v38, %v2545_v42  ;;  %v2660_v38 = vsel %vm2474_vm4, %v2545_v42, %v2659_v49  ;;  %vm4309_vm4 = vcmask 736256  }
 0x40f   : > { %v6845_v50 = vpop.permute.xlu1 %2413 }
 0x410   : > { %8497 = vst [vmem:[#allocation145_spill] sm:$0xff] %v6845_v50  ;;  %2920 = vrot.lane.b32.xlu0 %v2846_v1, %s4726_s14  ;;  %v8504_v50 = vrot.slane %v6757_v6, 1 }
 0x412   : > { %v6851_v57 = vpop.permute.xlu0 %2890  ;;  %3096 = vrot.lane.b32.xlu2 %v6849_v16, %s4728_s16 }
 0x413   : > { %8498 = vst [vmem:[#allocation146_spill] sm:$0xff] %v6851_v57 }
 0x414   : > { %v6856_v26 = vpop.permute.xlu2 %2894 }
 0x415   : > { %8499 = vst [vmem:[#allocation147_spill] sm:$0xff] %v6856_v26  ;;  %2619 = vrot.lane.b32.xlu1 %v2545_v42, %s4724_s27 }
 0x417   : > { %v6859_v61 = vpop.permute.xlu1 %2709 }
 0x418   : > { %8500 = vst [vmem:[#allocation148_spill] sm:$0xff] %v6859_v61  ;;  %2617 = vrot.lane.b32.xlu0 %v2546_v33, %s4724_s27  ;;  %v2842_v61 = vrot.slane %v6817_v46, 3 }
 0x41a   : > { %v6865_v57 = vpop.permute.xlu0 %2599  ;;  %2735 = vrot.lane.b32.xlu2 %v2661_v10, %s4727_s15  ;;  %v2843_v49 = vsel %vm2774_vm5, %v2840_v13, %v2842_v61  ;;  %v3321_v13 = vrot.slane %v6817_v46, 5 }
 0x41b   : > { %8501 = vst [vmem:[#allocation149_spill] sm:$0xff] %v6865_v57  ;;  %v2362_v57 = vsel %vm356_vm0, %v8504_v50, %v2361_v37  ;;  %v8509_v37 = vrot.slane %v6188_v20, 4 }
 0x41c   : > { %v6869_v5 = vpop.permute.xlu2 %2603 }
 0x41d   : > { %8502 = vst [vmem:[#allocation150_spill] sm:$0xff] %v6869_v5  ;;  %2733 = vrot.lane.b32.xlu1 %v2662_v54, %s4727_s15  ;;  %v2845_v54 = vsel %vm2774_vm5, %v2842_v61, %v2844_v19 }
 0x41f   : > { %v6872_v26 = vpop.permute.xlu1 %2419 }
 0x420   : > { %8503 = vst [vmem:[#allocation151_spill] sm:$0xff] %v6872_v26  ;;  %2731 = vrot.lane.b32.xlu0 %v2660_v38, %s4727_s15  ;;  %v3026_v38 = vrot.slane %v6817_v46, 4 }
 0x422   : > { %v6881_v0 = vpop.permute.xlu0 %2896  ;;  %2433 = vrot.lane.b32.xlu2 %v2362_v57, %s4723_s26  ;;  %v6899_v50 = vsel %vm2180_vm3, %v3026_v38, %v8509_v37  ;;  %v6908_v61 = vsel %vm2180_vm3, %v3024_v28, %v3026_v38  ;;  %v3287_v28 = vrot.slane %v6267_v32, 5 }
 0x423   : > { %8505 = vst [vmem:[#allocation152_spill] sm:$0xff] %v6881_v0  ;;  %v3289_v0 = vrot.slane %v6365_v2, 5 }
 0x424   : > { %v6885_v10 = vpop.permute.xlu2 %2900  ;;  %8510 = vst [vmem:[#allocation156_spill] sm:$0xff] %v6899_v50 }
 0x425   : > { %8506 = vst [vmem:[#allocation153_spill] sm:$0xff] %v6885_v10  ;;  %2916 = vrot.lane.b32.xlu1 %v2845_v54, %s4726_s14 }
 0x426   : > { %8512 = vst [vmem:[#allocation158_spill] sm:$0xff] %v6908_v61 }
 0x427   : > { %v6888_v42 = vpop.permute.xlu1 %2601 }
 0x428   : > { %8507 = vst [vmem:[#allocation154_spill] sm:$0xff] %v6888_v42  ;;  %2914 = vrot.lane.b32.xlu0 %v2843_v49, %s4726_s14  ;;  %v3319_v49 = vrot.slane %v6757_v6, 5 }
 0x42a   : > { %v6893_v5 = vpop.permute.xlu0 %2417  ;;  %2729 = vrot.lane.b32.xlu2 %v2546_v33, %s4727_s15  ;;  %v2847_v33 = vsel %vm2774_vm5, %v2844_v19, %v2846_v1  ;;  %v3290_v19 = vsel %vm3257_vm6, %v3287_v28, %v3289_v0  ;;  %v8297_v1 = vrot.slane %v6368_v43, 5  ;;  %vm4237_vm5 = vcmask 1031168  }
 0x42b   : > { %8508 = vst [vmem:[#allocation155_spill] sm:$0xff] %v6893_v5  ;;  %v3317_v5 = vrot.slane %v6761_v15, 5 }
 0x42c   : > { %v6901_v57 = vpop.permute.xlu2 %2421 }
 0x42d   : > { %3210 = vrot.lane.b32.xlu1 %v6899_v50, %s4729_s17  ;;  %v3322_v50 = vsel %vm3257_vm6, %v3319_v49, %v3321_v13 }
 0x42f   : > { %v6905_v54 = vpop.permute.xlu1 %2715 }
 0x430   : > { %8511 = vst [vmem:[#allocation157_spill] sm:$0xff] %v6905_v54  ;;  %3208 = vrot.lane.b32.xlu0 %v6908_v61, %s4729_s17 }
 0x432   : > { %v6915_v37 = vpop.permute.xlu0 %2713  ;;  %2918 = vrot.lane.b32.xlu2 %v2847_v33, %s4726_s14  ;;  %v8516_v33 = vrot.slane %v6188_v20, 5  ;;  %s4742_s14 = smov 111  }
 0x433   : > { %8513 = vst [vmem:[#allocation159_spill] sm:$0xff] %v6915_v37 }
 0x434   : > { %v6920_v10 = vpop.permute.xlu2 %2717  ;;  %v3324_v61 = vsel %vm3257_vm6, %v3321_v13, %v8516_v33  ;;  %v3503_v33 = vrot.slane %v6757_v6, 6 }
 0x435   : > { %8514 = vst [vmem:[#allocation160_spill] sm:$0xff] %v6920_v10  ;;  %3392 = vrot.lane.b32.xlu1 %v3322_v50, %s4730_s18  ;;  %v3505_v50 = vrot.slane %v6817_v46, 6 }
 0x437   : > { %v6924_v38 = vpop.permute.xlu1 %2898  ;;  %v3506_v46 = vsel %vm3441_vm7, %v3503_v33, %v3505_v50 }
 0x438   : > { %8515 = vst [vmem:[#allocation161_spill] sm:$0xff] %v6924_v38  ;;  %3360 = vrot.lane.b32.xlu0 %v3290_v19, %s4730_s18  ;;  %v3292_v38 = vsel %vm3257_vm6, %v3289_v0, %v8297_v1  ;;  %v8517_v19 = vrot.slane %v6188_v20, 6  ;;  %v8302_v1 = vrot.slane %v6368_v43, 6  ;;  %v8518_v20 = vrot.slane %v6727_v7, 4 }
 0x43a   : > { %v6932_v37 = vpop.permute.xlu0 %2423  ;;  %3394 = vrot.lane.b32.xlu2 %v3324_v61, %s4730_s18  ;;  %v3508_v13 = vsel %vm3441_vm7, %v3505_v50, %v8517_v19  ;;  %v3018_v61 = vrot.slane %v6719_v23, 4 }
 0x43c   : > { %v6939_v54 = vpop.permute.xlu2 %2427  ;;  %v3021_v19 = vsel %vm2180_vm3, %v3018_v61, %v8518_v20 }
 0x43d   : > { %3362 = vrot.lane.b32.xlu1 %v3292_v38, %s4730_s18  ;;  %v3473_v38 = vrot.slane %v6365_v2, 6 }
 0x43f   : > { %v6942_v10 = vpop.permute.xlu1 %2607  ;;  %v3476_v50 = vsel %vm3441_vm7, %v3473_v38, %v8302_v1  ;;  %v3320_v1 = vsel %vm3257_vm6, %v3317_v5, %v3319_v49 }
 0x440   : > { %3578 = vrot.lane.b32.xlu0 %v3508_v13, %s4731_s19 }
 0x442   : > { %v6951_v0 = vpop.permute.xlu0 %2605  ;;  %3576 = vrot.lane.b32.xlu2 %v3506_v46, %s4731_s19  ;;  %v3471_v46 = vrot.slane %v6267_v32, 6 }
 0x444   : > { %v6959_v6 = vpop.permute.xlu2 %2609  ;;  %v3474_v13 = vsel %vm3441_vm7, %v3471_v46, %v3473_v38 }
 0x445   : > { %3092 = vrot.lane.b32.xlu1 %v3021_v19, %s4728_s16 }
 0x447   : > { %v6962_v42 = vpop.permute.xlu1 %2904 }
 0x448   : > { %8519 = vst [vmem:[#allocation162_spill] sm:$0xff] %v6962_v42  ;;  %3546 = vrot.lane.b32.xlu0 %v3476_v50, %s4731_s19  ;;  %v3285_v50 = vrot.slane %v6273_v56, 5 }
 0x44a   : > { %v6970_v2 = vpop.permute.xlu0 %2719  ;;  %3544 = vrot.lane.b32.xlu2 %v3474_v13, %s4731_s19  ;;  %v3288_v13 = vsel %vm3257_vm6, %v3285_v50, %v3287_v28 }
 0x44b   : > { %8520 = vst [vmem:[#allocation163_spill] sm:$0xff] %v6970_v2 }
 0x44c   : > { %v6973_v20 = vpop.permute.xlu2 %2723 }
 0x44d   : > { %3206 = vrot.lane.b32.xlu1 %v6849_v16, %s4729_s17  ;;  %v3016_v16 = vrot.slane %v6664_v17, 4 }
 0x44f   : > { %v6978_v43 = vpop.permute.xlu1 %2425  ;;  %v3019_v49 = vsel %vm2180_vm3, %v3016_v16, %v3018_v61  ;;  %v3315_v61 = vrot.slane %v6727_v7, 5 }
 0x450   : > { %3390 = vrot.lane.b32.xlu0 %v3320_v1, %s4730_s18  ;;  %v3501_v1 = vrot.slane %v6761_v15, 6 }
 0x452   : > { %v6983_v38 = vpop.permute.xlu0 %2902  ;;  %3174 = vrot.lane.b32.xlu2 %v6372_v63, %s4729_s17  ;;  %v3469_v63 = vrot.slane %v6273_v56, 6 }
 0x453   : > { %8521 = vst [vmem:[#allocation164_spill] sm:$0xff] %v6983_v38  ;;  %v3504_v38 = vsel %vm3441_vm7, %v3501_v1, %v3503_v33 }
 0x454   : > { %v6988_v32 = vpop.permute.xlu2 %2906  ;;  %v3472_v28 = vsel %vm3441_vm7, %v3469_v63, %v3471_v46  ;;  %v3499_v46 = vrot.slane %v6727_v7, 6 }
 0x455   : > { %8522 = vst [vmem:[#allocation165_spill] sm:$0xff] %v6988_v32  ;;  %3358 = vrot.lane.b32.xlu1 %v3288_v13, %s4730_s18  ;;  %v3465_v32 = vrot.slane %v6177_v34, 6 }
 0x457   : > { %v6992_v42 = vpop.permute.xlu1 %2721 }
 0x458   : > { %8523 = vst [vmem:[#allocation166_spill] sm:$0xff] %v6992_v42  ;;  %3090 = vrot.lane.b32.xlu0 %v3019_v49, %s4728_s16 }
 0x45a   : > { %v6999_v2 = vpop.permute.xlu0 %2611  ;;  %3574 = vrot.lane.b32.xlu2 %v3504_v38, %s4731_s19  ;;  %v3318_v38 = vsel %vm3257_vm6, %v3315_v61, %v3317_v5 }
 0x45c   : > { %v7003_v13 = vpop.permute.xlu2 %2615 }
 0x45d   : > { %8524 = vst [vmem:[#allocation167_spill] sm:$0xff] %v7003_v13  ;;  %3542 = vrot.lane.b32.xlu1 %v3472_v28, %s4731_s19  ;;  %v3283_v28 = vrot.slane %v6203_v53, 5 }
 0x45f   : > { %v7006_v26 = vpop.permute.xlu1 %2431  ;;  %v3286_v15 = vsel %vm3257_vm6, %v3283_v28, %v3285_v50 }
 0x460   : > { %8525 = vst [vmem:[#allocation168_spill] sm:$0xff] %v7006_v26  ;;  %3172 = vrot.lane.b32.xlu0 %v6383_v36, %s4729_s17  ;;  %v3502_v36 = vsel %vm3441_vm7, %v3499_v46, %v3501_v1 }
 0x462   : > { %v7011_v33 = vpop.permute.xlu0 %2908  ;;  %3204 = vrot.lane.b32.xlu2 %v6837_v24, %s4729_s17  ;;  %v3014_v24 = vrot.slane %v6669_v30, 4 }
 0x464   : > { %v7016_v56 = vpop.permute.xlu2 %2912  ;;  %v3017_v5 = vsel %vm2180_vm3, %v3014_v24, %v3016_v16  ;;  %v3313_v16 = vrot.slane %v6719_v23, 5 }
 0x465   : > { %3388 = vrot.lane.b32.xlu1 %v3318_v38, %s4730_s18 }
 0x467   : > { %v7021_v13 = vpop.permute.xlu1 %2613 }
 0x468   : > { %8526 = vst [vmem:[#allocation169_spill] sm:$0xff] %v7021_v13  ;;  %3572 = vrot.lane.b32.xlu0 %v3502_v36, %s4731_s19  ;;  %v3467_v13 = vrot.slane %v6203_v53, 6 }
 0x46a   : > { %v7027_v26 = vpop.permute.xlu0 %2429  ;;  %3356 = vrot.lane.b32.xlu2 %v3286_v15, %s4730_s18  ;;  %v3470_v50 = vsel %vm3441_vm7, %v3467_v13, %v3469_v63  ;;  %v3281_v15 = vrot.slane %v6177_v34, 5  ;;  %v3316_v63 = vsel %vm3257_vm6, %v3313_v16, %v3315_v61 }
 0x46b   : > { %8527 = vst [vmem:[#allocation170_spill] sm:$0xff] %v7027_v26 }
 0x46c   : > { %v7031_v38 = vpop.permute.xlu2 %3096  ;;  %v3284_v26 = vsel %vm3257_vm6, %v3281_v15, %v3283_v28  ;;  %v3012_v28 = vrot.slane %v6605_v11, 4 }
 0x46d   : > { %3088 = vrot.lane.b32.xlu1 %v3017_v5, %s4728_s16 }
 0x46e   : > { %v3015_v61 = vsel %vm2180_vm3, %v3012_v28, %v3014_v24 }
 0x46f   : > { %v7035_v7 = vpop.permute.xlu1 %2727 }
 0x470   : > { %3202 = vrot.lane.b32.xlu0 %v3021_v19, %s4729_s17  ;;  %v3497_v19 = vrot.slane %v6719_v23, 6 }
 0x472   : > { %v7039_v1 = vpop.permute.xlu0 %2725  ;;  %3540 = vrot.lane.b32.xlu2 %v3470_v50, %s4731_s19 }
 0x474   : > { %v7042_v36 = vpop.permute.xlu2 %2735 }
 0x475   : > { %8528 = vst [vmem:[#allocation171_spill] sm:$0xff] %v7042_v36  ;;  %3170 = vrot.lane.b32.xlu1 %v6261_v60, %s4729_s17  ;;  %v3500_v60 = vsel %vm3441_vm7, %v3497_v19, %v3499_v46 }
 0x477   : > { %v7048_v53 = vpop.permute.xlu1 %2910 }
 0x478   : > { %3354 = vrot.lane.b32.xlu0 %v3284_v26, %s4730_s18  ;;  %v3468_v26 = vsel %vm3441_vm7, %v3465_v32, %v3467_v13  ;;  %v3279_v13 = vrot.slane %v6105_v21, 5 }
 0x47a   : > { %v7054_v50 = vpop.permute.xlu0 %2435  ;;  %3386 = vrot.lane.b32.xlu2 %v3316_v63, %s4730_s18  ;;  %v3311_v63 = vrot.slane %v6664_v17, 5  ;;  %v3282_v24 = vsel %vm3257_vm6, %v3279_v13, %v3281_v15  ;;  %v3463_v15 = vrot.slane %v6105_v21, 6 }
 0x47b   : > { %8529 = vst [vmem:[#allocation172_spill] sm:$0xff] %v7054_v50 }
 0x47c   : > { %v7058_v36 = vpop.permute.xlu2 %2433 }
 0x47d   : > { %8530 = vst [vmem:[#allocation173_spill] sm:$0xff] %v7058_v36  ;;  %3570 = vrot.lane.b32.xlu1 %v3500_v60, %s4731_s19  ;;  %v3314_v36 = vsel %vm3257_vm6, %v3311_v63, %v3313_v16 }
 0x47f   : > { %v7063_v42 = vpop.permute.xlu1 %3094 }
 0x480   : > { %3538 = vrot.lane.b32.xlu0 %v3468_v26, %s4731_s19 }
 0x482   : > { %v7068_v50 = vpop.permute.xlu0 %2920  ;;  %3086 = vrot.lane.b32.xlu2 %v3015_v61, %s4728_s16 }
 0x483   : > { %8531 = vst [vmem:[#allocation174_spill] sm:$0xff] %v7068_v50 }
 0x484   : > { %v7071_v46 = vpop.permute.xlu2 %2729 }
 0x485   : > { %8532 = vst [vmem:[#allocation175_spill] sm:$0xff] %v7071_v46  ;;  %3200 = vrot.lane.b32.xlu1 %v3019_v49, %s4729_s17  ;;  %v3010_v49 = vrot.slane %v6609_v27, 4 }
 0x487   : > { %v7075_v60 = vpop.permute.xlu1 %2619  ;;  %v7092_v16 = vsel %vm2180_vm3, %v3010_v49, %v3012_v28 }
 0x488   : > { %8533 = vst [vmem:[#allocation176_spill] sm:$0xff] %v7075_v60  ;;  %3384 = vrot.lane.b32.xlu0 %v3314_v36, %s4730_s18  ;;  %v3495_v36 = vrot.slane %v6664_v17, 6 }
 0x48a   : > { %v7080_v26 = vpop.permute.xlu0 %2617  ;;  %3168 = vrot.lane.b32.xlu2 %v6290_v14, %s4729_s17  ;;  %v3498_v14 = vsel %vm3441_vm7, %v3495_v36, %v3497_v19 }
 0x48b   : > { %8534 = vst [vmem:[#allocation177_spill] sm:$0xff] %v7080_v26 }
 0x48c   : > { %v7085_v46 = vpop.permute.xlu2 %2918 }
 0x48d   : > { %8535 = vst [vmem:[#allocation178_spill] sm:$0xff] %v7085_v46  ;;  %3352 = vrot.lane.b32.xlu1 %v3282_v24, %s4730_s18  ;;  %v3466_v24 = vsel %vm3441_vm7, %v3463_v15, %v3465_v32  ;;  %v3493_v32 = vrot.slane %v6669_v30, 6 }
 0x48f   : > { %v7089_v50 = vpop.permute.xlu1 %2733 }
 0x490   : > { %8536 = vst [vmem:[#allocation179_spill] sm:$0xff] %v7089_v50  ;;  %3084 = vrot.lane.b32.xlu0 %v7092_v16, %s4728_s16  ;;  %v3309_v50 = vrot.slane %v6669_v30, 5 }
 0x492   : > { %v7099_v26 = vpop.permute.xlu0 %2731  ;;  %3568 = vrot.lane.b32.xlu2 %v3498_v14, %s4731_s19 }
 0x493   : > { %8537 = vst [vmem:[#allocation180_spill] sm:$0xff] %v7099_v26  ;;  %v3312_v26 = vsel %vm3257_vm6, %v3309_v50, %v3311_v63  ;;  %v8308_v63 = vrot.slane %v6575_v44, 4 }
 0x494   : > { %v7103_v46 = vpop.permute.xlu2 %3394 }
 0x495   : > { %3536 = vrot.lane.b32.xlu1 %v3466_v24, %s4731_s19  ;;  %v3277_v24 = vrot.slane %v6102_v51, 5 }
 0x497   : > { %v7106_v28 = vpop.permute.xlu1 %2916 }
 0x498   : > { %8538 = vst [vmem:[#allocation181_spill] sm:$0xff] %v7106_v28  ;;  %3166 = vrot.lane.b32.xlu0 %v6198_v12, %s4729_s17  ;;  %v3496_v28 = vsel %vm3441_vm7, %v3493_v32, %v3495_v36  ;;  %v3280_v12 = vsel %vm3257_vm6, %v3277_v24, %v3279_v13 }
 0x49a   : > { %v7111_v19 = vpop.permute.xlu0 %2914  ;;  %3198 = vrot.lane.b32.xlu2 %v3017_v5, %s4729_s17  ;;  %v3657_v5 = vsel %vm3625_vm8, %v6664_v17, %v6978_v43  ;;  %v3461_v43 = vrot.slane %v6102_v51, 6 }
 0x49b   : > { %8539 = vst [vmem:[#allocation182_spill] sm:$0xff] %v7111_v19  ;;  %v3695_v13 = vsel %vm3663_vm9, %v3657_v5, %v6959_v6 }
 0x49c   : > { %v3577_v14 = vpop.permute.xlu2 %3576  ;;  %v3733_v17 = vsel %vm3701_vm10, %v3695_v13, %v7039_v1  ;;  %v3464_v5 = vsel %vm3441_vm7, %v3461_v43, %v3463_v15 }
 0x49d   : > { %3382 = vrot.lane.b32.xlu1 %v3312_v26, %s4730_s18  ;;  %v7129_v26 = vsel %vm2180_vm3, %v8308_v63, %v3010_v49  ;;  %v3658_v49 = vsel %vm3625_vm8, %v6719_v23, %v6939_v54  ;;  %v3275_v54 = vrot.slane %v6029_v31, 5 }
 0x49e   : > { %v3696_v6 = vsel %vm3663_vm9, %v3658_v49, %v6999_v2 }
 0x49f   : > { %v3211_v60 = vpop.permute.xlu1 %3210  ;;  %v3734_v1 = vsel %vm3701_vm10, %v3696_v6, %v7035_v7  ;;  %v3307_v7 = vrot.slane %v6605_v11, 5 }
 0x4a0   : > { %3566 = vrot.lane.b32.xlu0 %v3496_v28, %s4731_s19 }
 0x4a2   : > { %v3209_v19 = vpop.permute.xlu0 %3208  ;;  %3350 = vrot.lane.b32.xlu2 %v3280_v12, %s4730_s18  ;;  %v3771_v12 = vsel %vm3739_vm11, %v3733_v17, %v7048_v53  ;;  %v3641_v53 = vsel %vm3625_vm8, %v6105_v21, %v6535_v55  ;;  %v3278_v17 = vsel %vm3257_vm6, %v3275_v54, %v3277_v24 }
 0x4a3   : > { %v3809_v13 = vsel %vm3777_vm12, %v3771_v12, %v7063_v42  ;;  %v3642_v42 = vsel %vm3625_vm8, %v6177_v34, %v6546_v29  ;;  %v3679_v21 = vsel %vm3663_vm9, %v3641_v53, %v6570_v58  ;;  %v3006_v12 = vrot.slane %v6567_v22, 4 }
 0x4a4   : > { %v7131_v36 = vpop.permute.xlu2 %3544  ;;  %v3847_v23 = vsel %vm3815_vm13, %v3809_v13, %v3209_v19  ;;  %v3717_v34 = vsel %vm3701_vm10, %v3679_v21, %v6581_v62  ;;  %v3680_v29 = vsel %vm3663_vm9, %v3642_v42, %v6491_v8 }
 0x4a5   : > { %3082 = vrot.lane.b32.xlu1 %v7129_v26, %s4728_s16  ;;  %v3755_v58 = vsel %vm3739_vm11, %v3717_v34, %v6651_v45  ;;  %v3273_v34 = vrot.slane %v6035_v59, 5 }
 0x4a7   : > { %v3393_v28 = vpop.permute.xlu1 %3392 }
 0x4a8   : > { %3196 = vrot.lane.b32.xlu0 %v3015_v61, %s4729_s17  ;;  %v3772_v61 = vsel %vm3739_vm11, %v3734_v1, %v7016_v56  ;;  %v3885_v19 = vsel %vm3853_vm14, %v3847_v23, %v3393_v28  ;;  %v3718_v28 = vsel %vm3701_vm10, %v3680_v29, %v6633_v47  ;;  %v8540_v23 = vrot.slane %v6575_v44, 4 }
 0x4a9   : > { %v3810_v15 = vsel %vm3777_vm12, %v3772_v61, %v7031_v38  ;;  %v7187_v38 = vsel %vm3891_vm15, %v3885_v19, %v3577_v14  ;;  %v3793_v14 = vsel %vm3777_vm12, %v3755_v58, %v6661_v41  ;;  %v3305_v19 = vrot.slane %v6609_v27, 5 }
 0x4aa   : > { %v3361_v63 = vpop.permute.xlu0 %3360  ;;  %3534 = vrot.lane.b32.xlu2 %v3464_v5, %s4731_s19  ;;  %v3848_v56 = vsel %vm3815_vm13, %v3810_v15, %v3211_v60  ;;  %v3310_v60 = vsel %vm3257_vm6, %v3307_v7, %v3309_v50  ;;  %v4034_v50 = vrot.slane %v7187_v38, 1  ;;  %v3831_v6 = vsel %vm3815_vm13, %v3793_v14, %v6692_v35  ;;  %v8542_v14 = vld [vmem:[#allocation102_spill] sm:$0xff] }
 0x4ab   : > { %v3886_v24 = vsel %vm3853_vm14, %v3848_v56, %v7103_v46  ;;  %v3756_v46 = vsel %vm3739_vm11, %v3718_v28, %v6640_v9  ;;  %v3869_v41 = vsel %vm3853_vm14, %v3831_v6, %v3361_v63  ;;  %v7230_v53 = vsel %vm2180_vm3, %v3006_v12, %v8540_v23 }
 0x4ac   : > { %v7156_v2 = vpop.permute.xlu2 %3174  ;;  %v3794_v35 = vsel %vm3777_vm12, %v3756_v46, %v6602_v40  ;;  %v7225_v63 = vsel %vm3891_vm15, %v3869_v41, %v7131_v36  ;;  %v3656_v40 = vsel %vm3625_vm8, %v6669_v30, %v6932_v37  ;;  %v3640_v38 = vsel %vm3625_vm8, %v6102_v51, %v6418_v18  ;;  %v8543_v41 = vld [vmem:[#allocation88_spill] sm:$0xff] }
 0x4ad   : > { %3164 = vrot.lane.b32.xlu1 %v6174_v48, %s4729_s17  ;;  %v3491_v48 = vrot.slane %v6605_v11, 6  ;;  %v3832_v13 = vsel %vm3815_vm13, %v3794_v35, %v6729_v4  ;;  %v4002_v36 = vrot.slane %v7225_v63, 1  ;;  %v3694_v21 = vsel %vm3663_vm9, %v3656_v40, %v6942_v10 }
 0x4ae   : > { %v3732_v37 = vsel %vm3701_vm10, %v3694_v21, %v6973_v20  ;;  %v3678_v28 = vsel %vm3663_vm9, %v3640_v38, %v6469_v3  ;;  %v3489_v18 = vrot.slane %v6609_v27, 6  ;;  %v3655_v21 = vsel %vm3625_vm8, %v6605_v11, %v6901_v57  ;;  %v8551_v38 = vld [vmem:[#allocation23_spill] sm:$0xff] }
 0x4af   : > { %v3363_v55 = vpop.permute.xlu1 %3362  ;;  %v3494_v8 = vsel %vm3441_vm7, %v3491_v48, %v3493_v32  ;;  %v3459_v32 = vrot.slane %v6029_v31, 6 }
 0x4b0   : > { %3348 = vrot.lane.b32.xlu0 %v3278_v17, %s4730_s18  ;;  %v3870_v61 = vsel %vm3853_vm14, %v3832_v13, %v3363_v55  ;;  %v3308_v55 = vsel %vm3257_vm6, %v3305_v19, %v3307_v7  ;;  %v3492_v3 = vsel %vm3441_vm7, %v3489_v18, %v3491_v48  ;;  %v8546_v13 = vld [vmem:[#allocation110_spill] sm:$0xff] }
 0x4b1   : > { %v3462_v9 = vsel %vm3441_vm7, %v3459_v32, %v3461_v43 }
 0x4b2   : > { %v3579_v62 = vpop.permute.xlu0 %3578  ;;  %3380 = vrot.lane.b32.xlu2 %v3310_v60, %s4730_s18  ;;  %v3004_v60 = vrot.slane %v6505_v39, 4 }
 0x4b3   : > { %v7199_v45 = vsel %vm3891_vm15, %v3886_v24, %v3579_v62 }
 0x4b4   : > { %v4036_v47 = vrot.slane %v7199_v45, 1  ;;  %v3575_v49 = vpop.permute.xlu2 %3574  ;;  %v7285_v62 = vsel %vm2180_vm3, %v3004_v60, %v3006_v12 }
 0x4b5   : > { %3564 = vrot.lane.b32.xlu1 %v3494_v8, %s4731_s19 }
 0x4b6   : > { %v4037_v5 = vsel %vm356_vm0, %v4034_v50, %v4036_v47 }
 0x4b7   : > { %v3093_v1 = vpop.permute.xlu1 %3092  ;;  %4570 = vmatpush.xpose.msk.msra.mxu1 %vm4046_vm1, %v4037_v5 }
 0x4b8   : > { %3532 = vrot.lane.b32.xlu0 %v3462_v9, %s4731_s19 }
 0x4ba   : > { %v3547_v43 = vpop.permute.xlu0 %3546  ;;  %3080 = vrot.lane.b32.xlu2 %v7230_v53, %s4728_s16 }
 0x4bb   : > { %v7239_v4 = vsel %vm3891_vm15, %v3870_v61, %v3547_v43  ;;  %v8547_v43 = vld [vmem:[#allocation40_spill] sm:$0xff] }
 0x4bc   : > { %v4004_v42 = vrot.slane %v7239_v4, 1  ;;  %v7243_v15 = vpop.permute.xlu2 %3204 }
 0x4bd   : > { %3194 = vrot.lane.b32.xlu1 %v7092_v16, %s4729_s17  ;;  %v3770_v16 = vsel %vm3739_vm11, %v3732_v37, %v7011_v33  ;;  %v3276_v33 = vsel %vm3257_vm6, %v3273_v34, %v3275_v54  ;;  %v3716_v54 = vsel %vm3701_vm10, %v3678_v28, %v6588_v25  ;;  %v8541_v25 = vld [vmem:[#allocation96_spill] sm:$0xff]  ;;  %v3271_v28 = vrot.slane %v8551_v38, 5 }
 0x4be   : > { %v4005_v30 = vsel %vm356_vm0, %v4002_v36, %v4004_v42  ;;  %v3808_v17 = vsel %vm3777_vm12, %v3770_v16, %v3093_v1  ;;  %v3639_v8 = vsel %vm3625_vm8, %v6029_v31, %v8541_v25  ;;  %v8544_v1 = vld [vmem:[#allocation108_spill] sm:$0xff]  ;;  %v8545_v31 = vld [vmem:[#allocation106_spill] sm:$0xff] }
 0x4bf   : > { %v3207_v56 = vpop.permute.xlu1 %3206  ;;  %4553 = vmatpush.xpose.msk.msra.mxu0 %vm4046_vm1, %v4005_v30  ;;  %v3677_v5 = vsel %vm3663_vm9, %v3639_v8, %v8543_v41  ;;  %v3303_v30 = vrot.slane %v6575_v44, 5  ;;  %v3274_v25 = vsel %vm3257_vm6, %v3271_v28, %v3273_v34  ;;  %v3455_v41 = vrot.slane %v8551_v38, 6 }
 0x4c0   : > { %3378 = vrot.lane.b32.xlu0 %v3308_v55, %s4730_s18  ;;  %v3846_v10 = vsel %vm3815_vm13, %v3808_v17, %v3207_v56  ;;  %v3715_v9 = vsel %vm3701_vm10, %v3677_v5, %v8545_v31  ;;  %v3693_v55 = vsel %vm3663_vm9, %v3655_v21, %v6951_v0  ;;  %v8553_v31 = vld [vmem:[#allocation151_spill] sm:$0xff] }
 0x4c1   : > { %v3753_v63 = vsel %vm3739_vm11, %v3715_v9, %v8546_v13  ;;  %v3306_v11 = vsel %vm3257_vm6, %v3303_v30, %v3305_v19  ;;  %v3654_v9 = vsel %vm3625_vm8, %v6609_v27, %v8553_v31  ;;  %v3301_v13 = vrot.slane %v6567_v22, 5 }
 0x4c2   : > { %v3391_v29 = vpop.permute.xlu0 %3390  ;;  %3162 = vrot.lane.b32.xlu2 %v6109_v52, %s4729_s17  ;;  %v3485_v27 = vrot.slane %v6567_v22, 6 }
 0x4c3   : > { %v3884_v20 = vsel %vm3853_vm14, %v3846_v10, %v3391_v29  ;;  %v8549_v10 = vld [vmem:[#allocation166_spill] sm:$0xff] }
 0x4c4   : > { %v7272_v7 = vsel %vm3891_vm15, %v3884_v20, %v3575_v49  ;;  %v3357_v58 = vpop.permute.xlu2 %3356  ;;  %v3754_v49 = vsel %vm3739_vm11, %v3716_v54, %v8542_v14  ;;  %v3731_v29 = vsel %vm3701_vm10, %v3693_v55, %v8549_v10  ;;  %v8552_v14 = vld [vmem:[#allocation100_spill] sm:$0xff] }
 0x4c5   : > { %3346 = vrot.lane.b32.xlu1 %v3276_v33, %s4730_s18  ;;  %v4032_v52 = vrot.slane %v7272_v7, 1  ;;  %v3792_v48 = vsel %vm3777_vm12, %v3754_v49, %v8544_v1  ;;  %v8550_v33 = vld [vmem:[#allocation165_spill] sm:$0xff]  ;;  %v3002_v49 = vrot.slane %v8552_v14, 4  ;;  %v8554_v7 = vld [vmem:[#allocation27_spill] sm:$0xff] }
 0x4c6   : > { %v3830_v35 = vsel %vm3815_vm13, %v3792_v48, %v7156_v2  ;;  %v8548_v2 = vld [vmem:[#allocation105_spill] sm:$0xff] }
 0x4c7   : > { %v3359_v24 = vpop.permute.xlu1 %3358  ;;  %v4035_v51 = vsel %vm356_vm0, %v4032_v52, %v4034_v50  ;;  %v3457_v50 = vrot.slane %v6035_v59, 6  ;;  %v3791_v56 = vsel %vm3777_vm12, %v3753_v63, %v8548_v2  ;;  %v8556_v63 = vld [vmem:[#allocation150_spill] sm:$0xff] }
 0x4c8   : > { %3078 = vrot.lane.b32.xlu0 %v7285_v62, %s4728_s16  ;;  %4571 = vmatpush.xpose.msk.msra.mxu1 %vm4046_vm1, %v4035_v51 }
 0x4c9   : > { %v3460_v6 = vsel %vm3441_vm7, %v3457_v50, %v3459_v32  ;;  %v3868_v32 = vsel %vm3853_vm14, %v3830_v35, %v3359_v24 }
 0x4ca   : > { %v3091_v46 = vpop.permute.xlu0 %3090  ;;  %3562 = vrot.lane.b32.xlu2 %v3492_v3, %s4731_s19 }
 0x4cc   : > { %v3541_v12 = vpop.permute.xlu2 %3540 }
 0x4cd   : > { %3530 = vrot.lane.b32.xlu1 %v3460_v6, %s4731_s19  ;;  %v7363_v6 = vsel %vm2180_vm3, %v3002_v49, %v3004_v60  ;;  %v3458_v60 = vsel %vm3441_vm7, %v3455_v41, %v3457_v50  ;;  %v8557_v50 = vld [vmem:[#allocation163_spill] sm:$0xff] }
 0x4cf   : > { %v3543_v23 = vpop.permute.xlu1 %3542 }
 0x4d0   : > { %v3906_v61 = vsel %vm3891_vm15, %v3868_v32, %v3543_v23  ;;  %3160 = vrot.lane.b32.xlu0 %v8547_v43, %s4729_s17  ;;  %v3304_v43 = vsel %vm3257_vm6, %v3301_v13, %v3303_v30  ;;  %v8560_v30 = vld [vmem:[#allocation86_spill] sm:$0xff] }
 0x4d1   : > { %v4000_v40 = vrot.slane %v3906_v61, 1 }
 0x4d2   : > { %v3173_v37 = vpop.permute.xlu0 %3172  ;;  %3192 = vrot.lane.b32.xlu2 %v7129_v26, %s4729_s17  ;;  %v3769_v26 = vsel %vm3739_vm11, %v3731_v29, %v8550_v33 }
 0x4d3   : > { %v4003_v16 = vsel %vm356_vm0, %v4000_v40, %v4002_v36  ;;  %v3829_v17 = vsel %vm3815_vm13, %v3791_v56, %v3173_v37  ;;  %v3487_v36 = vrot.slane %v6575_v44, 6  ;;  %v3807_v54 = vsel %vm3777_vm12, %v3769_v26, %v3091_v46  ;;  %v8559_v56 = vld [vmem:[#allocation82_spill] sm:$0xff]  ;;  %v8562_v26 = vld [vmem:[#allocation97_spill] sm:$0xff] }
 0x4d4   : > { %4554 = vmatpush.xpose.msk.msra.mxu0 %vm4046_vm1, %v4003_v16  ;;  %v3867_v57 = vsel %vm3853_vm14, %v3829_v17, %v3357_v58  ;;  %v3387_v20 = vpop.permute.xlu2 %3386  ;;  %v3845_v3 = vsel %vm3815_vm13, %v3807_v54, %v7243_v15  ;;  %v3638_v55 = vsel %vm3625_vm8, %v6035_v59, %v8559_v56 }
 0x4d5   : > { %3376 = vrot.lane.b32.xlu1 %v3306_v11, %s4730_s18  ;;  %v7341_v0 = vsel %vm3891_vm15, %v3867_v57, %v3541_v12  ;;  %v3490_v58 = vsel %vm3441_vm7, %v3487_v36, %v3489_v18  ;;  %v3488_v17 = vsel %vm3441_vm7, %v3485_v27, %v3487_v36  ;;  %v3676_v29 = vsel %vm3663_vm9, %v3638_v55, %v8560_v30  ;;  %v8561_v57 = vld [vmem:[#allocation93_spill] sm:$0xff] }
 0x4d6   : > { %v3998_v24 = vrot.slane %v7341_v0, 1  ;;  %v3714_v33 = vsel %vm3701_vm10, %v3676_v29, %v8561_v57  ;;  %v8571_v0 = vmov 0.0   ;;  %v8575_v57 = vld [vmem:[#allocation72_spill] sm:$0xff] }
 0x4d7   : > { %v3389_v19 = vpop.permute.xlu1 %3388  ;;  %v3752_v59 = vsel %vm3739_vm11, %v3714_v33, %v8562_v26  ;;  %v8576_v26 = vld [vmem:[#allocation85_spill] sm:$0xff] }
 0x4d8   : > { %3560 = vrot.lane.b32.xlu0 %v3490_v58, %s4731_s19  ;;  %v4001_v51 = vsel %vm356_vm0, %v3998_v24, %v4000_v40  ;;  %v3883_v8 = vsel %vm3853_vm14, %v3845_v3, %v3389_v19  ;;  %v8558_v40 = vld [vmem:[#allocation162_spill] sm:$0xff]  ;;  %v8563_v19 = vld [vmem:[#allocation103_spill] sm:$0xff] }
 0x4d9   : > { %4555 = vmatpush.xpose.msk.msra.mxu0 %vm4046_vm1, %v4001_v51  ;;  %v3790_v58 = vsel %vm3777_vm12, %v3752_v59, %v8563_v19 }
 0x4da   : > { %v3573_v18 = vpop.permute.xlu0 %3572  ;;  %3344 = vrot.lane.b32.xlu2 %v3274_v25, %s4730_s18 }
 0x4db   : > { %v3921_v46 = vsel %vm3891_vm15, %v3883_v8, %v3573_v18  ;;  %v8564_v8 = vld [vmem:[#allocation89_spill] sm:$0xff] }
 0x4dc   : > { %v4030_v12 = vrot.slane %v3921_v46, 1  ;;  %v3087_v15 = vpop.permute.xlu2 %3086  ;;  %v8565_v18 = vrot.slane %v8564_v8, 4 }
 0x4dd   : > { %3076 = vrot.lane.b32.xlu1 %v7363_v6, %s4728_s16 }
 0x4de   : > { %v4033_v34 = vsel %vm356_vm0, %v4030_v12, %v4032_v52  ;;  %v8555_v52 = vld [vmem:[#allocation20_spill] sm:$0xff]  ;;  %v7428_v46 = vsel %vm2180_vm3, %v8565_v18, %v3002_v49  ;;  %v8580_v18 = vld [vmem:[#allocation87_spill] sm:$0xff] }
 0x4df   : > { %v3089_v5 = vpop.permute.xlu1 %3088  ;;  %4572 = vmatpush.xpose.msk.msra.mxu1 %vm4046_vm1, %v4033_v34  ;;  %v3269_v35 = vrot.slane %v8555_v52, 5  ;;  %v3453_v11 = vrot.slane %v8555_v52, 6  ;;  %v3636_v33 = vsel %vm3625_vm8, %v8555_v52, %v8575_v57  ;;  %v7538_v57 = vrot.slane %v8571_v0, 6 }
 0x4e0   : > { %3190 = vrot.lane.b32.xlu0 %v7230_v53, %s4729_s17  ;;  %v3692_v53 = vsel %vm3663_vm9, %v3654_v9, %v8556_v63  ;;  %v8567_v9 = vld [vmem:[#allocation154_spill] sm:$0xff] }
 0x4e1   : > { %v3730_v32 = vsel %vm3701_vm10, %v3692_v53, %v8557_v50  ;;  %v3272_v61 = vsel %vm3257_vm6, %v3269_v35, %v3271_v28  ;;  %v3456_v36 = vsel %vm3441_vm7, %v3453_v11, %v3455_v41  ;;  %v8566_v41 = vld [vmem:[#allocation155_spill] sm:$0xff]  ;;  %v8569_v50 = vld [vmem:[#allocation164_spill] sm:$0xff] }
 0x4e2   : > { %v3203_v1 = vpop.permute.xlu0 %3202  ;;  %3528 = vrot.lane.b32.xlu2 %v3458_v60, %s4731_s19  ;;  %v3768_v21 = vsel %vm3739_vm11, %v3730_v32, %v8558_v40  ;;  %v7461_v40 = vrot.slane %v8571_v0, 4 }
 0x4e3   : > { %v3806_v2 = vsel %vm3777_vm12, %v3768_v21, %v3089_v5  ;;  %v3653_v5 = vsel %vm3625_vm8, %v6575_v44, %v8566_v41 }
 0x4e4   : > { %v7376_v48 = vpop.permute.xlu2 %3168  ;;  %v3844_v16 = vsel %vm3815_vm13, %v3806_v2, %v3203_v1  ;;  %v4632_v2 = vpack.i.bf16 %v7461_v40, %v7461_v40 }
 0x4e5   : > { %3158 = vrot.lane.b32.xlu1 %v8554_v7, %s4729_s17  ;;  %v3882_v28 = vsel %vm3853_vm14, %v3844_v16, %v3387_v20  ;;  %v3691_v7 = vsel %vm3663_vm9, %v3653_v5, %v8567_v9  ;;  %v8574_v16 = vld [vmem:[#allocation75_spill] sm:$0xff] }
 0x4e7   : > { %v3171_v23 = vpop.permute.xlu1 %3170 }
 0x4e8   : > { %3342 = vrot.lane.b32.xlu0 %v3272_v61, %s4730_s18  ;;  %v3828_v3 = vsel %vm3815_vm13, %v3790_v58, %v3171_v23  ;;  %v8570_v23 = vld [vmem:[#allocation50_spill] sm:$0xff] }
 0x4ea   : > { %v3355_v37 = vpop.permute.xlu0 %3354  ;;  %3374 = vrot.lane.b32.xlu2 %v3304_v43, %s4730_s18 }
 0x4eb   : > { %v3866_v20 = vsel %vm3853_vm14, %v3828_v3, %v3355_v37  ;;  %v8579_v3 = vld [vmem:[#allocation64_spill] sm:$0xff] }
 0x4ec   : > { %v3569_v10 = vpop.permute.xlu2 %3568 }
 0x4ed   : > { %3558 = vrot.lane.b32.xlu1 %v3488_v17, %s4731_s19  ;;  %v3637_v17 = vsel %vm3625_vm8, %v8551_v38, %v8574_v16 }
 0x4ee   : > { %v3675_v59 = vsel %vm3663_vm9, %v3637_v17, %v8576_v26 }
 0x4ef   : > { %v3571_v54 = vpop.permute.xlu1 %3570 }
 0x4f0   : > { %v3920_v51 = vsel %vm3891_vm15, %v3882_v28, %v3571_v54  ;;  %3526 = vrot.lane.b32.xlu0 %v3456_v36, %s4731_s19  ;;  %v8577_v28 = vld [vmem:[#allocation98_spill] sm:$0xff]  ;;  %v8578_v36 = vld [vmem:[#allocation13_spill] sm:$0xff] }
 0x4f1   : > { %v4028_v25 = vrot.slane %v3920_v51, 1  ;;  %v3713_v38 = vsel %vm3701_vm10, %v3675_v59, %v8577_v28  ;;  %v3267_v19 = vrot.slane %v8578_v36, 5  ;;  %v7497_v51 = vrot.slane %v8571_v0, 5  ;;  %v8588_v28 = vld [vmem:[#allocation153_spill] sm:$0xff] }
 0x4f2   : > { %v3539_v34 = vpop.permute.xlu0 %3538  ;;  %3074 = vrot.lane.b32.xlu2 %v7428_v46, %s4728_s16  ;;  %v3451_v16 = vrot.slane %v8578_v36, 6  ;;  %v4642_v0 = vpack.i.bf16 %v7538_v57, %v7538_v57 }
 0x4f3   : > { %v4031_v60 = vsel %vm356_vm0, %v4028_v25, %v4030_v12  ;;  %v7438_v1 = vsel %vm3891_vm15, %v3866_v20, %v3539_v34  ;;  %v8568_v12 = vld [vmem:[#allocation160_spill] sm:$0xff]  ;;  %v8581_v34 = vld [vmem:[#allocation95_spill] sm:$0xff]  ;;  %v4637_v5 = vpack.i.bf16 %v7497_v51, %v7497_v51 }
 0x4f4   : > { %4573 = vmatpush.xpose.msk.msra.mxu1 %vm4046_vm1, %v4031_v60  ;;  %v3996_v49 = vrot.slane %v7438_v1, 1  ;;  %v7442_v31 = vpop.permute.xlu2 %3198  ;;  %v3729_v63 = vsel %vm3701_vm10, %v3691_v7, %v8568_v12  ;;  %v3751_v41 = vsel %vm3739_vm11, %v3713_v38, %v8581_v34  ;;  %v8582_v1 = vld [vmem:[#allocation101_spill] sm:$0xff] }
 0x4f5   : > { %3188 = vrot.lane.b32.xlu1 %v7285_v62, %s4729_s17  ;;  %v3767_v32 = vsel %vm3739_vm11, %v3729_v63, %v8569_v50  ;;  %v3789_v9 = vsel %vm3777_vm12, %v3751_v41, %v8582_v1  ;;  %v8584_v50 = vld [vmem:[#allocation137_spill] sm:$0xff]  ;;  %v8589_v41 = vld [vmem:[#allocation156_spill] sm:$0xff] }
 0x4f6   : > { %v3999_v44 = vsel %vm356_vm0, %v3996_v49, %v3998_v24  ;;  %v3805_v62 = vsel %vm3777_vm12, %v3767_v32, %v3087_v15  ;;  %v8572_v24 = vld [vmem:[#allocation54_spill] sm:$0xff]  ;;  %v8573_v15 = vld [vmem:[#allocation31_spill] sm:$0xff]  ;;  %v3827_v7 = vsel %vm3815_vm13, %v3789_v9, %v7376_v48  ;;  %v3652_v32 = vsel %vm3625_vm8, %v6567_v22, %v8584_v50  ;;  %v8590_v1 = vld [vmem:[#allocation21_spill] sm:$0xff] }
 0x4f7   : > { %v3201_v53 = vpop.permute.xlu1 %3200  ;;  %4556 = vmatpush.xpose.msk.msra.mxu0 %vm4046_vm1, %v3999_v44  ;;  %v8583_v44 = vld [vmem:[#allocation91_spill] sm:$0xff]  ;;  %v8591_v9 = vld [vmem:[#allocation145_spill] sm:$0xff] }
 0x4f8   : > { %3104 = vrot.lane.b32.xlu0 %v8570_v23, %s4728_s16  ;;  %v3843_v61 = vsel %vm3815_vm13, %v3805_v62, %v3201_v53 }
 0x4fa   : > { %v3385_v43 = vpop.permute.xlu0 %3384  ;;  %3102 = vrot.lane.b32.xlu2 %v8572_v24, %s4728_s16 }
 0x4fb   : > { %v3881_v21 = vsel %vm3853_vm14, %v3843_v61, %v3385_v43  ;;  %v8585_v61 = vld [vmem:[#allocation149_spill] sm:$0xff] }
 0x4fc   : > { %v7467_v37 = vsel %vm3891_vm15, %v3881_v21, %v3569_v10  ;;  %v3351_v56 = vpop.permute.xlu2 %3350  ;;  %v3299_v10 = vrot.slane %v6505_v39, 5  ;;  %v3690_v43 = vsel %vm3663_vm9, %v3652_v32, %v8585_v61  ;;  %v8594_v32 = vld [vmem:[#allocation15_spill] sm:$0xff] }
 0x4fd   : > { %3156 = vrot.lane.b32.xlu1 %v8573_v15, %s4729_s17  ;;  %v4026_v55 = vrot.slane %v7467_v37, 1  ;;  %v3651_v37 = vsel %vm3625_vm8, %v6505_v39, %v8591_v9 }
 0x4fe   : > { %v3302_v54 = vsel %vm3257_vm6, %v3299_v10, %v3301_v13  ;;  %v3270_v13 = vsel %vm3257_vm6, %v3267_v19, %v3269_v35  ;;  %v3483_v35 = vrot.slane %v6505_v39, 6 }
 0x4ff   : > { %v3353_v30 = vpop.permute.xlu1 %3352  ;;  %v4029_v29 = vsel %vm356_vm0, %v4026_v55, %v4028_v25  ;;  %v3674_v25 = vsel %vm3663_vm9, %v3636_v33, %v8579_v3 }
 0x500   : > { %4633 = vrot.lane.b32.xlu0 %v4632_v2, %s4729_s17  ;;  %4574 = vmatpush.xpose.msk.msra.mxu1 %vm4046_vm1, %v4029_v29  ;;  %v3712_v20 = vsel %vm3701_vm10, %v3674_v25, %v8580_v18  ;;  %v3865_v63 = vsel %vm3853_vm14, %v3827_v7, %v3353_v30  ;;  %v3486_v21 = vsel %vm3441_vm7, %v3483_v35, %v3485_v27  ;;  %v8586_v2 = vld [vmem:[#allocation157_spill] sm:$0xff]  ;;  %v8587_v30 = vld [vmem:[#allocation83_spill] sm:$0xff] }
 0x501   : > { %v3750_v12 = vsel %vm3739_vm11, %v3712_v20, %v8583_v44  ;;  %v3728_v15 = vsel %vm3701_vm10, %v3690_v43, %v8586_v2  ;;  %v3454_v27 = vsel %vm3441_vm7, %v3451_v16, %v3453_v11  ;;  %v8592_v44 = vld [vmem:[#allocation141_spill] sm:$0xff]  ;;  %v8597_v2 = vld [vmem:[#allocation76_spill] sm:$0xff] }
 0x502   : > { %v3085_v58 = vpop.permute.xlu0 %3084  ;;  %3372 = vrot.lane.b32.xlu2 %v3302_v54, %s4730_s18  ;;  %v3788_v29 = vsel %vm3777_vm12, %v3750_v12, %v8587_v30  ;;  %v3766_v38 = vsel %vm3739_vm11, %v3728_v15, %v8588_v28  ;;  %v3689_v12 = vsel %vm3663_vm9, %v3651_v37, %v8592_v44  ;;  %v8596_v43 = vld [vmem:[#allocation161_spill] sm:$0xff]  ;;  %v8606_v37 = vld [vmem:[#allocation144_spill] sm:$0xff] }
 0x503   : > { %v3804_v52 = vsel %vm3777_vm12, %v3766_v38, %v3085_v58 }
 0x504   : > { %v3535_v60 = vpop.permute.xlu2 %3534 }
 0x505   : > { %3340 = vrot.lane.b32.xlu1 %v3270_v13, %s4730_s18  ;;  %v3297_v13 = vrot.slane %v8552_v14, 5 }
 0x507   : > { %v3537_v53 = vpop.permute.xlu1 %3536 }
 0x508   : > { %v3903_v62 = vsel %vm3891_vm15, %v3865_v63, %v3537_v53  ;;  %4638 = vrot.lane.b32.xlu0 %v4637_v5, %s4730_s18  ;;  %v8593_v63 = vld [vmem:[#allocation159_spill] sm:$0xff] }
 0x509   : > { %v3994_v48 = vrot.slane %v3903_v62, 1  ;;  %v3727_v53 = vsel %vm3701_vm10, %v3689_v12, %v8593_v63  ;;  %v3265_v62 = vrot.slane %v8594_v32, 5  ;;  %v8607_v12 = vld [vmem:[#allocation152_spill] sm:$0xff]  ;;  %v3295_v63 = vrot.slane %v8564_v8, 5 }
 0x50a   : > { %v3167_v17 = vpop.permute.xlu0 %3166  ;;  %3556 = vrot.lane.b32.xlu2 %v3486_v21, %s4731_s19 }
 0x50b   : > { %v3997_v33 = vsel %vm356_vm0, %v3994_v48, %v3996_v49  ;;  %v3826_v22 = vsel %vm3815_vm13, %v3788_v29, %v3167_v17  ;;  %v8598_v17 = vld [vmem:[#allocation80_spill] sm:$0xff] }
 0x50c   : > { %4557 = vmatpush.xpose.msk.msra.mxu0 %vm4046_vm1, %v3997_v33  ;;  %v3864_v26 = vsel %vm3853_vm14, %v3826_v22, %v3351_v56  ;;  %v3381_v59 = vpop.permute.xlu2 %3380  ;;  %v3842_v56 = vsel %vm3815_vm13, %v3804_v52, %v7442_v31  ;;  %v8599_v29 = vld [vmem:[#allocation48_spill] sm:$0xff]  ;;  %v3449_v52 = vrot.slane %v8594_v32, 6 }
 0x50d   : > { %3524 = vrot.lane.b32.xlu1 %v3454_v27, %s4731_s19  ;;  %v7556_v49 = vsel %vm3891_vm15, %v3864_v26, %v3535_v60  ;;  %v8600_v33 = vrot.slane %v8599_v29, 5  ;;  %v8601_v26 = vld [vmem:[#allocation92_spill] sm:$0xff] }
 0x50e   : > { %v3992_v54 = vrot.slane %v7556_v49, 1 }
 0x50f   : > { %v3383_v3 = vpop.permute.xlu1 %3382  ;;  %v3328_v22 = vsel %vm3257_vm6, %v8600_v33, %v7497_v51 }
 0x510   : > { %4643 = vrot.lane.b32.xlu0 %v4642_v0, %s4731_s19  ;;  %v3995_v11 = vsel %vm356_vm0, %v3992_v54, %v3994_v48  ;;  %v3880_v25 = vsel %vm3853_vm14, %v3842_v56, %v3383_v3  ;;  %v3765_v48 = vsel %vm3739_vm11, %v3727_v53, %v8596_v43  ;;  %v8602_v3 = vld [vmem:[#allocation94_spill] sm:$0xff]  ;;  %v8608_v53 = vld [vmem:[#allocation19_spill] sm:$0xff] }
 0x511   : > { %4558 = vmatpush.xpose.msk.msra.mxu0 %vm4046_vm1, %v3995_v11 }
 0x512   : > { %v3567_v18 = vpop.permute.xlu0 %3566  ;;  %3186 = vrot.lane.b32.xlu2 %v7363_v6, %s4729_s17  ;;  %v3300_v6 = vsel %vm3257_vm6, %v3297_v13, %v3299_v10  ;;  %v3481_v10 = vrot.slane %v8552_v14, 6 }
 0x513   : > { %v3918_v58 = vsel %vm3891_vm15, %v3880_v25, %v3567_v18  ;;  %v3452_v18 = vsel %vm3441_vm7, %v3449_v52, %v3451_v16 }
 0x514   : > { %v4024_v20 = vrot.slane %v3918_v58, 1  ;;  %v7571_v34 = vpop.permute.xlu2 %3080  ;;  %v3484_v39 = vsel %vm3441_vm7, %v3481_v10, %v3483_v35 }
 0x515   : > { %3100 = vrot.lane.b32.xlu1 %v8589_v41, %s4728_s16  ;;  %v8603_v41 = vld [vmem:[#allocation136_spill] sm:$0xff] }
 0x516   : > { %v4027_v31 = vsel %vm356_vm0, %v4024_v20, %v4026_v55  ;;  %v3144_v55 = vsel %vm2180_vm3, %v8570_v23, %v7461_v40  ;;  %v3268_v23 = vsel %vm3257_vm6, %v3265_v62, %v3267_v19  ;;  %v8595_v40 = vld [vmem:[#allocation70_spill] sm:$0xff] }
 0x517   : > { %v3083_v5 = vpop.permute.xlu1 %3082  ;;  %4575 = vmatpush.xpose.msk.msra.mxu1 %vm4046_vm1, %v4027_v31  ;;  %v3635_v61 = vsel %vm3625_vm8, %v8578_v36, %v8595_v40  ;;  %v3650_v31 = vsel %vm3625_vm8, %v8552_v14, %v8603_v41  ;;  %v8604_v36 = vrot.slane %v8599_v29, 6  ;;  %v3298_v40 = vsel %vm3257_vm6, %v3295_v63, %v3297_v13  ;;  %v8619_v14 = vld [vmem:[#allocation84_spill] sm:$0xff] }
 0x518   : > { %3370 = vrot.lane.b32.xlu0 %v3300_v6, %s4730_s18  ;;  %v3673_v35 = vsel %vm3663_vm9, %v3635_v61, %v8597_v2  ;;  %v3803_v15 = vsel %vm3777_vm12, %v3765_v48, %v3083_v5  ;;  %v8610_v48 = vld [vmem:[#allocation46_spill] sm:$0xff]  ;;  %v8611_v2 = vld [vmem:[#allocation3_spill] sm:$0xff] }
 0x519   : > { %v3711_v30 = vsel %vm3701_vm10, %v3673_v35, %v8598_v17  ;;  %v3512_v16 = vsel %vm3441_vm7, %v8604_v36, %v7538_v57  ;;  %v3263_v35 = vrot.slane %v8611_v2, 5  ;;  %v8620_v36 = vld [vmem:[#allocation131_spill] sm:$0xff] }
 0x51a   : > { %v3197_v60 = vpop.permute.xlu0 %3196  ;;  %3154 = vrot.lane.b32.xlu2 %v8590_v1, %s4729_s17  ;;  %v3749_v0 = vsel %vm3739_vm11, %v3711_v30, %v8601_v26  ;;  %v8605_v1 = vld [vmem:[#allocation138_spill] sm:$0xff]  ;;  %v8613_v30 = vld [vmem:[#allocation81_spill] sm:$0xff]  ;;  %v8615_v26 = vld [vmem:[#allocation67_spill] sm:$0xff] }
 0x51b   : > { %v3841_v19 = vsel %vm3815_vm13, %v3803_v15, %v3197_v60  ;;  %v3787_v11 = vsel %vm3777_vm12, %v3749_v0, %v8602_v3  ;;  %v3688_v9 = vsel %vm3663_vm9, %v3650_v31, %v8605_v1  ;;  %v8612_v15 = vld [vmem:[#allocation58_spill] sm:$0xff]  ;;  %v3266_v29 = vsel %vm3257_vm6, %v3263_v35, %v3265_v62  ;;  %v8616_v3 = vld [vmem:[#allocation51_spill] sm:$0xff] }
 0x51c   : > { %v7594_v7 = vpop.permute.xlu2 %3162  ;;  %v3879_v28 = vsel %vm3853_vm14, %v3841_v19, %v3381_v59 }
 0x51d   : > { %3214 = vrot.lane.b32.xlu1 %v3144_v55, %s4729_s17  ;;  %v3726_v55 = vsel %vm3701_vm10, %v3688_v9, %v8606_v37  ;;  %v8621_v9 = vld [vmem:[#allocation71_spill] sm:$0xff] }
 0x51e   : > { %v3764_v57 = vsel %vm3739_vm11, %v3726_v55, %v8607_v12  ;;  %v8623_v37 = vld [vmem:[#allocation139_spill] sm:$0xff]  ;;  %v8624_v12 = vld [vmem:[#allocation148_spill] sm:$0xff] }
 0x51f   : > { %v3165_v50 = vpop.permute.xlu1 %3164 }
 0x520   : > { %3554 = vrot.lane.b32.xlu0 %v3484_v39, %s4731_s19  ;;  %v3825_v51 = vsel %vm3815_vm13, %v3787_v11, %v3165_v50  ;;  %v3802_v50 = vsel %vm3777_vm12, %v3764_v57, %v7571_v34  ;;  %v8609_v39 = vld [vmem:[#allocation158_spill] sm:$0xff]  ;;  %v3634_v34 = vsel %vm3625_vm8, %v8594_v32, %v8610_v48  ;;  %v3479_v32 = vrot.slane %v8564_v8, 6 }
 0x521   : > { %v3672_v17 = vsel %vm3663_vm9, %v3634_v34, %v8612_v15  ;;  %v8627_v48 = vld [vmem:[#allocation14_spill] sm:$0xff] }
 0x522   : > { %v3349_v21 = vpop.permute.xlu0 %3348  ;;  %3338 = vrot.lane.b32.xlu2 %v3268_v23, %s4730_s18  ;;  %v3710_v13 = vsel %vm3701_vm10, %v3672_v17, %v8613_v30  ;;  %v3482_v62 = vsel %vm3441_vm7, %v3479_v32, %v3481_v10  ;;  %v8628_v17 = vld [vmem:[#allocation90_spill] sm:$0xff] }
 0x523   : > { %v3863_v59 = vsel %vm3853_vm14, %v3825_v51, %v3349_v21  ;;  %v3748_v0 = vsel %vm3739_vm11, %v3710_v13, %v8615_v26  ;;  %v3293_v30 = vrot.slane %v8628_v17, 5 }
 0x524   : > { %v3563_v27 = vpop.permute.xlu2 %3562 }
 0x525   : > { %3398 = vrot.lane.b32.xlu1 %v3328_v22, %s4730_s18  ;;  %v8614_v22 = vld [vmem:[#allocation60_spill] sm:$0xff] }
 0x527   : > { %v3565_v38 = vpop.permute.xlu1 %3564 }
 0x528   : > { %v3917_v56 = vsel %vm3891_vm15, %v3879_v28, %v3565_v38  ;;  %3184 = vrot.lane.b32.xlu0 %v7428_v46, %s4729_s17 }
 0x529   : > { %v4022_v25 = vrot.slane %v3917_v56, 1  ;;  %v8617_v56 = vld [vmem:[#allocation79_spill] sm:$0xff] }
 0x52a   : > { %v3533_v58 = vpop.permute.xlu0 %3532  ;;  %3522 = vrot.lane.b32.xlu2 %v3452_v18, %s4731_s19  ;;  %v3786_v51 = vsel %vm3777_vm12, %v3748_v0, %v8617_v56  ;;  %v8618_v18 = vld [vmem:[#allocation74_spill] sm:$0xff] }
 0x52b   : > { %v4025_v5 = vsel %vm356_vm0, %v4022_v25, %v4024_v20  ;;  %v3901_v46 = vsel %vm3891_vm15, %v3863_v59, %v3533_v58 }
 0x52c   : > { %4576 = vmatpush.xpose.msk.msra.mxu1 %vm4046_vm1, %v4025_v5  ;;  %v3990_v6 = vrot.slane %v3901_v46, 1  ;;  %v7652_v60 = vpop.permute.xlu2 %3192 }
 0x52d   : > { %3582 = vrot.lane.b32.xlu1 %v3512_v16, %s4731_s19  ;;  %v3649_v16 = vsel %vm3625_vm8, %v8564_v8, %v8620_v36  ;;  %v8638_v36 = vld [vmem:[#allocation78_spill] sm:$0xff] }
 0x52e   : > { %v3993_v20 = vsel %vm356_vm0, %v3990_v6, %v3992_v54  ;;  %v3687_v55 = vsel %vm3663_vm9, %v3649_v16, %v8623_v37  ;;  %v8639_v16 = vrot.slane %v8638_v36, 5  ;;  %v8641_v37 = vld [vmem:[#allocation56_spill] sm:$0xff] }
 0x52f   : > { %v3195_v44 = vpop.permute.xlu1 %3194  ;;  %4559 = vmatpush.xpose.msk.msra.mxu0 %vm4046_vm1, %v3993_v20  ;;  %v8622_v20 = vld [vmem:[#allocation69_spill] sm:$0xff]  ;;  %v3725_v57 = vsel %vm3701_vm10, %v3687_v55, %v8624_v12 }
 0x530   : > { %3152 = vrot.lane.b32.xlu0 %v8608_v53, %s4729_s17  ;;  %v3840_v49 = vsel %vm3815_vm13, %v3802_v50, %v3195_v44 }
 0x532   : > { %v3379_v54 = vpop.permute.xlu0 %3378  ;;  %3098 = vrot.lane.b32.xlu2 %v8609_v39, %s4728_s16  ;;  %v8626_v39 = vld [vmem:[#allocation99_spill] sm:$0xff] }
 0x533   : > { %v3878_v23 = vsel %vm3853_vm14, %v3840_v49, %v3379_v54  ;;  %v8625_v49 = vld [vmem:[#allocation147_spill] sm:$0xff] }
 0x534   : > { %v7680_v61 = vsel %vm3891_vm15, %v3878_v23, %v3563_v27  ;;  %v3345_v43 = vpop.permute.xlu2 %3344  ;;  %v3633_v27 = vsel %vm3625_vm8, %v8611_v2, %v8614_v22  ;;  %v3763_v54 = vsel %vm3739_vm11, %v3725_v57, %v8625_v49 }
 0x535   : > { %3368 = vrot.lane.b32.xlu1 %v3298_v40, %s4730_s18  ;;  %v4020_v21 = vrot.slane %v7680_v61, 1  ;;  %v3671_v11 = vsel %vm3663_vm9, %v3633_v27, %v8616_v3 }
 0x536   : > { %v3709_v59 = vsel %vm3701_vm10, %v3671_v11, %v8618_v18  ;;  %v8631_v11 = vld [vmem:[#allocation5_spill] sm:$0xff]  ;;  %v8633_v18 = vld [vmem:[#allocation143_spill] sm:$0xff] }
 0x537   : > { %v3347_v19 = vpop.permute.xlu1 %3346  ;;  %v4023_v33 = vsel %vm356_vm0, %v4020_v21, %v4022_v25  ;;  %v3447_v25 = vrot.slane %v8611_v2, 6  ;;  %v3747_v10 = vsel %vm3739_vm11, %v3709_v59, %v8619_v14  ;;  %v8635_v14 = vld [vmem:[#allocation142_spill] sm:$0xff] }
 0x538   : > { %3336 = vrot.lane.b32.xlu0 %v3266_v29, %s4730_s18  ;;  %4577 = vmatpush.xpose.msk.msra.mxu1 %vm4046_vm1, %v4023_v33  ;;  %v3296_v33 = vsel %vm3257_vm6, %v3293_v30, %v3295_v63 }
 0x539   : > { %v3450_v31 = vsel %vm3441_vm7, %v3447_v25, %v3449_v52 }
 0x53a   : > { %v3079_v28 = vpop.permute.xlu0 %3078  ;;  %3212 = vrot.lane.b32.xlu2 %v8572_v24, %s4729_s17  ;;  %v3824_v24 = vsel %vm3815_vm13, %v3786_v51, %v7594_v7  ;;  %v3785_v7 = vsel %vm3777_vm12, %v3747_v10, %v8621_v9  ;;  %v8632_v51 = vld [vmem:[#allocation122_spill] sm:$0xff] }
 0x53b   : > { %v3862_v58 = vsel %vm3853_vm14, %v3824_v24, %v3347_v19  ;;  %v8629_v19 = vld [vmem:[#allocation73_spill] sm:$0xff]  ;;  %v8634_v24 = vld [vmem:[#allocation16_spill] sm:$0xff] }
 0x53c   : > { %v3529_v38 = vpop.permute.xlu2 %3528 }
 0x53d   : > { %3552 = vrot.lane.b32.xlu1 %v3482_v62, %s4731_s19  ;;  %v8630_v62 = vld [vmem:[#allocation2_spill] sm:$0xff] }
 0x53e   : > { %v3445_v63 = vrot.slane %v8630_v62, 6 }
 0x53f   : > { %v3531_v41 = vpop.permute.xlu1 %3530 }
 0x540   : > { %v3900_v5 = vsel %vm3891_vm15, %v3862_v58, %v3531_v41  ;;  %3520 = vrot.lane.b32.xlu0 %v3450_v31, %s4731_s19  ;;  %v3448_v56 = vsel %vm3441_vm7, %v3445_v63, %v3447_v25  ;;  %v8636_v25 = vld [vmem:[#allocation104_spill] sm:$0xff]  ;;  %v8637_v31 = vld [vmem:[#allocation43_spill] sm:$0xff] }
 0x541   : > { %v3988_v46 = vrot.slane %v3900_v5, 1  ;;  %v3632_v5 = vsel %vm3625_vm8, %v8630_v62, %v8637_v31 }
 0x542   : > { %v3161_v1 = vpop.permute.xlu0 %3160  ;;  %3396 = vrot.lane.b32.xlu2 %v8622_v20, %s4730_s18 }
 0x543   : > { %v3991_v52 = vsel %vm356_vm0, %v3988_v46, %v3990_v6  ;;  %v3823_v44 = vsel %vm3815_vm13, %v3785_v7, %v3161_v1  ;;  %v3801_v6 = vsel %vm3777_vm12, %v3763_v54, %v3079_v28  ;;  %v3294_v1 = vsel %vm3257_vm6, %v8639_v16, %v3293_v30  ;;  %v8640_v7 = vld [vmem:[#allocation47_spill] sm:$0xff]  ;;  %v8644_v54 = vld [vmem:[#allocation10_spill] sm:$0xff]  ;;  %v8653_v16 = vld [vmem:[#allocation33_spill] sm:$0xff] }
 0x544   : > { %4560 = vmatpush.xpose.msk.msra.mxu0 %vm4046_vm1, %v3991_v52  ;;  %v3861_v53 = vsel %vm3853_vm14, %v3823_v44, %v3345_v43  ;;  %v3375_v50 = vpop.permute.xlu2 %3374  ;;  %v3839_v34 = vsel %vm3815_vm13, %v3801_v6, %v7652_v60  ;;  %v3477_v60 = vrot.slane %v8628_v17, 6  ;;  %v3670_v20 = vsel %vm3663_vm9, %v3632_v5, %v8640_v7  ;;  %v8642_v52 = vld [vmem:[#allocation63_spill] sm:$0xff]  ;;  %v8645_v6 = vld [vmem:[#allocation68_spill] sm:$0xff]  ;;  %v8652_v5 = vld [vmem:[#allocation37_spill] sm:$0xff] }
 0x545   : > { %3182 = vrot.lane.b32.xlu1 %v8626_v39, %s4729_s17  ;;  %v7745_v23 = vsel %vm3891_vm15, %v3861_v53, %v3529_v38  ;;  %v3261_v38 = vrot.slane %v8630_v62, 5  ;;  %v3708_v55 = vsel %vm3701_vm10, %v3670_v20, %v8641_v37  ;;  %v8643_v53 = vrot.slane %v8638_v36, 6  ;;  %v8655_v20 = vld [vmem:[#allocation172_spill] sm:$0xff] }
 0x546   : > { %v3986_v40 = vrot.slane %v7745_v23, 1  ;;  %v3480_v28 = vsel %vm3441_vm7, %v3477_v60, %v3479_v32  ;;  %v3746_v44 = vsel %vm3739_vm11, %v3708_v55, %v8642_v52  ;;  %v3259_v39 = vrot.slane %v8644_v54, 5  ;;  %v8656_v37 = vld [vmem:[#allocation140_spill] sm:$0xff]  ;;  %v8657_v52 = vld [vmem:[#allocation65_spill] sm:$0xff] }
 0x547   : > { %v3377_v61 = vpop.permute.xlu1 %3376  ;;  %v3264_v8 = vsel %vm3257_vm6, %v3261_v38, %v3263_v35  ;;  %v3478_v49 = vsel %vm3441_vm7, %v8643_v53, %v3477_v60  ;;  %v8647_v60 = vld [vmem:[#allocation129_spill] sm:$0xff]  ;;  %v3662_v55 = vsel %vm3625_vm8, %v8656_v37, %v8655_v20 }
 0x548   : > { %3150 = vrot.lane.b32.xlu0 %v8627_v48, %s4729_s17  ;;  %v3989_v43 = vsel %vm356_vm0, %v3986_v40, %v3988_v46  ;;  %v3877_v15 = vsel %vm3853_vm14, %v3839_v34, %v3377_v61  ;;  %v3784_v61 = vsel %vm3777_vm12, %v3746_v44, %v8645_v6  ;;  %v8661_v6 = vld [vmem:[#allocation127_spill] sm:$0xff] }
 0x549   : > { %4561 = vmatpush.xpose.msk.msra.mxu0 %vm4046_vm1, %v3989_v43  ;;  %v8646_v43 = vld [vmem:[#allocation4_spill] sm:$0xff] }
 0x54a   : > { %v3561_v13 = vpop.permute.xlu0 %3560  ;;  %3580 = vrot.lane.b32.xlu2 %v8629_v19, %s4731_s19  ;;  %v3647_v34 = vsel %vm3625_vm8, %v8638_v36, %v8646_v43 }
 0x54b   : > { %v3915_v29 = vsel %vm3891_vm15, %v3877_v15, %v3561_v13  ;;  %v3443_v13 = vrot.slane %v8644_v54, 6 }
 0x54c   : > { %v4018_v22 = vrot.slane %v3915_v29, 1  ;;  %v3075_v27 = vpop.permute.xlu2 %3074 }
 0x54d   : > { %3366 = vrot.lane.b32.xlu1 %v3296_v33, %s4730_s18 }
 0x54e   : > { %v4021_v26 = vsel %vm356_vm0, %v4018_v22, %v4020_v21  ;;  %v3648_v21 = vsel %vm3625_vm8, %v8628_v17, %v8631_v11  ;;  %v3262_v17 = vsel %vm3257_vm6, %v3259_v39, %v3261_v38  ;;  %v8648_v38 = vld [vmem:[#allocation134_spill] sm:$0xff] }
 0x54f   : > { %v3077_v0 = vpop.permute.xlu1 %3076  ;;  %4578 = vmatpush.xpose.msk.msra.mxu1 %vm4046_vm1, %v4021_v26  ;;  %v3686_v2 = vsel %vm3663_vm9, %v3648_v21, %v8632_v51  ;;  %v3685_v26 = vsel %vm3663_vm9, %v3647_v34, %v8647_v60  ;;  %v8650_v11 = vld [vmem:[#allocation146_spill] sm:$0xff]  ;;  %v8663_v34 = vld [vmem:[#allocation59_spill] sm:$0xff] }
 0x550   : > { %3550 = vrot.lane.b32.xlu0 %v3480_v28, %s4731_s19  ;;  %v3724_v35 = vsel %vm3701_vm10, %v3686_v2, %v8633_v18 }
 0x551   : > { %v3762_v10 = vsel %vm3739_vm11, %v3724_v35, %v8635_v14 }
 0x552   : > { %v3191_v3 = vpop.permute.xlu0 %3190  ;;  %3334 = vrot.lane.b32.xlu2 %v3264_v8, %s4730_s18  ;;  %v3800_v41 = vsel %vm3777_vm12, %v3762_v10, %v3077_v0  ;;  %v3446_v0 = vsel %vm3441_vm7, %v3443_v13, %v3445_v63  ;;  %v3723_v8 = vsel %vm3701_vm10, %v3685_v26, %v8648_v38  ;;  %v8667_v38 = vld [vmem:[#allocation53_spill] sm:$0xff] }
 0x553   : > { %v3838_v46 = vsel %vm3815_vm13, %v3800_v41, %v3191_v3  ;;  %v8649_v3 = vld [vmem:[#allocation11_spill] sm:$0xff]  ;;  %v3761_v21 = vsel %vm3739_vm11, %v3723_v8, %v8650_v11 }
 0x554   : > { %v7781_v32 = vpop.permute.xlu2 %3102  ;;  %v3876_v12 = vsel %vm3853_vm14, %v3838_v46, %v3375_v50  ;;  %v3799_v63 = vsel %vm3777_vm12, %v3761_v21, %v3075_v27  ;;  %v3631_v46 = vsel %vm3625_vm8, %v8644_v54, %v8652_v5  ;;  %v8669_v11 = vld [vmem:[#allocation179_spill] sm:$0xff]  ;;  %v8671_v5 = vld [vmem:[#allocation44_spill] sm:$0xff] }
 0x555   : > { %3518 = vrot.lane.b32.xlu1 %v3448_v56, %s4731_s19 }
 0x557   : > { %v3159_v59 = vpop.permute.xlu1 %3158 }
 0x558   : > { %3148 = vrot.lane.b32.xlu0 %v8634_v24, %s4729_s17  ;;  %v3822_v50 = vsel %vm3815_vm13, %v3784_v61, %v3159_v59  ;;  %v3442_v59 = vrot.slane %v8649_v3, 6 }
 0x55a   : > { %v3343_v58 = vpop.permute.xlu0 %3342  ;;  %3180 = vrot.lane.b32.xlu2 %v8636_v25, %s4729_s17  ;;  %v3444_v14 = vsel %vm3441_vm7, %v3442_v59, %v3443_v13  ;;  %vm4297_vm7 = vcmask 744448  }
 0x55b   : > { %v3860_v30 = vsel %vm3853_vm14, %v3822_v50, %v3343_v58 }
 0x55c   : > { %v3373_v9 = vpop.permute.xlu2 %3372 }
 0x55d   : > { %3364 = vrot.lane.b32.xlu1 %v3294_v1, %s4730_s18  ;;  %v3630_v1 = vsel %vm3625_vm8, %v8649_v3, %v8653_v16 }
 0x55f   : > { %v3559_v57 = vpop.permute.xlu1 %3558 }
 0x560   : > { %v3914_v48 = vsel %vm3891_vm15, %v3876_v12, %v3559_v57  ;;  %3548 = vrot.lane.b32.xlu0 %v3478_v49, %s4731_s19  ;;  %v8658_v12 = vld [vmem:[#allocation176_spill] sm:$0xff]  ;;  %v8659_v49 = vld [vmem:[#allocation25_spill] sm:$0xff] }
 0x561   : > { %v4016_v15 = vrot.slane %v3914_v48, 1  ;;  %v3700_v57 = vsel %vm3663_vm9, %v3662_v55, %v8658_v12  ;;  %v3668_v54 = vsel %vm3663_vm9, %v3630_v1, %v8659_v49  ;;  %v8662_v48 = vld [vmem:[#allocation49_spill] sm:$0xff]  ;;  %v8672_v49 = vld [vmem:[#allocation112_spill] sm:$0xff] }
 0x562   : > { %v3527_v19 = vpop.permute.xlu0 %3526  ;;  %3332 = vrot.lane.b32.xlu2 %v3262_v17, %s4730_s18  ;;  %v3706_v43 = vsel %vm3701_vm10, %v3668_v54, %v8662_v48  ;;  %v8673_v54 = vld [vmem:[#allocation77_spill] sm:$0xff] }
 0x563   : > { %v4019_v29 = vsel %vm356_vm0, %v4016_v15, %v4018_v22  ;;  %v7828_v33 = vsel %vm3891_vm15, %v3860_v30, %v3527_v19  ;;  %v3258_v22 = vrot.slane %v8649_v3, 5  ;;  %v8665_v30 = vld [vmem:[#allocation177_spill] sm:$0xff]  ;;  %v3744_v8 = vsel %vm3739_vm11, %v3706_v43, %v8667_v38  ;;  %v8668_v3 = vld [vmem:[#allocation174_spill] sm:$0xff]  ;;  %v8675_v43 = vld [vmem:[#allocation132_spill] sm:$0xff] }
 0x564   : > { %4579 = vmatpush.xpose.msk.msra.mxu1 %vm4046_vm1, %v4019_v29  ;;  %v3984_v28 = vrot.slane %v7828_v33, 1  ;;  %v3557_v62 = vpop.permute.xlu2 %3556  ;;  %v8666_v29 = vld [vmem:[#allocation66_spill] sm:$0xff] }
 0x565   : > { %3516 = vrot.lane.b32.xlu1 %v3446_v0, %s4731_s19  ;;  %v3260_v2 = vsel %vm3257_vm6, %v3258_v22, %v3259_v39  ;;  %v8660_v39 = vld [vmem:[#allocation173_spill] sm:$0xff]  ;;  %vm4285_vm6 = vcmask 752640  }
 0x566   : > { %v3987_v56 = vsel %vm356_vm0, %v3984_v28, %v3986_v40  ;;  %v8651_v40 = vld [vmem:[#allocation12_spill] sm:$0xff]  ;;  %v3661_v61 = vsel %vm3625_vm8, %v8661_v6, %v8660_v39  ;;  %v3646_v39 = vsel %vm3625_vm8, %v8673_v54, %v8672_v49 }
 0x567   : > { %v3189_v51 = vpop.permute.xlu1 %3188  ;;  %4562 = vmatpush.xpose.msk.msra.mxu0 %vm4046_vm1, %v3987_v56  ;;  %v3699_v13 = vsel %vm3663_vm9, %v3661_v61, %v8665_v30  ;;  %v8674_v61 = vld [vmem:[#allocation116_spill] sm:$0xff] }
 0x568   : > { %v3837_v18 = vsel %vm3815_vm13, %v3799_v63, %v3189_v51  ;;  %3330 = vrot.lane.b32.xlu0 %v3260_v2, %s4730_s18  ;;  %v3737_v21 = vsel %vm3701_vm10, %v3699_v13, %v8669_v11  ;;  %v8670_v51 = vld [vmem:[#allocation178_spill] sm:$0xff]  ;;  %v3684_v48 = vsel %vm3663_vm9, %v3646_v39, %v8674_v61  ;;  %v8677_v13 = vld [vmem:[#allocation133_spill] sm:$0xff]  ;;  %v8691_v61 = vld [vmem:[#allocation7_spill] sm:$0xff] }
 0x569   : > { %v3875_v35 = vsel %vm3853_vm14, %v3837_v18, %v3373_v9  ;;  %v8654_v9 = vld [vmem:[#allocation45_spill] sm:$0xff]  ;;  %v3775_v2 = vsel %vm3739_vm11, %v3737_v21, %v8670_v51 }
 0x56a   : > { %v3105_v23 = vpop.permute.xlu0 %3104  ;;  %v7854_v24 = vsel %vm3891_vm15, %v3875_v35, %v3557_v62  ;;  %3146 = vrot.lane.b32.xlu2 %v8651_v40, %s4729_s17  ;;  %v3669_v7 = vsel %vm3663_vm9, %v3631_v46, %v8654_v9  ;;  %v3813_v40 = vsel %vm3777_vm12, %v3775_v2, %v7781_v32  ;;  %v3782_v46 = vsel %vm3777_vm12, %v3744_v8, %v8671_v5 }
 0x56b   : > { %v4014_v27 = vrot.slane %v7854_v24, 1  ;;  %v3707_v44 = vsel %vm3701_vm10, %v3669_v7, %v8657_v52 }
 0x56c   : > { %v7860_v10 = vpop.permute.xlu2 %3186  ;;  %v3745_v50 = vsel %vm3739_vm11, %v3707_v44, %v8663_v34  ;;  %v3722_v34 = vsel %vm3701_vm10, %v3684_v48, %v8675_v43  ;;  %v8692_v43 = vld [vmem:[#allocation114_spill] sm:$0xff] }
 0x56d   : > { %3514 = vrot.lane.b32.xlu1 %v3444_v14, %s4731_s19  ;;  %v4017_v58 = vsel %vm356_vm0, %v4014_v27, %v4016_v15  ;;  %v8664_v15 = vld [vmem:[#allocation171_spill] sm:$0xff]  ;;  %v3783_v60 = vsel %vm3777_vm12, %v3745_v50, %v8666_v29  ;;  %s4602_s19 = smul.u32 12, %s8729_s25 }
 0x56e   : > { %4580 = vmatpush.xpose.msk.msra.mxu1 %vm4046_vm1, %v4017_v58  ;;  %v3738_v17 = vsel %vm3701_vm10, %v3700_v57, %v8664_v15  ;;  %v8676_v15 = vld [vmem:[#allocation125_spill] sm:$0xff] }
 0x56f   : > { %v3157_v25 = vpop.permute.xlu1 %3156  ;;  %v3776_v22 = vsel %vm3739_vm11, %v3738_v17, %v8668_v3  ;;  %v3760_v17 = vsel %vm3739_vm11, %v3722_v34, %v8676_v15  ;;  %v8678_v3 = vld [vmem:[#allocation168_spill] sm:$0xff]  ;;  %s298_s22 = scalar_lea.vmem %s8214_s7, %s4602_s19 }
 0x570   : > { %v3821_v26 = vsel %vm3815_vm13, %v3783_v60, %v3157_v25  ;;  %v3814_v14 = vsel %vm3777_vm12, %v3776_v22, %v3105_v23  ;;  %v8679_v22 = vld [vmem:[#allocation128_spill] sm:$0xff] }
 0x571   : > { %v3660_v11 = vsel %vm3625_vm8, %v8679_v22, %v8678_v3  ;;  %v8698_v3 = vld [vmem:[#allocation126_spill] sm:$0xff] }
 0x572   : > { %v4634_v41 = vpop.permute.xlu0 %4633 }
 0x573   : > { %v4636_v0 = vunpack.i.h.bf16 %v4634_v41  ;;  %v4635_v62 = vunpack.i.l.bf16 %v4634_v41 }
 0x574   : > { %v3155_v31 = vpop.permute.xlu2 %3154 }
 0x575   : > { %v3851_v25 = vsel %vm3815_vm13, %v3813_v40, %v4635_v62  ;;  %v3852_v41 = vsel %vm3815_vm13, %v3814_v14, %v4636_v0  ;;  %v3820_v16 = vsel %vm3815_vm13, %v3782_v46, %v3155_v31 }
 0x577   : > { %v3341_v36 = vpop.permute.xlu1 %3340 }
 0x578   : > { %v3859_v56 = vsel %vm3853_vm14, %v3821_v26, %v3341_v36 }
 0x57a   : > { %v4639_v53 = vpop.permute.xlu0 %4638 }
 0x57b   : > { %v4641_v35 = vunpack.i.h.bf16 %v4639_v53  ;;  %v4640_v59 = vunpack.i.l.bf16 %v4639_v53 }
 0x57c   : > { %v3339_v19 = vpop.permute.xlu2 %3338 }
 0x57d   : > { %v3889_v32 = vsel %vm3853_vm14, %v3851_v25, %v4640_v59  ;;  %v3890_v23 = vsel %vm3853_vm14, %v3852_v41, %v4641_v35  ;;  %v3858_v20 = vsel %vm3853_vm14, %v3820_v16, %v3339_v19  ;;  %v3798_v19 = vsel %vm3777_vm12, %v3760_v17, %v8677_v13  ;;  %v8683_v35 = vld [vmem:[#allocation124_spill] sm:$0xff]  ;;  %v8684_v59 = vld [vmem:[#allocation181_spill] sm:$0xff]  ;;  %v8694_v17 = vld [vmem:[#allocation135_spill] sm:$0xff] }
 0x57e   : > { %v3836_v29 = vsel %vm3815_vm13, %v3798_v19, %v7860_v10  ;;  %v8685_v25 = vld [vmem:[#allocation169_spill] sm:$0xff]  ;;  %v8695_v19 = vld [vmem:[#allocation35_spill] sm:$0xff] }
 0x57f   : > { %v3525_v63 = vpop.permute.xlu1 %3524 }
 0x580   : > { %v3897_v18 = vsel %vm3891_vm15, %v3859_v56, %v3525_v63  ;;  %v8680_v56 = vld [vmem:[#allocation167_spill] sm:$0xff]  ;;  %v8681_v63 = vld [vmem:[#allocation180_spill] sm:$0xff] }
 0x581   : > { %v3982_v58 = vrot.slane %v3897_v18, 1  ;;  %v3698_v10 = vsel %vm3663_vm9, %v3660_v11, %v8680_v56  ;;  %v8682_v18 = vld [vmem:[#allocation170_spill] sm:$0xff] }
 0x582   : > { %v4644_v36 = vpop.permute.xlu0 %4643  ;;  %v3736_v51 = vsel %vm3701_vm10, %v3698_v10, %v8681_v63  ;;  %v3659_v24 = vsel %vm3625_vm8, %v8683_v35, %v8682_v18  ;;  %v8699_v10 = vld [vmem:[#allocation57_spill] sm:$0xff] }
 0x583   : > { %v3985_v1 = vsel %vm356_vm0, %v3982_v58, %v3984_v28  ;;  %v4646_v9 = vunpack.i.h.bf16 %v4644_v36  ;;  %v4645_v7 = vunpack.i.l.bf16 %v4644_v36  ;;  %v3697_v41 = vsel %vm3663_vm9, %v3659_v24, %v8685_v25  ;;  %v8686_v36 = vld [vmem:[#allocation175_spill] sm:$0xff]  ;;  %v8700_v25 = vld [vmem:[#allocation109_spill] sm:$0xff] }
 0x584   : > { %4563 = vmatpush.xpose.msk.msra.mxu0 %vm4046_vm1, %v3985_v1  ;;  %v3523_v37 = vpop.permute.xlu2 %3522  ;;  %v3735_v16 = vsel %vm3701_vm10, %v3697_v41, %v8686_v36  ;;  %v8701_v41 = vld [vmem:[#allocation62_spill] sm:$0xff]  ;;  %v8703_v36 = vld [vmem:[#allocation9_spill] sm:$0xff] }
 0x585   : > { %v3927_v55 = vsel %vm3891_vm15, %v3889_v32, %v4645_v7  ;;  %v3928_v52 = vsel %vm3891_vm15, %v3890_v23, %v4646_v9  ;;  %v7926_v31 = vsel %vm3891_vm15, %v3858_v20, %v3523_v37  ;;  %v8687_v9 = vld [vmem:[#allocation182_spill] sm:$0xff] }
 0x586   : > { %v4042_v33 = vrot.slane %v3927_v55, 1  ;;  %v4044_v28 = vrot.slane %v3928_v52, 1  ;;  %v3980_v44 = vrot.slane %v7926_v31, 1  ;;  %v3773_v7 = vsel %vm3739_vm11, %v3735_v16, %v8687_v9  ;;  %v8704_v16 = vld [vmem:[#allocation113_spill] sm:$0xff] }
 0x587   : > { %v3101_v12 = vpop.permute.xlu1 %3100 }
 0x588   : > { %v4045_v57 = vsel %vm356_vm0, %v4042_v33, %v4044_v28  ;;  %v3983_v53 = vsel %vm356_vm0, %v3980_v44, %v3982_v58 }
 0x589   : > { %4587 = vmatpush.xpose.msk.msra.mxu2 %vm4046_vm1, %v4045_v57  ;;  %4564 = vmatpush.xpose.msk.msra.mxu0 %vm4046_vm1, %v3983_v53  ;;  %v8689_v57 = vld [vmem:[#allocation61_spill] sm:$0xff] }
 0x58a   : > { %v3371_v6 = vpop.permute.xlu0 %3370 }
 0x58b   : > { %v3874_v60 = vsel %vm3853_vm14, %v3836_v29, %v3371_v6  ;;  %v8690_v6 = vld [vmem:[#allocation34_spill] sm:$0xff] }
 0x58c   : > { %v3099_v50 = vpop.permute.xlu2 %3098  ;;  %v3629_v48 = vsel %vm3625_vm8, %v8691_v61, %v8690_v6  ;;  %v8711_v6 = vld [vmem:[#allocation39_spill] sm:$0xff] }
 0x58d   : > { %v3811_v23 = vsel %vm3777_vm12, %v3773_v7, %v3099_v50  ;;  %v8693_v50 = vld [vmem:[#allocation130_spill] sm:$0xff]  ;;  %v3667_v29 = vsel %vm3663_vm9, %v3629_v48, %v8695_v19  ;;  %v8706_v7 = vld [vmem:[#allocation115_spill] sm:$0xff]  ;;  %v4732_v19 = vmov 0  }
 0x58e   : > { %4647 = vset.pattern.permute.xlu2 %v4732_v19  ;;  %4713 = vset.pattern.permute.xlu0 %v4732_v19 }
 0x58f   : > { %v3215_v30 = vpop.permute.xlu1 %3214 }
 0x592   : > { %v3555_v26 = vpop.permute.xlu0 %3554 }
 0x593   : > { %v3912_v0 = vsel %vm3891_vm15, %v3874_v60, %v3555_v26  ;;  %v8696_v60 = vld [vmem:[#allocation41_spill] sm:$0xff] }
 0x594   : > { %v4012_v62 = vrot.slane %v3912_v0, 1  ;;  %v3213_v38 = vpop.permute.xlu2 %3212  ;;  %v3705_v26 = vsel %vm3701_vm10, %v3667_v29, %v8696_v60  ;;  %v8712_v60 = vld [vmem:[#allocation107_spill] sm:$0xff] }
 0x595   : > { %v3849_v37 = vsel %vm3815_vm13, %v3811_v23, %v3213_v38  ;;  %v8697_v38 = vld [vmem:[#allocation55_spill] sm:$0xff]  ;;  %v8707_v23 = vld [vmem:[#allocation38_spill] sm:$0xff] }
 0x596   : > { %v4015_v8 = vsel %vm356_vm0, %v4012_v62, %v4014_v27  ;;  %v3774_v27 = vsel %vm3739_vm11, %v3736_v51, %v8684_v59 }
 0x597   : > { %v3399_v21 = vpop.permute.xlu1 %3398  ;;  %4581 = vmatpush.xpose.msk.msra.mxu1 %vm4046_vm1, %v4015_v8  ;;  %v3812_v14 = vsel %vm3777_vm12, %v3774_v27, %v3101_v12  ;;  %v8688_v12 = vld [vmem:[#allocation118_spill] sm:$0xff]  ;;  %v3743_v8 = vsel %vm3739_vm11, %v3705_v26, %v8697_v38  ;;  %v8713_v26 = vld [vmem:[#allocation52_spill] sm:$0xff] }
 0x598   : > { %v3850_v58 = vsel %vm3815_vm13, %v3812_v14, %v3215_v30  ;;  %v3645_v53 = vsel %vm3625_vm8, %v8689_v57, %v8688_v12  ;;  %v3781_v63 = vsel %vm3777_vm12, %v3743_v8, %v8699_v10  ;;  %v8714_v8 = vld [vmem:[#allocation26_spill] sm:$0xff] }
 0x599   : > { %v3888_v5 = vsel %vm3853_vm14, %v3850_v58, %v3399_v21 }
 0x59a   : > { %v3185_v2 = vpop.permute.xlu0 %3184 }
 0x59c   : > { %v3397_v40 = vpop.permute.xlu2 %3396 }
 0x59d   : > { %v3887_v52 = vsel %vm3853_vm14, %v3849_v37, %v3397_v40  ;;  %v8708_v37 = vld [vmem:[#allocation119_spill] sm:$0xff] }
 0x59f   : > { %v3583_v46 = vpop.permute.xlu1 %3582 }
 0x5a0   : > { %v3926_v1 = vsel %vm3891_vm15, %v3888_v5, %v3583_v46  ;;  %v3644_v5 = vsel %vm3625_vm8, %v8701_v41, %v8700_v25  ;;  %v8702_v46 = vld [vmem:[#allocation17_spill] sm:$0xff] }
 0x5a1   : > { %v4040_v32 = vrot.slane %v3926_v1, 1  ;;  %v3628_v31 = vsel %vm3625_vm8, %v8703_v36, %v8702_v46  ;;  %v8705_v1 = vld [vmem:[#allocation24_spill] sm:$0xff] }
 0x5a2   : > { %v3153_v20 = vpop.permute.xlu0 %3152  ;;  %v3666_v9 = vsel %vm3663_vm9, %v3628_v31, %v8705_v1  ;;  %v8723_v36 = vld [vmem:[#allocation32_spill] sm:$0xff] }
 0x5a3   : > { %v4043_v55 = vsel %vm356_vm0, %v4040_v32, %v4042_v33  ;;  %v3683_v33 = vsel %vm3663_vm9, %v3645_v53, %v8692_v43  ;;  %v8710_v53 = vld [vmem:[#allocation29_spill] sm:$0xff] }
 0x5a4   : > { %4588 = vmatpush.xpose.msk.msra.mxu2 %vm4046_vm1, %v4043_v55  ;;  %v3581_v28 = vpop.permute.xlu2 %3580  ;;  %v3721_v15 = vsel %vm3701_vm10, %v3683_v33, %v8693_v50 }
 0x5a5   : > { %v3925_v49 = vsel %vm3891_vm15, %v3887_v52, %v3581_v28  ;;  %v3759_v30 = vsel %vm3739_vm11, %v3721_v15, %v8694_v17  ;;  %v8709_v28 = vld [vmem:[#allocation123_spill] sm:$0xff] }
 0x5a6   : > { %v4038_v54 = vrot.slane %v3925_v49, 1  ;;  %v3797_v22 = vsel %vm3777_vm12, %v3759_v30, %v8698_v3  ;;  %v3930_v30 = vld [vmem:[%s8211_s4] sm:$0xf]  ;;  %v3627_v3 = vsel %vm3625_vm8, 0.0, %v8714_v8 }
 0x5a7   : > { %v3369_v39 = vpop.permute.xlu1 %3368  ;;  %v3835_v11 = vsel %vm3815_vm13, %v3797_v22, %v3185_v2  ;;  %3933 = vperm.xlu2 %4647, %v3930_v30   ;;  %v8715_v22 = vld [vmem:[#allocation111_spill] sm:$0xff] }
 0x5a8   : > { %v4041_v34 = vsel %vm356_vm0, %v4038_v54, %v4040_v32  ;;  %v4039_v0 = vsel %vm356_vm0, %v4036_v47, %v4038_v54  ;;  %v3873_v21 = vsel %vm3853_vm14, %v3835_v11, %v3369_v39  ;;  %v3819_v47 = vsel %vm3815_vm13, %v3781_v63, %v3153_v20  ;;  %v8717_v63 = vld [vmem:[#allocation18_spill] sm:$0xff] }
 0x5a9   : > { %4589 = vmatpush.xpose.msk.msra.mxu2 %vm4046_vm1, %v4041_v34  ;;  %v3704_v20 = vsel %vm3701_vm10, %v3666_v9, %v8707_v23  ;;  %v8724_v9 = vld [vmem:[#allocation8_spill] sm:$0xff]  ;;  %v8725_v23 = vld [vmem:[#allocation22_spill] sm:$0xff] }
 0x5aa   : > { %v3337_v13 = vpop.permute.xlu0 %3336  ;;  %v3742_v49 = vsel %vm3739_vm11, %v3704_v20, %v8710_v53 }
 0x5ab   : > { %v3857_v18 = vsel %vm3853_vm14, %v3819_v47, %v3337_v13  ;;  %v3780_v61 = vsel %vm3777_vm12, %v3742_v49, %v8711_v6  ;;  %v8718_v47 = vld [vmem:[#allocation36_spill] sm:$0xff] }
 0x5ac   : > { %v3335_v58 = vpop.permute.xlu2 %3334 }
 0x5ad   : > { %4590 = vmatpush.xpose.msk.msra.mxu2 %vm4046_vm1, %v4039_v0  ;;  %v3643_v0 = vsel %vm3625_vm8, %v8713_v26, %v8712_v60 }
 0x5ae   : > { %v3681_v11 = vsel %vm3663_vm9, %v3643_v0, %v8715_v22 }
 0x5af   : > { %v3553_v56 = vpop.permute.xlu1 %3552 }
 0x5b0   : > { %v3911_v45 = vsel %vm3891_vm15, %v3873_v21, %v3553_v56  ;;  %v8716_v56 = vld [vmem:[#allocation120_spill] sm:$0xff] }
 0x5b1   : > { %v4010_v51 = vrot.slane %v3911_v45, 1  ;;  %v3719_v10 = vsel %vm3701_vm10, %v3681_v11, %v8716_v56  ;;  %v3665_v45 = vsel %vm3663_vm9, %v3627_v3, %v8717_v63 }
 0x5b2   : > { %v3521_v35 = vpop.permute.xlu0 %3520 }
 0x5b3   : > { %v4013_v24 = vsel %vm356_vm0, %v4010_v51, %v4012_v62  ;;  %v3895_v59 = vsel %vm3891_vm15, %v3857_v18, %v3521_v35  ;;  %v8028_v62 = vld [vmem:[%s8210_s3] sm:$0xf] }
 0x5b4   : > { %4582 = vmatpush.xpose.msk.msra.mxu1 %vm4046_vm1, %v4013_v24  ;;  %v3978_v2 = vrot.slane %v3895_v59, 1  ;;  %4591 = vmatmul.msk.f32.vlgmr.msra.gmra.mxu2 %vm4046_vm1, %v8028_v62  ;;  %v3181_v34 = vpop.permute.xlu2 %3180  ;;  %v8719_v18 = vld [vmem:[#allocation117_spill] sm:$0xff] }
 0x5b5   : > { %v3757_v35 = vsel %vm3739_vm11, %v3719_v10, %v8719_v18 }
 0x5b6   : > { %v3981_v27 = vsel %vm356_vm0, %v3978_v2, %v3980_v44  ;;  %v3682_v44 = vsel %vm3663_vm9, %v3644_v5, %v8704_v16  ;;  %v8722_v5 = vld [vmem:[#allocation6_spill] sm:$0xff] }
 0x5b7   : > { %v3183_v40 = vpop.permute.xlu1 %3182  ;;  %4565 = vmatpush.xpose.msk.msra.mxu0 %vm4046_vm1, %v3981_v27  ;;  %v3720_v32 = vsel %vm3701_vm10, %v3682_v44, %v8706_v7  ;;  %v8720_v27 = vld [vmem:[#allocation42_spill] sm:$0xff]  ;;  %v3626_v46 = vsel %vm3625_vm8, 0.0, %v8722_v5  ;;  %vm4249_vm8 = vcmask 900096  }
 0x5b8   : > { %v3758_v55 = vsel %vm3739_vm11, %v3720_v32, %v8708_v37  ;;  %v3664_v7 = vsel %vm3663_vm9, %v3626_v46, %v8724_v9  ;;  %vm4273_vm9 = vcmask 883712  }
 0x5b9   : > { %v3796_v12 = vsel %vm3777_vm12, %v3758_v55, %v8709_v28  ;;  %v3702_v20 = vsel %vm3701_vm10, %v3664_v7, %v8725_v23 }
 0x5ba   : > { %v3151_v14 = vpop.permute.xlu0 %3150  ;;  %v3834_v57 = vsel %vm3815_vm13, %v3796_v12, %v3183_v40 }
 0x5bb   : > { %v3818_v43 = vsel %vm3815_vm13, %v3780_v61, %v3151_v14 }
 0x5bc   : > { %v3856_v15 = vsel %vm3853_vm14, %v3818_v43, %v3335_v58  ;;  %v3333_v24 = vpop.permute.xlu2 %3332 }
 0x5bf   : > { %v3367_v52 = vpop.permute.xlu1 %3366 }
 0x5c0   : > { %v3872_v54 = vsel %vm3853_vm14, %v3834_v57, %v3367_v52  ;;  %v8726_v52 = vld [vmem:[#allocation28_spill] sm:$0xff] }
 0x5c1   : > { %v3740_v28 = vsel %vm3739_vm11, %v3702_v20, %v8726_v52 }
 0x5c2   : > { %v3551_v39 = vpop.permute.xlu0 %3550 }
 0x5c3   : > { %v3910_v48 = vsel %vm3891_vm15, %v3872_v54, %v3551_v39  ;;  %v8727_v39 = vld [vmem:[#allocation30_spill] sm:$0xff] }
 0x5c4   : > { %v4008_v33 = vrot.slane %v3910_v48, 1  ;;  %v3147_v57 = vpop.permute.xlu2 %3146  ;;  %v3778_v6 = vsel %vm3777_vm12, %v3740_v28, %v8727_v39 }
 0x5c5   : > { %v3816_v48 = vsel %vm3815_vm13, %v3778_v6, %v3147_v57 }
 0x5c6   : > { %v4011_v50 = vsel %vm356_vm0, %v4008_v33, %v4010_v51  ;;  %v3703_v51 = vsel %vm3701_vm10, %v3665_v45, %v8718_v47  ;;  %vm4261_vm10 = vcmask 891904  }
 0x5c7   : > { %v3519_v17 = vpop.permute.xlu1 %3518  ;;  %4583 = vmatpush.xpose.msk.msra.mxu1 %vm4046_vm1, %v4011_v50  ;;  %v3741_v40 = vsel %vm3739_vm11, %v3703_v51, %v8720_v27  ;;  %vm4225_vm11 = vcmask 1039360  }
 0x5c8   : > { %v3894_v13 = vsel %vm3891_vm15, %v3856_v15, %v3519_v17  ;;  %v3779_v31 = vsel %vm3777_vm12, %v3741_v40, %v8723_v36  ;;  %v4185_v15 = vld [vmem:[%s8209_s2] sm:$0x7] }
 0x5c9   : > { %v3976_v29 = vrot.slane %v3894_v13, 1  ;;  %v4189_v13 = vperm.slane %v4185_v15, 2  ;;  %v4188_v0 = vperm.slane %v4185_v15, 1  ;;  %v4187_v22 = vperm.slane %v4185_v15, 0 }
 0x5ca   : > { %v3149_v38 = vpop.permute.xlu0 %3148 }
 0x5cb   : > { %v3979_v21 = vsel %vm356_vm0, %v3976_v29, %v3978_v2  ;;  %v8721_v2 = vld [vmem:[#allocation121_spill] sm:$0xff]  ;;  %v3817_v44 = vsel %vm3815_vm13, %v3779_v31, %v3149_v38 }
 0x5cc   : > { %4566 = vmatpush.xpose.msk.msra.mxu0 %vm4046_vm1, %v3979_v21  ;;  %v3795_v14 = vsel %vm3777_vm12, %v3757_v35, %v8721_v2  ;;  %v3855_v37 = vsel %vm3853_vm14, %v3817_v44, %v3333_v24  ;;  %vm4373_vm12 = vcmask 908288  }
 0x5cd   : > { %v3833_v58 = vsel %vm3815_vm13, %v3795_v14, %v3181_v34  ;;  %vm4474_vm13 = vcmask 257024  }
 0x5cf   : > { %v3365_v59 = vpop.permute.xlu1 %3364 }
 0x5d0   : > { %v3871_v25 = vsel %vm3853_vm14, %v3833_v58, %v3365_v59 }
 0x5d2   : > { %v3549_v41 = vpop.permute.xlu0 %3548 }
 0x5d3   : > { %v3909_v16 = vsel %vm3891_vm15, %v3871_v25, %v3549_v41 }
 0x5d4   : > { %v4006_v1 = vrot.slane %v3909_v16, 1 }
 0x5d6   : > { %v4009_v32 = vsel %vm356_vm0, %v4006_v1, %v4008_v33  ;;  %v4007_v54 = vsel %vm356_vm0, %v4004_v42, %v4006_v1 }
 0x5d7   : > { %v3517_v55 = vpop.permute.xlu1 %3516  ;;  %4584 = vmatpush.xpose.msk.msra.mxu1 %vm4046_vm1, %v4009_v32 }
 0x5d8   : > { %v3893_v12 = vsel %vm3891_vm15, %v3855_v37, %v3517_v55 }
 0x5d9   : > { %v3974_v53 = vrot.slane %v3893_v12, 1 }
 0x5da   : > { %v3331_v49 = vpop.permute.xlu0 %3330 }
 0x5db   : > { %v3977_v61 = vsel %vm356_vm0, %v3974_v53, %v3976_v29  ;;  %4585 = vmatpush.xpose.msk.msra.mxu1 %vm4046_vm1, %v4007_v54  ;;  %v3854_v43 = vsel %vm3853_vm14, %v3816_v48, %v3331_v49 }
 0x5dc   : > { %4567 = vmatpush.xpose.msk.msra.mxu0 %vm4046_vm1, %v3977_v61 }
 0x5de   : > { %4586 = vmatmul.msk.f32.vlgmr.msra.gmra.mxu1 %vm4046_vm1, %v8028_v62 }
 0x5df   : > { %v3515_v33 = vpop.permute.xlu1 %3514 }
 0x5e0   : > { %v3892_v4 = vsel %vm3891_vm15, %v3854_v43, %v3515_v33 }
 0x5e1   : > { %v3973_v42 = vrot.slane %v3892_v4, 1 }
 0x5e3   : > { %v3975_v34 = vsel %vm356_vm0, %v3973_v42, %v3974_v53  ;;  %vm4205_vm0 = vcmask 293888  }
 0x5e4   : > { %4568 = vmatpush.xpose.msk.msra.mxu0 %vm4046_vm1, %v3975_v34 }
 0x5e7   : > { %4569 = vmatmul.msk.f32.vlgmr.msra.gmra.mxu0 %vm4046_vm1, %v8028_v62 }
 0x601   : > { %v3934_v50 = vpop.permute.xlu2 %3933 }
 0x637   : > { %v4179_v17 = vpop.f32.mrf.mxu2 }
 0x638   : > { %v4180_v30 = vadd.f32 %v4179_v17, %v3934_v50 }
 0x63a   : > { %v4184_v19 = vmax.f32 %v4180_v30, 0.0 }
 0x63c   : > { %v4195_v29 = vmul.f32 %v4189_v13, %v4184_v19 }
 0x63e   : > { %4203 = vrot.lane.b32.xlu1 %v4195_v29, %s4733_s28 }
 0x65b   : > { %v4159_v60 = vpop.f32.mrf.mxu1 }
 0x65c   : > { %v4160_v26 = vadd.f32 %v4159_v60, %v3934_v50 }
 0x65e   : > { %v4183_v38 = vmax.f32 %v4160_v26, 0.0 }
 0x660   : > { %v4194_v8 = vmul.f32 %v4188_v0, %v4183_v38 }
 0x662   : > { %4201 = vrot.lane.b32.xlu0 %v4194_v8, %s4733_s28 }
 0x664   : > { %v4139_v3 = vpop.f32.mrf.mxu0 }
 0x665   : > { %v4140_v62 = vadd.f32 %v4139_v3, %v3934_v50 }
 0x667   : > { %v4182_v11 = vmax.f32 %v4140_v62, 0.0 }
 0x669   : > { %v4193_v21 = vmul.f32 %v4187_v22, %v4182_v11 }
 0x66b   : > { %4199 = vrot.lane.b32.xlu2 %v4193_v21, %s4733_s28 }
 0x6b0   : > { %v4204_v51 = vpop.permute.xlu1 %4203 }
 0x6c5   : > { %v4200_v56 = vpop.permute.xlu2 %4199 }
 0x6c6   : > { %v8122_v10 = vsel %vm4205_vm0, 0.0, %v4200_v56 }
 0x6c7   : > { %4303 = vrot.lane.b32.xlu0 %v8122_v10, %s4734_s29  ;;  %v4216_v59 = vrot.slane %v8122_v10, 4 }
 0x6d4   : > { %v4202_v63 = vpop.permute.xlu0 %4201 }
 0x6d5   : > { %v8126_v45 = vsel %vm4205_vm0, %v4200_v56, %v4202_v63  ;;  %v4207_v18 = vsel %vm4205_vm0, %v4202_v63, %v4204_v51 }
 0x6d6   : > { %4305 = vrot.lane.b32.xlu1 %v8126_v45, %s4734_s29  ;;  %v4658_v47 = vpack.i.bf16 %v8126_v45, %v8122_v10  ;;  %v8132_v35 = vsel %vm4212_vm2, %v4207_v18, 0.0  ;;  %v4217_v24 = vrot.slane %v8126_v45, 4 }
 0x6d7   : > { %v4218_v40 = vrot.slane %v8132_v35, 4 }
 0x6d8   : > { %4659 = vrot.lane.b32.xlu2 %v4658_v47, %s4735_s30  ;;  %4649 = vrot.lane.b32.xlu0 %v4658_v47, %s4736_s8  ;;  %v4668_v27 = vpack.i.bf16 %v4217_v24, %v4216_v59 }
 0x6de   : > { %4654 = vrot.lane.b32.xlu1 %v4658_v47, %s4737_s9 }
 0x6e0   : > { %4235 = vrot.lane.b32.xlu0 %v8132_v35, %s4735_s30  ;;  %4307 = vrot.lane.b32.xlu2 %v8132_v35, %s4734_s29 }
 0x6e6   : > { %4283 = vrot.lane.b32.xlu1 %v8132_v35, %s4736_s8 }
 0x6e8   : > { %4669 = vrot.lane.b32.xlu0 %v4668_v27, %s4738_s10  ;;  %4259 = vrot.lane.b32.xlu2 %v8132_v35, %s4737_s9 }
 0x6ee   : > { %4674 = vrot.lane.b32.xlu1 %v4668_v27, %s4739_s11 }
 0x6f0   : > { %4664 = vrot.lane.b32.xlu2 %v4668_v27, %s4740_s12  ;;  %4295 = vrot.lane.b32.xlu0 %v4218_v40, %s4740_s12 }
 0x6f6   : > { %4271 = vrot.lane.b32.xlu1 %v4218_v40, %s4738_s10 }
 0x6f8   : > { %4247 = vrot.lane.b32.xlu2 %v4218_v40, %s4739_s11  ;;  %4679 = vrot.lane.b32.xlu0 %v4668_v27, %s4741_s13 }
 0x6fe   : > { %4223 = vrot.lane.b32.xlu1 %v4218_v40, %s4741_s13 }
 0x732   : > { %v4660_v2 = vpop.permute.xlu2 %4659 }
 0x733   : > { %v4662_v7 = vunpack.i.h.bf16 %v4660_v2  ;;  %v4661_v32 = vunpack.i.l.bf16 %v4660_v2 }
 0x735   : > { %v4238_v52 = vsel %vm4237_vm5, %v4661_v32, %v4662_v7 }
 0x739   : > { %v4304_v14 = vpop.permute.xlu0 %4303 }
 0x73a   : > { %v8141_v58 = vpop.permute.xlu2 %4307 }
 0x742   : > { %v4260_v36 = vpop.permute.xlu2 %4259 }
 0x748   : > { %v4306_v25 = vpop.permute.xlu1 %4305 }
 0x749   : > { %v4310_v41 = vsel %vm4309_vm4, %v4304_v14, %v4306_v25  ;;  %v4311_v5 = vsel %vm4309_vm4, %v4306_v25, %v8141_v58 }
 0x74a   : > { %v4650_v46 = vpop.permute.xlu0 %4649  ;;  %4369 = vrot.lane.b32.xlu0 %v4311_v5, %s4742_s14  ;;  %4367 = vrot.lane.b32.xlu2 %v4310_v41, %s4742_s14  ;;  %v4665_v44 = vpop.permute.xlu2 %4664  ;;  %v4325_v41 = vld [vmem:[%s8213_s6] sm:$0xf] }
 0x74b   : > { %v4652_v23 = vunpack.i.h.bf16 %v4650_v46  ;;  %v4651_v20 = vunpack.i.l.bf16 %v4650_v46  ;;  %v4667_v37 = vunpack.i.h.bf16 %v4665_v44  ;;  %v4666_v55 = vunpack.i.l.bf16 %v4665_v44 }
 0x74d   : > { %v4286_v12 = vsel %vm4285_vm6, %v4651_v20, %v4652_v23  ;;  %v4298_v49 = vsel %vm4297_vm7, %v4666_v55, %v4667_v37 }
 0x74e   : > { %v4321_v34 = vsel %vm2180_vm3, %v4286_v12, %v4298_v49  ;;  %v4324_v49 = vld [vmem:[%s8212_s5] sm:$0xf] }
 0x750   : > { %v4655_v31 = vpop.permute.xlu1 %4654 }
 0x751   : > { %v4657_v30 = vunpack.i.h.bf16 %v4655_v31  ;;  %v4656_v13 = vunpack.i.l.bf16 %v4655_v31 }
 0x752   : > { %v8146_v16 = vpop.permute.xlu0 %4235  ;;  %v4248_v39 = vpop.permute.xlu2 %4247 }
 0x753   : > { %v4239_v54 = vsel %vm4237_vm5, %v4662_v7, %v8146_v16  ;;  %v4262_v0 = vsel %vm4261_vm10, %v4656_v13, %v4657_v30  ;;  %v4263_v38 = vsel %vm4261_vm10, %v4657_v30, %v4260_v36  ;;  %v4317_v25 = vsel %vm2180_vm3, %v8146_v16, %v4248_v39 }
 0x758   : > { %v4284_v1 = vpop.permute.xlu1 %4283 }
 0x759   : > { %v4287_v6 = vsel %vm4285_vm6, %v4652_v23, %v4284_v1 }
 0x75a   : > { %v4670_v9 = vpop.permute.xlu0 %4669 }
 0x75b   : > { %v4672_v61 = vunpack.i.h.bf16 %v4670_v9  ;;  %v4671_v43 = vunpack.i.l.bf16 %v4670_v9 }
 0x75d   : > { %v4274_v60 = vsel %vm4273_vm9, %v4671_v43, %v4672_v61 }
 0x75e   : > { %v4318_v62 = vsel %vm2180_vm3, %v4262_v0, %v4274_v60 }
 0x760   : > { %v4675_v28 = vpop.permute.xlu1 %4674 }
 0x761   : > { %v4677_v57 = vunpack.i.h.bf16 %v4675_v28  ;;  %v4676_v53 = vunpack.i.l.bf16 %v4675_v28 }
 0x762   : > { %v4296_v48 = vpop.permute.xlu0 %4295 }
 0x763   : > { %v4251_v33 = vsel %vm4249_vm8, %v4677_v57, %v4248_v39  ;;  %v4250_v4 = vsel %vm4249_vm8, %v4676_v53, %v4677_v57  ;;  %v4299_v42 = vsel %vm4297_vm7, %v4667_v37, %v4296_v48  ;;  %v4323_v47 = vsel %vm2180_vm3, %v4284_v1, %v4296_v48 }
 0x764   : > { %v4322_v50 = vsel %vm2180_vm3, %v4287_v6, %v4299_v42  ;;  %v4315_v15 = vsel %vm2180_vm3, %v4238_v52, %v4250_v4  ;;  %v4316_v17 = vsel %vm2180_vm3, %v4239_v54, %v4251_v33 }
 0x765   : > { %v4683_v19 = vpack.i.bf16 %v4322_v50, %v4321_v34  ;;  %v4693_v29 = vpack.i.bf16 %v4316_v17, %v4315_v15 }
 0x767   : > { %4684 = vrot.lane.b32.xlu1 %v4683_v19, %s4742_s14  ;;  %4694 = vrot.lane.b32.xlu0 %v4693_v29, %s4742_s14 }
 0x768   : > { %v4272_v26 = vpop.permute.xlu1 %4271 }
 0x769   : > { %v4275_v8 = vsel %vm4273_vm9, %v4672_v61, %v4272_v26  ;;  %v4320_v3 = vsel %vm2180_vm3, %v4260_v36, %v4272_v26 }
 0x76a   : > { %v4319_v22 = vsel %vm2180_vm3, %v4263_v38, %v4275_v8  ;;  %v4680_v11 = vpop.permute.xlu0 %4679  ;;  %v4703_v51 = vpack.i.bf16 %v4320_v3, %v4323_v47 }
 0x76b   : > { %v4688_v21 = vpack.i.bf16 %v4319_v22, %v4318_v62  ;;  %v4682_v56 = vunpack.i.h.bf16 %v4680_v11  ;;  %v4681_v63 = vunpack.i.l.bf16 %v4680_v11 }
 0x76d   : > { %4689 = vrot.lane.b32.xlu2 %v4688_v21, %s4742_s14  ;;  %v4226_v18 = vsel %vm4225_vm11, %v4681_v63, %v4682_v56 }
 0x76e   : > { %v4312_v27 = vsel %vm2180_vm3, %v8122_v10, %v4226_v18 }
 0x76f   : > { %4704 = vrot.lane.b32.xlu0 %v4703_v51, %s4742_s14 }
 0x770   : > { %v4224_v24 = vpop.permute.xlu1 %4223 }
 0x771   : > { %v4227_v59 = vsel %vm4225_vm11, %v4682_v56, %v4224_v24  ;;  %v4314_v14 = vsel %vm2180_vm3, %v8132_v35, %v4224_v24 }
 0x772   : > { %v4313_v40 = vsel %vm2180_vm3, %v8126_v45, %v4227_v59  ;;  %v4708_v10 = vpack.i.bf16 %v4314_v14, %v4317_v25 }
 0x773   : > { %v4698_v2 = vpack.i.bf16 %v4313_v40, %v4312_v27 }
 0x775   : > { %4699 = vrot.lane.b32.xlu1 %v4698_v2, %s4742_s14  ;;  %4371 = vrot.lane.b32.xlu2 %v8141_v58, %s4742_s14 }
 0x77d   : > { %4709 = vrot.lane.b32.xlu1 %v4708_v10, %s4742_s14  ;;  %4328 = vperm.xlu2 %4647, %v4325_v41  }
 0x7a4   : > { %v4368_v45 = vpop.permute.xlu2 %4367 }
 0x7bc   : > { %v4370_v5 = vpop.permute.xlu0 %4369 }
 0x7bd   : > { %v4382_v46 = vsel %vm4373_vm12, %v4368_v45, %v4370_v5 }
 0x7be   : > { %4592 = vmatpush.msk.msra.mxu3 %vm2180_vm3, %v4382_v46 }
 0x7c7   : > { %v4690_v58 = vpop.permute.xlu2 %4689 }
 0x7c8   : > { %v4692_v16 = vunpack.i.h.bf16 %v4690_v58  ;;  %v4691_v44 = vunpack.i.l.bf16 %v4690_v58 }
 0x7ca   : > { %v4378_v20 = vsel %vm4373_vm12, %v4691_v44, %v4692_v16 }
 0x7cf   : > { %v4372_v35 = vpop.permute.xlu2 %4371 }
 0x7d0   : > { %4596 = vmatpush.msk.msrb.mxu2 %vm2180_vm3, %v4372_v35  ;;  %v4383_v39 = vsel %vm4373_vm12, %v4370_v5, %v4372_v35 }
 0x7d7   : > { %v4329_v50 = vpop.permute.xlu2 %4328 }
 0x7d9   : > { %v4685_v36 = vpop.permute.xlu1 %4684  ;;  %v4695_v31 = vpop.permute.xlu0 %4694 }
 0x7da   : > { %v4687_v1 = vunpack.i.h.bf16 %v4685_v36  ;;  %v4686_v9 = vunpack.i.l.bf16 %v4685_v36  ;;  %v4697_v7 = vunpack.i.h.bf16 %v4695_v31  ;;  %v4696_v32 = vunpack.i.l.bf16 %v4695_v31 }
 0x7dc   : > { %v4380_v23 = vsel %vm4373_vm12, %v4686_v9, %v4687_v1  ;;  %v4376_v37 = vsel %vm4373_vm12, %v4696_v32, %v4697_v7 }
 0x7dd   : > { %4417 = vmatpush.msra.mxu3 %v4380_v23 }
 0x7df   : > { %4418 = vmatpush.msra.mxu3 %v4378_v20 }
 0x7e1   : > { %v4705_v55 = vpop.permute.xlu0 %4704  ;;  %4419 = vmatpush.msra.mxu3 %v4376_v37 }
 0x7e2   : > { %v4706_v52 = vunpack.i.l.bf16 %v4705_v55  ;;  %v4707_v28 = vunpack.i.h.bf16 %v4705_v55 }
 0x7e4   : > { %4457 = vmatpush.msrb.mxu2 %v4706_v52  ;;  %v4381_v6 = vsel %vm4373_vm12, %v4687_v1, %v4706_v52  ;;  %v4379_v33 = vsel %vm4373_vm12, %v4692_v16, %v4707_v28 }
 0x7e6   : > { %4458 = vmatpush.msrb.mxu2 %v4707_v28 }
 0x7e7   : > { %v4700_v12 = vpop.permute.xlu1 %4699 }
 0x7e8   : > { %v4702_v57 = vunpack.i.h.bf16 %v4700_v12  ;;  %v4701_v53 = vunpack.i.l.bf16 %v4700_v12 }
 0x7ea   : > { %v4374_v54 = vsel %vm4373_vm12, %v4701_v53, %v4702_v57 }
 0x7eb   : > { %4420 = vmatpush.msra.mxu3 %v4374_v54 }
 0x7ec   : > { %4593 = vmatmul.msk.f32.vlgmr.msra.gmra.mxu3 %vm4205_vm0, %v4324_v49 }
 0x7ed   : > { %4594 = vmatpush.msk.msrb.mxu3 %vm2180_vm3, %v4383_v39 }
 0x7ef   : > { %4437 = vmatpush.msrb.mxu3 %v4381_v6  ;;  %v4710_v61 = vpop.permute.xlu1 %4709 }
 0x7f0   : > { %v4712_v48 = vunpack.i.h.bf16 %v4710_v61  ;;  %v4711_v43 = vunpack.i.l.bf16 %v4710_v61 }
 0x7f1   : > { %4438 = vmatpush.msrb.mxu3 %v4379_v33 }
 0x7f2   : > { %4459 = vmatpush.msrb.mxu2 %v4711_v43  ;;  %v4377_v4 = vsel %vm4373_vm12, %v4697_v7, %v4711_v43  ;;  %v4375_v42 = vsel %vm4373_vm12, %v4702_v57, %v4712_v48 }
 0x7f3   : > { %4439 = vmatpush.msrb.mxu3 %v4377_v4 }
 0x7f4   : > { %4460 = vmatpush.msrb.mxu2 %v4712_v48 }
 0x7f5   : > { %4440 = vmatpush.msrb.mxu3 %v4375_v42  ;;  %4597 = vmatmul.msk.f32.vlgmr.msrb.gmra.mxu2 %vm4205_vm0, %v4324_v49 }
 0x7f6   : > { %4595 = vmatmul.msk.f32.vlgmr.msrb.gmra.mxu3 %vm4205_vm0, %v4324_v49 }
 0x86f   : > { %v4422_v34 = vpop.f32.mrf.mxu3 }
 0x870   : > { %v4423_v13 = vadd.f32 %v4422_v34, %v4329_v50 }
 0x872   : > { %v4465_v26 = vmax.f32 %v4423_v13, 0.0 }
 0x878   : > { %v4462_v15 = vpop.f32.mrf.mxu2 }
 0x879   : > { %v4463_v17 = vadd.f32 %v4462_v15, %v4329_v50  ;;  %v4442_v30 = vpop.f32.mrf.mxu3 }
 0x87a   : > { %v4443_v19 = vadd.f32 %v4442_v30, %v4329_v50 }
 0x87b   : > { %v4467_v29 = vmax.f32 %v4463_v17, 0.0 }
 0x87c   : > { %v4466_v60 = vmax.f32 %v4443_v19, 0.0 }
 0x87d   : > { %4475 = vst.msk [vmem:[%s298_s22 + $0x8] sm:$0xf] %vm4474_vm13, %v4467_v29 }
 0x87e   : > { %v4470_v0 = vrot.slane %v4466_v60, 4 }
 0x880   : > { %v4471_v38 = vsel %vm2180_vm3, %v4465_v26, %v4470_v0 }
 0x881   : > { %4473 = vst [vmem:[%s298_s22] sm:$0xff] %v4471_v38 }
 0x882 PF: > { %s17_s24 = sadd.s32 1, %s4720_s24  }
 0x883   : > { %p14_p4 = scmp.ge.s32.totalorder %s17_s24, 4  }
 0x885   :  { %16 = sbr.rel (!%p14_p4) target bundleno = 1 (0x1), region = 102 }

</bundles_post_ra>
